<compile_context>
chip_gen: v7x
topology: tpu7x:2x2x1
jax: 0.10.0
libtpu: 0.0.40
codegen_flags: <defaults>
</compile_context>

<pallas_src>
import functools

import jax
import jax.numpy as jnp
from jax.experimental import pallas as pl
from jax.experimental.pallas import tpu as pltpu

_SQRT2_INV = 0.7071067811865476
_MiB = 1024 * 1024


def _gelu_exact(t):
    # PyTorch nn.GELU() default = exact erf-based GELU.
    # (Switch to the tanh approximation only if profiling shows the VALU slot
    #  saturating and bit-parity with the PyTorch module is not required.)
    return 0.5 * t * (1.0 + jax.lax.erf(t * _SQRT2_INV))


def _lora_tac_mlp4_kernel(x_ref, u_ref, v_ref, bft_ref, win_ref, bin_ref,
                          wout_ref, bo_ref, o_ref, weff_ref, *, compute_dtype):
    fi = pl.program_id(1)
    K, FT, Cin = x_ref.shape[1], x_ref.shape[2], x_ref.shape[3]
    twoH = win_ref.shape[1]
    H = twoH // 2
    R = u_ref.shape[3]

    # ---- Fold LoRA into the output weight ONCE per batch element (fi == 0 only):
    #      W_eff_k = W_out^T + v_k @ u_k^T / (2H*R).  fi is the inner 'arbitrary'
    #      grid axis, so every later freq tile of this batch reuses the cached scratch.
    @pl.when(fi == 0)
    def _():
        u = u_ref[0].astype(jnp.float32)                      # [K, Cout, R]
        v = v_ref[0].astype(jnp.float32)                      # [K, 2H,  R]
        scale = 1.0 / float(twoH * R)
        w_lora = jnp.einsum('khr,kor->kho', v, u,
                            preferred_element_type=jnp.float32) * scale
        weff_ref[...] = (wout_ref[...].astype(jnp.float32)[None]
                         + w_lora).astype(weff_ref.dtype)

    # ---- Fused input projection: one MXU matmul, contraction Cin, 2H=128 lanes ----
    x = x_ref[0]                                              # [K, FT, Cin]
    x2 = x.reshape(K * FT, Cin).astype(compute_dtype)
    proj = jnp.dot(x2, win_ref[...].astype(compute_dtype),
                   preferred_element_type=jnp.float32)        # f32 accumulation
    proj = proj.reshape(K, FT, twoH) + bin_ref[...].astype(jnp.float32)

    # 'ave' half uses the cross-K mean (mean commutes with the affine projection);
    # replace it with a per-lane select instead of a lane-axis concatenate, then a
    # single exact GELU over the fused 2H lanes.
    proj_mean = jnp.mean(proj, axis=0, keepdims=True)         # [1, FT, 2H]
    lane = jax.lax.broadcasted_iota(jnp.int32, proj.shape, 2)
    h = _gelu_exact(jnp.where(lane < H, proj,
                              jnp.broadcast_to(proj_mean, proj.shape)))
    # TODO(synk): nn.Dropout is stochastic only in training; identity here (eval).

    # ---- Output projection: one batched, lane-dense MXU matmul, contraction 2H ----
    out = jnp.einsum('kfh,kho->kfo', h.astype(compute_dtype), weff_ref[...],
                     preferred_element_type=jnp.float32)
    out = out + bo_ref[...].astype(jnp.float32) + bft_ref[0].astype(jnp.float32)
    o_ref[0] = _gelu_exact(out).astype(o_ref.dtype)


def _default_vmem_limit():
    """~75% of this chip's physical VMEM per core: ≈48 MiB v7x, ≈96 MiB v5e/v6e."""
    try:
        cap = pltpu.get_tpu_info().vmem_capacity_bytes
    except Exception:
        cap = 64 * _MiB                       # conservative: v7x physical size
    return int(min(cap * 3 // 4, 96 * _MiB))


def _pick_f_tile(F, K, Cin, Cout, itemsize, vmem_limit):
    """Largest multiple-of-8 divisor of F whose double-buffered x/out blocks stay
    within ~1/3 of the VMEM limit (rest: weights, W_eff scratch, temporaries).
    Big tiles matter: ~0.35 us fixed cost per grid step, and the HBM roofline wants
    >= ~1 MiB moved per step at these channel widths."""
    per_freq = K * (Cin + Cout) * itemsize * 2          # x + out, double-buffered
    cap = max(8, (vmem_limit // 3) // per_freq)
    if F <= cap:
        return F
    ft = 8
    for d in range(8, int(min(cap, F)) + 1, 8):
        if F % d == 0:
            ft = d
    return ft


def lora_tac_mlp4(x, u, v, b, params, *, f_tile=None,
                  compute_dtype=jnp.bfloat16, single_buffer_weights=True):
    """Forward pass of LoRATACMLP4 (inference: dropout = identity)."""
    B, K, F, Cin = x.shape
    H = params["w_pass"].shape[0]                 # inch // 2
    twoH = 2 * H
    Cout = params["w_out"].shape[0]
    R = u.shape[-1]
    assert v.shape == (B, K, twoH, R)
    assert u.shape == (B, K, Cout, R)
    assert params["w_out"].shape[1] == twoH
    # NOTE: lane-dense stores assume Cin/Cout are multiples of 128; pad in the caller
    # for other production widths, or the output stores become masked vst.

    # Fused input-projection weight [Cin, 2H] = [W_pass^T | W_ave^T]; lanes [0,H) are
    # the per-k 'pass' half, lanes [H,2H) the K-mean 'ave' half.
    w_in = jnp.concatenate([params["w_pass"].T, params["w_ave"].T], axis=1)
    b_in = jnp.concatenate([params["b_pass"], params["b_ave"]]).reshape(1, twoH)
    w_out_t = params["w_out"].T                   # [2H, Cout]
    b_out = params["b_out"].reshape(1, Cout)
    bft = jnp.asarray(b, x.dtype).reshape(B, 1, Cout)   # per-batch BitFit bias

    vmem_limit = _default_vmem_limit()
    itemsize = jnp.dtype(x.dtype).itemsize
    ft = _pick_f_tile(F, K, Cin, Cout, itemsize, vmem_limit) if f_tile is None else f_tile
    assert F % ft == 0, (F, ft)
    assert ft == F or ft % 8 == 0, "f_tile must be a multiple of 8 (sublane tiling)"

    kernel = functools.partial(_lora_tac_mlp4_kernel, compute_dtype=compute_dtype)

    def build(single_buf):
        # Operands whose block never changes along the inner freq axis are never
        # re-DMA'd; single-buffering them just frees their second VMEM buffer.
        pm = dict(pipeline_mode=pl.Buffered(1)) if single_buf else {}
        in_specs = [
            pl.BlockSpec((1, K, ft, Cin), lambda bi, fi: (bi, 0, fi, 0)),        # x
            pl.BlockSpec((1, K, Cout, R), lambda bi, fi: (bi, 0, 0, 0), **pm),   # u
            pl.BlockSpec((1, K, twoH, R), lambda bi, fi: (bi, 0, 0, 0), **pm),   # v
            pl.BlockSpec((1, 1, Cout), lambda bi, fi: (bi, 0, 0), **pm),         # BitFit b
            pl.BlockSpec((Cin, twoH), lambda bi, fi: (0, 0), **pm),              # W_in
            pl.BlockSpec((1, twoH), lambda bi, fi: (0, 0), **pm),                # b_in
            pl.BlockSpec((twoH, Cout), lambda bi, fi: (0, 0), **pm),             # W_out^T
            pl.BlockSpec((1, Cout), lambda bi, fi: (0, 0), **pm),                # b_out
        ]
        return pl.pallas_call(
            kernel,
            out_shape=jax.ShapeDtypeStruct((B, K, F, Cout), x.dtype),
            grid=(B, F // ft),
            in_specs=in_specs,
            out_specs=pl.BlockSpec((1, K, ft, Cout), lambda bi, fi: (bi, 0, fi, 0)),
            # Folded LoRA output weight, cached across freq tiles of one batch element.
            # TODO(synk): if production 2H*Cout makes this tens of MiB (v7x budget),
            # switch to the rank-R form ((h @ v_k) @ u_k^T) instead of folding.
            scratch_shapes=[pltpu.VMEM((K, twoH, Cout), compute_dtype)],
            compiler_params=pltpu.CompilerParams(
                # batch is the megacore-parallel axis (keep >=2 units per call on v7x;
                # if B==1 in production, tile on fi instead and drop the W_eff cache);
                # freq tiles must stay sequential so the cached W_eff scratch is valid.
                dimension_semantics=("parallel", "arbitrary"),
                vmem_limit_bytes=vmem_limit,
            ),
        )

    args = (x, u, v, bft, w_in, b_in, w_out_t, b_out)
    if single_buffer_weights:
        try:
            return build(True)(*args)
        except Exception:
            pass  # this JAX rejected pipeline_mode=Buffered(1); use default buffering
    return build(False)(*args)


def _reference(x, u, v, b, params):
    """Pure-JAX mirror of the PyTorch forward (eval mode)."""
    K = x.shape[1]
    y = x @ params["w_ave"].T + params["b_ave"]
    y = jnp.tile(jnp.mean(y, axis=1, keepdims=True), (1, K, 1, 1))
    xp = x @ params["w_pass"].T + params["b_pass"]
    h = _gelu_exact(jnp.concatenate([xp, y], axis=-1))
    z = jnp.mean(v[..., None, :, :] * h[..., None], axis=-2)
    z = jnp.mean(u[..., None, :, :] * z[..., None, :], axis=-1)
    out = h @ params["w_out"].T + params["b_out"] + z + b[:, None, None, :]
    return _gelu_exact(out)


if __name__ == "__main__":
    B, K, F, R = 2, 4, 16, 4
    Cin = 128                 # lane-aligned channels -> lane-dense loads
    H = Cin // 2
    Cout = 128                # lane-dense (unmasked) output stores

    key = jax.random.PRNGKey(0)
    ks = jax.random.split(key, 10)
    params = {
        "w_pass": jax.random.normal(ks[0], (H, Cin), jnp.float32) / jnp.sqrt(float(Cin)),
        "b_pass": jax.random.normal(ks[1], (H,), jnp.float32) * 0.01,
        "w_ave":  jax.random.normal(ks[2], (H, Cin), jnp.float32) / jnp.sqrt(float(Cin)),
        "b_ave":  jax.random.normal(ks[3], (H,), jnp.float32) * 0.01,
        "w_out":  jax.random.normal(ks[4], (Cout, 2 * H), jnp.float32) / jnp.sqrt(float(2 * H)),
        "b_out":  jax.random.normal(ks[5], (Cout,), jnp.float32) * 0.01,
    }
    x = jax.random.normal(ks[6], (B, K, F, Cin), jnp.float32)
    u = jax.random.normal(ks[7], (B, K, Cout, R), jnp.float32)
    v = jax.random.normal(ks[8], (B, K, 2 * H, R), jnp.float32)
    b = jax.random.normal(ks[9], (B, Cout), jnp.float32) * 0.1

    ref = _reference(x, u, v, b, params)

    # Default path: bf16 MXU operands / f32 accumulation; f_tile=8 gives two freq
    # tiles per batch so the fi>0 reuse of the cached folded LoRA weight is exercised.
    out_bf16 = jax.block_until_ready(
        lora_tac_mlp4(x, u, v, b, params, f_tile=8, compute_dtype=jnp.bfloat16))
    assert out_bf16.shape == (B, K, F, Cout)
    err_bf16 = float(jnp.max(jnp.abs(out_bf16 - ref)))
    assert jnp.allclose(out_bf16, ref, rtol=6e-2, atol=6e-2), err_bf16

    # Exact-f32 path (bit-parity check with the PyTorch-style reference).
    out_f32 = jax.block_until_ready(
        lora_tac_mlp4(x, u, v, b, params, compute_dtype=jnp.float32))
    err_f32 = float(jnp.max(jnp.abs(out_f32 - ref)))
    assert jnp.allclose(out_f32, ref, rtol=5e-4, atol=5e-4), err_f32

    print("KERNEL_OK")
</pallas_src>

<mosaic_0001>
module attributes {stable_mosaic.version = 11 : i64} {
  func.func @_lora_tac_mlp4_kernel(%arg0: i32, %arg1: i32, %arg2: memref<1x4x8x128xf32, #tpu.memory_space<vmem>>, %arg3: memref<1x4x128x4xf32, #tpu.memory_space<vmem>>, %arg4: memref<1x4x128x4xf32, #tpu.memory_space<vmem>>, %arg5: memref<1x1x128xf32, #tpu.memory_space<vmem>>, %arg6: memref<128x128xf32, #tpu.memory_space<vmem>>, %arg7: memref<1x128xf32, #tpu.memory_space<vmem>>, %arg8: memref<128x128xf32, #tpu.memory_space<vmem>>, %arg9: memref<1x128xf32, #tpu.memory_space<vmem>>, %arg10: memref<1x4x8x128xf32, #tpu.memory_space<vmem>>, %arg11: memref<4x128x128xbf16, #tpu.memory_space<vmem>>) attributes {dimension_semantics = [#tpu.dimension_semantics<parallel>, #tpu.dimension_semantics<arbitrary>], iteration_bounds = array<i64: 2, 2>, scalar_prefetch = 0 : i64, scratch_operands = 1 : i64, tpu.core_type = #tpu.core_type<tc>, window_params = [{transform_indices = @transform_0, window_bounds = array<i64: 1, 4, 8, 128>}, {pipeline_mode = #tpu.pipeline_mode<synchronous>, transform_indices = @transform_1, window_bounds = array<i64: 1, 4, 128, 4>}, {pipeline_mode = #tpu.pipeline_mode<synchronous>, transform_indices = @transform_2, window_bounds = array<i64: 1, 4, 128, 4>}, {pipeline_mode = #tpu.pipeline_mode<synchronous>, transform_indices = @transform_3, window_bounds = array<i64: 1, 1, 128>}, {pipeline_mode = #tpu.pipeline_mode<synchronous>, transform_indices = @transform_4, window_bounds = array<i64: 128, 128>}, {pipeline_mode = #tpu.pipeline_mode<synchronous>, transform_indices = @transform_5, window_bounds = array<i64: 1, 128>}, {pipeline_mode = #tpu.pipeline_mode<synchronous>, transform_indices = @transform_6, window_bounds = array<i64: 128, 128>}, {pipeline_mode = #tpu.pipeline_mode<synchronous>, transform_indices = @transform_7, window_bounds = array<i64: 1, 128>}, {transform_indices = @transform_8, window_bounds = array<i64: 1, 4, 8, 128>}]} {
    %c0_i32 = arith.constant 0 : i32
    %0 = arith.cmpi eq, %arg1, %c0_i32 : i32
    %1 = arith.extui %0 : i1 to i32
    %c0_i32_0 = arith.constant 0 : i32
    %2 = arith.cmpi ne, %1, %c0_i32_0 : i32
    scf.if %2 {
      %c0_29 = arith.constant 0 : index
      %c0_30 = arith.constant 0 : index
      %c0_31 = arith.constant 0 : index
      %c0_32 = arith.constant 0 : index
      %56 = vector.load %arg3[%c0_29, %c0_30, %c0_31, %c0_32] : memref<1x4x128x4xf32, #tpu.memory_space<vmem>>, vector<1x4x128x4xf32>
      %57 = vector.shape_cast %56 : vector<1x4x128x4xf32> to vector<4x128x4xf32>
      %c0_33 = arith.constant 0 : index
      %c0_34 = arith.constant 0 : index
      %c0_35 = arith.constant 0 : index
      %c0_36 = arith.constant 0 : index
      %58 = vector.load %arg4[%c0_33, %c0_34, %c0_35, %c0_36] : memref<1x4x128x4xf32, #tpu.memory_space<vmem>>, vector<1x4x128x4xf32>
      %59 = vector.shape_cast %58 : vector<1x4x128x4xf32> to vector<4x128x4xf32>
      "tpu.trace_start"() <{level = 10 : i32, message = "khr,kor->kho"}> : () -> ()
      %cst_37 = arith.constant dense<0.000000e+00> : vector<4x128x128xf32>
      %60 = tpu.matmul %59, %57, %cst_37 {dimension_numbers = #tpu.dot_dimension_numbers<[2], [2], [1], [1], [0, 0, 0, 1, 1, 1], [0], [0]>} : vector<4x128x4xf32>, vector<4x128x4xf32>, vector<4x128x128xf32> -> vector<4x128x128xf32>
      "tpu.trace_stop"() : () -> ()
      %cst_38 = arith.constant 0.001953125 : f32
      %61 = vector.broadcast %cst_38 : f32 to vector<4x128x128xf32>
      %62 = arith.mulf %60, %61 : vector<4x128x128xf32>
      %c0_39 = arith.constant 0 : index
      %c0_40 = arith.constant 0 : index
      %63 = vector.load %arg8[%c0_39, %c0_40] : memref<128x128xf32, #tpu.memory_space<vmem>>, vector<128x128xf32>
      %64 = vector.shape_cast %63 : vector<128x128xf32> to vector<1x128x128xf32>
      %65 = vector.broadcast %64 : vector<1x128x128xf32> to vector<4x128x128xf32>
      %66 = arith.addf %65, %62 : vector<4x128x128xf32>
      %67 = arith.truncf %66 : vector<4x128x128xf32> to vector<4x128x128xbf16>
      %c0_41 = arith.constant 0 : index
      %c0_42 = arith.constant 0 : index
      %c0_43 = arith.constant 0 : index
      %68 = vector.load %arg11[%c0_41, %c0_42, %c0_43] : memref<4x128x128xbf16, #tpu.memory_space<vmem>>, vector<4x128x128xbf16>
      tpu.vector_store %arg11[%c0_41, %c0_42, %c0_43], %67 {strides = array<i32>} : memref<4x128x128xbf16, #tpu.memory_space<vmem>>, vector<4x128x128xbf16>,
    } else {
    }
    %c0 = arith.constant 0 : index
    %c0_1 = arith.constant 0 : index
    %c0_2 = arith.constant 0 : index
    %c0_3 = arith.constant 0 : index
    %3 = vector.load %arg2[%c0, %c0_1, %c0_2, %c0_3] : memref<1x4x8x128xf32, #tpu.memory_space<vmem>>, vector<1x4x8x128xf32>
    %4 = vector.shape_cast %3 : vector<1x4x8x128xf32> to vector<4x8x128xf32>
    %5 = vector.shape_cast %4 : vector<4x8x128xf32> to vector<32x128xf32>
    %6 = arith.truncf %5 : vector<32x128xf32> to vector<32x128xbf16>
    %c0_4 = arith.constant 0 : index
    %c0_5 = arith.constant 0 : index
    %7 = vector.load %arg6[%c0_4, %c0_5] : memref<128x128xf32, #tpu.memory_space<vmem>>, vector<128x128xf32>
    %8 = arith.truncf %7 : vector<128x128xf32> to vector<128x128xbf16>
    %cst = arith.constant dense<0.000000e+00> : vector<32x128xf32>
    %9 = tpu.matmul %6, %8, %cst {dimension_numbers = #tpu.dot_dimension_numbers<[1], [0], [0], [1], [0, 0, 1, 1], [], []>} : vector<32x128xbf16>, vector<128x128xbf16>, vector<32x128xf32> -> vector<32x128xf32>
    %10 = vector.shape_cast %9 : vector<32x128xf32> to vector<4x8x128xf32>
    %c0_6 = arith.constant 0 : index
    %c0_7 = arith.constant 0 : index
    %11 = vector.load %arg7[%c0_6, %c0_7] : memref<1x128xf32, #tpu.memory_space<vmem>>, vector<1x128xf32>
    %12 = vector.shape_cast %11 : vector<1x128xf32> to vector<1x1x128xf32>
    %13 = vector.broadcast %12 : vector<1x1x128xf32> to vector<4x8x128xf32>
    %14 = arith.addf %10, %13 : vector<4x8x128xf32>
    %cst_8 = arith.constant dense<0.000000e+00> : vector<8x128xf32>
    %15 = vector.multi_reduction <add>, %14, %cst_8 [0] : vector<4x8x128xf32> to vector<8x128xf32>
    %16 = vector.shape_cast %15 : vector<8x128xf32> to vector<1x8x128xf32>
    %cst_9 = arith.constant 4.000000e+00 : f32
    %17 = vector.broadcast %cst_9 : f32 to vector<1x8x128xf32>
    %18 = arith.divf %16, %17 : vector<1x8x128xf32>
    %19 = tpu.iota {dimensions = array<i32: 2>} : vector<4x8x128xi32>
    %c64_i32 = arith.constant 64 : i32
    %20 = vector.broadcast %c64_i32 : i32 to vector<4x8x128xi32>
    %21 = arith.cmpi slt, %19, %20 : vector<4x8x128xi32>
    %22 = vector.shape_cast %18 : vector<1x8x128xf32> to vector<1x8x128xf32>
    %23 = vector.broadcast %22 : vector<1x8x128xf32> to vector<4x8x128xf32>
    %24 = arith.select %21, %14, %23 : vector<4x8x128xi1>, vector<4x8x128xf32>
    %cst_10 = arith.constant 5.000000e-01 : f32
    %25 = vector.broadcast %cst_10 : f32 to vector<4x8x128xf32>
    %26 = arith.mulf %25, %24 : vector<4x8x128xf32>
    %cst_11 = arith.constant 0.707106769 : f32
    %27 = vector.broadcast %cst_11 : f32 to vector<4x8x128xf32>
    %28 = arith.mulf %24, %27 : vector<4x8x128xf32>
    %29 = math.erf %28 : vector<4x8x128xf32>
    %cst_12 = arith.constant 1.000000e+00 : f32
    %30 = vector.broadcast %cst_12 : f32 to vector<4x8x128xf32>
    %31 = arith.addf %30, %29 : vector<4x8x128xf32>
    %32 = arith.mulf %26, %31 : vector<4x8x128xf32>
    %33 = arith.truncf %32 : vector<4x8x128xf32> to vector<4x8x128xbf16>
    %c0_13 = arith.constant 0 : index
    %c0_14 = arith.constant 0 : index
    %c0_15 = arith.constant 0 : index
    %34 = vector.load %arg11[%c0_13, %c0_14, %c0_15] : memref<4x128x128xbf16, #tpu.memory_space<vmem>>, vector<4x128x128xbf16>
    "tpu.trace_start"() <{level = 10 : i32, message = "kfh,kho->kfo"}> : () -> ()
    %cst_16 = arith.constant dense<0.000000e+00> : vector<4x8x128xf32>
    %35 = tpu.matmul %33, %34, %cst_16 {dimension_numbers = #tpu.dot_dimension_numbers<[2], [1], [1], [2], [0, 0, 0, 1, 1, 2], [0], [0]>} : vector<4x8x128xbf16>, vector<4x128x128xbf16>, vector<4x8x128xf32> -> vector<4x8x128xf32>
    "tpu.trace_stop"() : () -> ()
    %c0_17 = arith.constant 0 : index
    %c0_18 = arith.constant 0 : index
    %36 = vector.load %arg9[%c0_17, %c0_18] : memref<1x128xf32, #tpu.memory_space<vmem>>, vector<1x128xf32>
    %37 = vector.shape_cast %36 : vector<1x128xf32> to vector<1x1x128xf32>
    %38 = vector.broadcast %37 : vector<1x1x128xf32> to vector<4x8x128xf32>
    %39 = arith.addf %35, %38 : vector<4x8x128xf32>
    %c0_19 = arith.constant 0 : index
    %c0_20 = arith.constant 0 : index
    %c0_21 = arith.constant 0 : index
    %40 = vector.load %arg5[%c0_19, %c0_20, %c0_21] : memref<1x1x128xf32, #tpu.memory_space<vmem>>, vector<1x1x128xf32>
    %41 = vector.shape_cast %40 : vector<1x1x128xf32> to vector<1x128xf32>
    %42 = vector.shape_cast %41 : vector<1x128xf32> to vector<1x1x128xf32>
    %43 = vector.broadcast %42 : vector<1x1x128xf32> to vector<4x8x128xf32>
    %44 = arith.addf %39, %43 : vector<4x8x128xf32>
    %cst_22 = arith.constant 5.000000e-01 : f32
    %45 = vector.broadcast %cst_22 : f32 to vector<4x8x128xf32>
    %46 = arith.mulf %45, %44 : vector<4x8x128xf32>
    %cst_23 = arith.constant 0.707106769 : f32
    %47 = vector.broadcast %cst_23 : f32 to vector<4x8x128xf32>
    %48 = arith.mulf %44, %47 : vector<4x8x128xf32>
    %49 = math.erf %48 : vector<4x8x128xf32>
    %cst_24 = arith.constant 1.000000e+00 : f32
    %50 = vector.broadcast %cst_24 : f32 to vector<4x8x128xf32>
    %51 = arith.addf %50, %49 : vector<4x8x128xf32>
    %52 = arith.mulf %46, %51 : vector<4x8x128xf32>
    %c0_25 = arith.constant 0 : index
    %c0_26 = arith.constant 0 : index
    %c0_27 = arith.constant 0 : index
    %c0_28 = arith.constant 0 : index
    %53 = vector.load %arg10[%c0_25, %c0_26, %c0_27, %c0_28] : memref<1x4x8x128xf32, #tpu.memory_space<vmem>>, vector<1x4x8x128xf32>
    %54 = vector.shape_cast %53 : vector<1x4x8x128xf32> to vector<4x8x128xf32>
    %55 = vector.shape_cast %52 : vector<4x8x128xf32> to vector<1x4x8x128xf32>
    tpu.vector_store %arg10[%c0_25, %c0_26, %c0_27, %c0_28], %55 {strides = array<i32>} : memref<1x4x8x128xf32, #tpu.memory_space<vmem>>, vector<1x4x8x128xf32>,
    return
  }
  func.func @transform_0(%arg0: i32, %arg1: i32) -> (i32, i32, i32, i32) {
    %c0_i32 = arith.constant 0 : i32
    %c0_i32_0 = arith.constant 0 : i32
    %c0_i32_1 = arith.constant 0 : i32
    return %arg0, %c0_i32, %arg1, %c0_i32_0 : i32, i32, i32, i32
  }
  func.func @transform_1(%arg0: i32, %arg1: i32) -> (i32, i32, i32, i32) {
    %c0_i32 = arith.constant 0 : i32
    %c0_i32_0 = arith.constant 0 : i32
    %c0_i32_1 = arith.constant 0 : i32
    %c0_i32_2 = arith.constant 0 : i32
    return %arg0, %c0_i32, %c0_i32_0, %c0_i32_1 : i32, i32, i32, i32
  }
  func.func @transform_2(%arg0: i32, %arg1: i32) -> (i32, i32, i32, i32) {
    %c0_i32 = arith.constant 0 : i32
    %c0_i32_0 = arith.constant 0 : i32
    %c0_i32_1 = arith.constant 0 : i32
    %c0_i32_2 = arith.constant 0 : i32
    return %arg0, %c0_i32, %c0_i32_0, %c0_i32_1 : i32, i32, i32, i32
  }
  func.func @transform_3(%arg0: i32, %arg1: i32) -> (i32, i32, i32) {
    %c0_i32 = arith.constant 0 : i32
    %c0_i32_0 = arith.constant 0 : i32
    %c0_i32_1 = arith.constant 0 : i32
    return %arg0, %c0_i32, %c0_i32_0 : i32, i32, i32
  }
  func.func @transform_4(%arg0: i32, %arg1: i32) -> (i32, i32) {
    %c0_i32 = arith.constant 0 : i32
    %c0_i32_0 = arith.constant 0 : i32
    %c0_i32_1 = arith.constant 0 : i32
    return %c0_i32, %c0_i32_0 : i32, i32
  }
  func.func @transform_5(%arg0: i32, %arg1: i32) -> (i32, i32) {
    %c0_i32 = arith.constant 0 : i32
    %c0_i32_0 = arith.constant 0 : i32
    %c0_i32_1 = arith.constant 0 : i32
    return %c0_i32, %c0_i32_0 : i32, i32
  }
  func.func @transform_6(%arg0: i32, %arg1: i32) -> (i32, i32) {
    %c0_i32 = arith.constant 0 : i32
    %c0_i32_0 = arith.constant 0 : i32
    %c0_i32_1 = arith.constant 0 : i32
    return %c0_i32, %c0_i32_0 : i32, i32
  }
  func.func @transform_7(%arg0: i32, %arg1: i32) -> (i32, i32) {
    %c0_i32 = arith.constant 0 : i32
    %c0_i32_0 = arith.constant 0 : i32
    %c0_i32_1 = arith.constant 0 : i32
    return %c0_i32, %c0_i32_0 : i32, i32
  }
  func.func @transform_8(%arg0: i32, %arg1: i32) -> (i32, i32, i32, i32) {
    %c0_i32 = arith.constant 0 : i32
    %c0_i32_0 = arith.constant 0 : i32
    %c0_i32_1 = arith.constant 0 : i32
    return %arg0, %c0_i32, %arg1, %c0_i32_0 : i32, i32, i32, i32
  }
}

module attributes {stable_mosaic.version = 11 : i64} {
  func.func @_lora_tac_mlp4_kernel(%arg0: i32, %arg1: i32, %arg2: memref<1x4x8x128xf32, #tpu.memory_space<vmem>>, %arg3: memref<1x4x128x4xf32, #tpu.memory_space<vmem>>, %arg4: memref<1x4x128x4xf32, #tpu.memory_space<vmem>>, %arg5: memref<1x1x128xf32, #tpu.memory_space<vmem>>, %arg6: memref<128x128xf32, #tpu.memory_space<vmem>>, %arg7: memref<1x128xf32, #tpu.memory_space<vmem>>, %arg8: memref<128x128xf32, #tpu.memory_space<vmem>>, %arg9: memref<1x128xf32, #tpu.memory_space<vmem>>, %arg10: memref<1x4x8x128xf32, #tpu.memory_space<vmem>>, %arg11: memref<4x128x128xbf16, #tpu.memory_space<vmem>>) attributes {dimension_semantics = [#tpu.dimension_semantics<parallel>, #tpu.dimension_semantics<arbitrary>], iteration_bounds = array<i64: 2, 2>, scalar_prefetch = 0 : i64, scratch_operands = 1 : i64, tpu.core_type = #tpu.core_type<tc>, window_params = [{transform_indices = @transform_0, window_bounds = array<i64: 1, 4, 8, 128>}, {transform_indices = @transform_1, window_bounds = array<i64: 1, 4, 128, 4>}, {transform_indices = @transform_2, window_bounds = array<i64: 1, 4, 128, 4>}, {transform_indices = @transform_3, window_bounds = array<i64: 1, 1, 128>}, {pipeline_mode = #tpu.pipeline_mode<synchronous>, transform_indices = @transform_4, window_bounds = array<i64: 128, 128>}, {pipeline_mode = #tpu.pipeline_mode<synchronous>, transform_indices = @transform_5, window_bounds = array<i64: 1, 128>}, {pipeline_mode = #tpu.pipeline_mode<synchronous>, transform_indices = @transform_6, window_bounds = array<i64: 128, 128>}, {pipeline_mode = #tpu.pipeline_mode<synchronous>, transform_indices = @transform_7, window_bounds = array<i64: 1, 128>}, {transform_indices = @transform_8, window_bounds = array<i64: 1, 4, 8, 128>}]} {
    %c0_i32 = arith.constant 0 : i32
    %0 = arith.cmpi eq, %arg1, %c0_i32 : i32
    %1 = arith.extui %0 : i1 to i32
    %c0_i32_0 = arith.constant 0 : i32
    %2 = arith.cmpi ne, %1, %c0_i32_0 : i32
    scf.if %2 {
      %c0_29 = arith.constant 0 : index
      %c0_30 = arith.constant 0 : index
      %c0_31 = arith.constant 0 : index
      %c0_32 = arith.constant 0 : index
      %56 = vector.load %arg3[%c0_29, %c0_30, %c0_31, %c0_32] : memref<1x4x128x4xf32, #tpu.memory_space<vmem>>, vector<1x4x128x4xf32>
      %57 = vector.shape_cast %56 : vector<1x4x128x4xf32> to vector<4x128x4xf32>
      %c0_33 = arith.constant 0 : index
      %c0_34 = arith.constant 0 : index
      %c0_35 = arith.constant 0 : index
      %c0_36 = arith.constant 0 : index
      %58 = vector.load %arg4[%c0_33, %c0_34, %c0_35, %c0_36] : memref<1x4x128x4xf32, #tpu.memory_space<vmem>>, vector<1x4x128x4xf32>
      %59 = vector.shape_cast %58 : vector<1x4x128x4xf32> to vector<4x128x4xf32>
      "tpu.trace_start"() <{level = 10 : i32, message = "khr,kor->kho"}> : () -> ()
      %cst_37 = arith.constant dense<0.000000e+00> : vector<4x128x128xf32>
      %60 = tpu.matmul %59, %57, %cst_37 {dimension_numbers = #tpu.dot_dimension_numbers<[2], [2], [1], [1], [0, 0, 0, 1, 1, 1], [0], [0]>} : vector<4x128x4xf32>, vector<4x128x4xf32>, vector<4x128x128xf32> -> vector<4x128x128xf32>
      "tpu.trace_stop"() : () -> ()
      %cst_38 = arith.constant 0.001953125 : f32
      %61 = vector.broadcast %cst_38 : f32 to vector<4x128x128xf32>
      %62 = arith.mulf %60, %61 : vector<4x128x128xf32>
      %c0_39 = arith.constant 0 : index
      %c0_40 = arith.constant 0 : index
      %63 = vector.load %arg8[%c0_39, %c0_40] : memref<128x128xf32, #tpu.memory_space<vmem>>, vector<128x128xf32>
      %64 = vector.shape_cast %63 : vector<128x128xf32> to vector<1x128x128xf32>
      %65 = vector.broadcast %64 : vector<1x128x128xf32> to vector<4x128x128xf32>
      %66 = arith.addf %65, %62 : vector<4x128x128xf32>
      %67 = arith.truncf %66 : vector<4x128x128xf32> to vector<4x128x128xbf16>
      %c0_41 = arith.constant 0 : index
      %c0_42 = arith.constant 0 : index
      %c0_43 = arith.constant 0 : index
      %68 = vector.load %arg11[%c0_41, %c0_42, %c0_43] : memref<4x128x128xbf16, #tpu.memory_space<vmem>>, vector<4x128x128xbf16>
      tpu.vector_store %arg11[%c0_41, %c0_42, %c0_43], %67 {strides = array<i32>} : memref<4x128x128xbf16, #tpu.memory_space<vmem>>, vector<4x128x128xbf16>,
    } else {
    }
    %c0 = arith.constant 0 : index
    %c0_1 = arith.constant 0 : index
    %c0_2 = arith.constant 0 : index
    %c0_3 = arith.constant 0 : index
    %3 = vector.load %arg2[%c0, %c0_1, %c0_2, %c0_3] : memref<1x4x8x128xf32, #tpu.memory_space<vmem>>, vector<1x4x8x128xf32>
    %4 = vector.shape_cast %3 : vector<1x4x8x128xf32> to vector<4x8x128xf32>
    %5 = vector.shape_cast %4 : vector<4x8x128xf32> to vector<32x128xf32>
    %6 = arith.truncf %5 : vector<32x128xf32> to vector<32x128xbf16>
    %c0_4 = arith.constant 0 : index
    %c0_5 = arith.constant 0 : index
    %7 = vector.load %arg6[%c0_4, %c0_5] : memref<128x128xf32, #tpu.memory_space<vmem>>, vector<128x128xf32>
    %8 = arith.truncf %7 : vector<128x128xf32> to vector<128x128xbf16>
    %cst = arith.constant dense<0.000000e+00> : vector<32x128xf32>
    %9 = tpu.matmul %6, %8, %cst {dimension_numbers = #tpu.dot_dimension_numbers<[1], [0], [0], [1], [0, 0, 1, 1], [], []>} : vector<32x128xbf16>, vector<128x128xbf16>, vector<32x128xf32> -> vector<32x128xf32>
    %10 = vector.shape_cast %9 : vector<32x128xf32> to vector<4x8x128xf32>
    %c0_6 = arith.constant 0 : index
    %c0_7 = arith.constant 0 : index
    %11 = vector.load %arg7[%c0_6, %c0_7] : memref<1x128xf32, #tpu.memory_space<vmem>>, vector<1x128xf32>
    %12 = vector.shape_cast %11 : vector<1x128xf32> to vector<1x1x128xf32>
    %13 = vector.broadcast %12 : vector<1x1x128xf32> to vector<4x8x128xf32>
    %14 = arith.addf %10, %13 : vector<4x8x128xf32>
    %cst_8 = arith.constant dense<0.000000e+00> : vector<8x128xf32>
    %15 = vector.multi_reduction <add>, %14, %cst_8 [0] : vector<4x8x128xf32> to vector<8x128xf32>
    %16 = vector.shape_cast %15 : vector<8x128xf32> to vector<1x8x128xf32>
    %cst_9 = arith.constant 4.000000e+00 : f32
    %17 = vector.broadcast %cst_9 : f32 to vector<1x8x128xf32>
    %18 = arith.divf %16, %17 : vector<1x8x128xf32>
    %19 = tpu.iota {dimensions = array<i32: 2>} : vector<4x8x128xi32>
    %c64_i32 = arith.constant 64 : i32
    %20 = vector.broadcast %c64_i32 : i32 to vector<4x8x128xi32>
    %21 = arith.cmpi slt, %19, %20 : vector<4x8x128xi32>
    %22 = vector.shape_cast %18 : vector<1x8x128xf32> to vector<1x8x128xf32>
    %23 = vector.broadcast %22 : vector<1x8x128xf32> to vector<4x8x128xf32>
    %24 = arith.select %21, %14, %23 : vector<4x8x128xi1>, vector<4x8x128xf32>
    %cst_10 = arith.constant 5.000000e-01 : f32
    %25 = vector.broadcast %cst_10 : f32 to vector<4x8x128xf32>
    %26 = arith.mulf %25, %24 : vector<4x8x128xf32>
    %cst_11 = arith.constant 0.707106769 : f32
    %27 = vector.broadcast %cst_11 : f32 to vector<4x8x128xf32>
    %28 = arith.mulf %24, %27 : vector<4x8x128xf32>
    %29 = math.erf %28 : vector<4x8x128xf32>
    %cst_12 = arith.constant 1.000000e+00 : f32
    %30 = vector.broadcast %cst_12 : f32 to vector<4x8x128xf32>
    %31 = arith.addf %30, %29 : vector<4x8x128xf32>
    %32 = arith.mulf %26, %31 : vector<4x8x128xf32>
    %33 = arith.truncf %32 : vector<4x8x128xf32> to vector<4x8x128xbf16>
    %c0_13 = arith.constant 0 : index
    %c0_14 = arith.constant 0 : index
    %c0_15 = arith.constant 0 : index
    %34 = vector.load %arg11[%c0_13, %c0_14, %c0_15] : memref<4x128x128xbf16, #tpu.memory_space<vmem>>, vector<4x128x128xbf16>
    "tpu.trace_start"() <{level = 10 : i32, message = "kfh,kho->kfo"}> : () -> ()
    %cst_16 = arith.constant dense<0.000000e+00> : vector<4x8x128xf32>
    %35 = tpu.matmul %33, %34, %cst_16 {dimension_numbers = #tpu.dot_dimension_numbers<[2], [1], [1], [2], [0, 0, 0, 1, 1, 2], [0], [0]>} : vector<4x8x128xbf16>, vector<4x128x128xbf16>, vector<4x8x128xf32> -> vector<4x8x128xf32>
    "tpu.trace_stop"() : () -> ()
    %c0_17 = arith.constant 0 : index
    %c0_18 = arith.constant 0 : index
    %36 = vector.load %arg9[%c0_17, %c0_18] : memref<1x128xf32, #tpu.memory_space<vmem>>, vector<1x128xf32>
    %37 = vector.shape_cast %36 : vector<1x128xf32> to vector<1x1x128xf32>
    %38 = vector.broadcast %37 : vector<1x1x128xf32> to vector<4x8x128xf32>
    %39 = arith.addf %35, %38 : vector<4x8x128xf32>
    %c0_19 = arith.constant 0 : index
    %c0_20 = arith.constant 0 : index
    %c0_21 = arith.constant 0 : index
    %40 = vector.load %arg5[%c0_19, %c0_20, %c0_21] : memref<1x1x128xf32, #tpu.memory_space<vmem>>, vector<1x1x128xf32>
    %41 = vector.shape_cast %40 : vector<1x1x128xf32> to vector<1x128xf32>
    %42 = vector.shape_cast %41 : vector<1x128xf32> to vector<1x1x128xf32>
    %43 = vector.broadcast %42 : vector<1x1x128xf32> to vector<4x8x128xf32>
    %44 = arith.addf %39, %43 : vector<4x8x128xf32>
    %cst_22 = arith.constant 5.000000e-01 : f32
    %45 = vector.broadcast %cst_22 : f32 to vector<4x8x128xf32>
    %46 = arith.mulf %45, %44 : vector<4x8x128xf32>
    %cst_23 = arith.constant 0.707106769 : f32
    %47 = vector.broadcast %cst_23 : f32 to vector<4x8x128xf32>
    %48 = arith.mulf %44, %47 : vector<4x8x128xf32>
    %49 = math.erf %48 : vector<4x8x128xf32>
    %cst_24 = arith.constant 1.000000e+00 : f32
    %50 = vector.broadcast %cst_24 : f32 to vector<4x8x128xf32>
    %51 = arith.addf %50, %49 : vector<4x8x128xf32>
    %52 = arith.mulf %46, %51 : vector<4x8x128xf32>
    %c0_25 = arith.constant 0 : index
    %c0_26 = arith.constant 0 : index
    %c0_27 = arith.constant 0 : index
    %c0_28 = arith.constant 0 : index
    %53 = vector.load %arg10[%c0_25, %c0_26, %c0_27, %c0_28] : memref<1x4x8x128xf32, #tpu.memory_space<vmem>>, vector<1x4x8x128xf32>
    %54 = vector.shape_cast %53 : vector<1x4x8x128xf32> to vector<4x8x128xf32>
    %55 = vector.shape_cast %52 : vector<4x8x128xf32> to vector<1x4x8x128xf32>
    tpu.vector_store %arg10[%c0_25, %c0_26, %c0_27, %c0_28], %55 {strides = array<i32>} : memref<1x4x8x128xf32, #tpu.memory_space<vmem>>, vector<1x4x8x128xf32>,
    return
  }
  func.func @transform_0(%arg0: i32, %arg1: i32) -> (i32, i32, i32, i32) {
    %c0_i32 = arith.constant 0 : i32
    %c0_i32_0 = arith.constant 0 : i32
    %c0_i32_1 = arith.constant 0 : i32
    return %arg0, %c0_i32, %arg1, %c0_i32_0 : i32, i32, i32, i32
  }
  func.func @transform_1(%arg0: i32, %arg1: i32) -> (i32, i32, i32, i32) {
    %c0_i32 = arith.constant 0 : i32
    %c0_i32_0 = arith.constant 0 : i32
    %c0_i32_1 = arith.constant 0 : i32
    %c0_i32_2 = arith.constant 0 : i32
    return %arg0, %c0_i32, %c0_i32_0, %c0_i32_1 : i32, i32, i32, i32
  }
  func.func @transform_2(%arg0: i32, %arg1: i32) -> (i32, i32, i32, i32) {
    %c0_i32 = arith.constant 0 : i32
    %c0_i32_0 = arith.constant 0 : i32
    %c0_i32_1 = arith.constant 0 : i32
    %c0_i32_2 = arith.constant 0 : i32
    return %arg0, %c0_i32, %c0_i32_0, %c0_i32_1 : i32, i32, i32, i32
  }
  func.func @transform_3(%arg0: i32, %arg1: i32) -> (i32, i32, i32) {
    %c0_i32 = arith.constant 0 : i32
    %c0_i32_0 = arith.constant 0 : i32
    %c0_i32_1 = arith.constant 0 : i32
    return %arg0, %c0_i32, %c0_i32_0 : i32, i32, i32
  }
  func.func @transform_4(%arg0: i32, %arg1: i32) -> (i32, i32) {
    %c0_i32 = arith.constant 0 : i32
    %c0_i32_0 = arith.constant 0 : i32
    %c0_i32_1 = arith.constant 0 : i32
    return %c0_i32, %c0_i32_0 : i32, i32
  }
  func.func @transform_5(%arg0: i32, %arg1: i32) -> (i32, i32) {
    %c0_i32 = arith.constant 0 : i32
    %c0_i32_0 = arith.constant 0 : i32
    %c0_i32_1 = arith.constant 0 : i32
    return %c0_i32, %c0_i32_0 : i32, i32
  }
  func.func @transform_6(%arg0: i32, %arg1: i32) -> (i32, i32) {
    %c0_i32 = arith.constant 0 : i32
    %c0_i32_0 = arith.constant 0 : i32
    %c0_i32_1 = arith.constant 0 : i32
    return %c0_i32, %c0_i32_0 : i32, i32
  }
  func.func @transform_7(%arg0: i32, %arg1: i32) -> (i32, i32) {
    %c0_i32 = arith.constant 0 : i32
    %c0_i32_0 = arith.constant 0 : i32
    %c0_i32_1 = arith.constant 0 : i32
    return %c0_i32, %c0_i32_0 : i32, i32
  }
  func.func @transform_8(%arg0: i32, %arg1: i32) -> (i32, i32, i32, i32) {
    %c0_i32 = arith.constant 0 : i32
    %c0_i32_0 = arith.constant 0 : i32
    %c0_i32_1 = arith.constant 0 : i32
    return %arg0, %c0_i32, %arg1, %c0_i32_0 : i32, i32, i32, i32
  }
}

</mosaic_0001>

<bundles_post_ra>
// kernel: tpu_custom_call.1
= control target key start
LH: loop header
LB: loop body
LE: loop exit
PB: predicated region body
PF: predicated region fallthrough
CT: control target
= control target key end

     0   :  { %s4071_s0 = inlined_call_operand.vmem [shape: f32[2,4,16,128], index: 0, kind: input, shape index: {}]   ;;  %s4072_s1 = inlined_call_operand.vmem [shape: f32[2,4,128,4], index: 1, kind: input, shape index: {}]   ;;  %s4073_s2 = inlined_call_operand.vmem [shape: f32[2,4,128,4], index: 2, kind: input, shape index: {}]   ;;  %s4074_s3 = inlined_call_operand.vmem [shape: f32[2,1,128], index: 3, kind: input, shape index: {}]   ;;  %s4075_s4 = inlined_call_operand.vmem [shape: f32[128,128], index: 4, kind: input, shape index: {}]   ;;  %s4076_s5 = inlined_call_operand.vmem [shape: f32[1,128], index: 5, kind: input, shape index: {}]   ;;  %s4077_s6 = inlined_call_operand.vmem [shape: f32[128,128], index: 6, kind: input, shape index: {}]   ;;  %s4078_s7 = inlined_call_operand.vmem [shape: f32[1,128], index: 7, kind: input, shape index: {}]   ;;  %s4079_s8 = inlined_call_operand.hbm [shape: f32[2,4,16,128], index: 8, kind: output, shape index: {}]  }
   0x1   :  { %4085 = sst [smem:[#allocation11_spill]] %s4071_s0 }
   0x2   :  { %13 = vsyncpa [#allocation5], 0 }
   0x3   :  { %15 = vsyncpa [#allocation5 + $0x1], 0  ;;  %s3310_s27 = smov 0   ;;  %s3312_s28 = smov 0  }
   0x4   :  { %s3314_s29 = smov 0   ;;  %s3316_s30 = smov 0  }
   0x5   :  { %s3318_s9 = smov 0   ;;  %s3320_s10 = smov 0  }
   0x6   :  { %s3322_s11 = smov 0   ;;  %s3324_s12 = smov 0  }
   0x7 LB: > { %4086 = sst [smem:[#allocation7_spill]] %s3249_s10  ;;  %s2228_s13 = sadd.s32 4294967295, %s3257_s12   ;;  %s3257_s12 = sphi %s3324_s12, %s21_s12   ;;  %s3253_s11 = sphi %s3322_s11, %s4100_s11   ;;  %s3249_s10 = sphi %s3320_s10, %s4099_s10   ;;  %s3245_s9 = sphi %s3318_s9, %s4098_s9   ;;  %s3241_s30 = sphi %s3316_s30, %s4097_s30   ;;  %s3237_s29 = sphi %s3314_s29, %s4103_s29   ;;  %s3233_s28 = sphi %s3312_s28, %s4102_s28   ;;  %s3229_s27 = sphi %s3310_s27, %s4101_s27  }
   0x8   : > { %4087 = sst [smem:[#allocation8_spill]] %s3253_s11  ;;  %s2229_s14 = sadd.s32 4294967294, %s3257_s12  }
   0x9   : > { %s30_s15 = sadd.s32 1, %s3249_s10  ;;  %s33_s16 = sadd.s32 1, %s3253_s11 }
   0xa   : > { %p31_p0 = scmp.ge.s32.totalorder %s30_s15, 2  ;;  %p49_p1 = scmp.ne.s32.totalorder %s3237_s29, %s3233_s28 }
   0xb   : > { %p50_p2 = scmp.eq.s32.totalorder %s3257_s12, 0  ;;  %p243_p5 = scmp.eq.s32.totalorder %s2228_s13, 3 }
   0xc   : > { %s4105_s15 = smov (%p31_p0, %s30_s15), 0  ;;  %s4107_s16 = smov (!%p31_p0, %s33_s16), %s3253_s11 }
   0xd   : > { %4088 = sst [smem:[#allocation9_spill]] %s4105_s15  ;;  %s38_s17 = ssub.s32 %s3249_s10, %s4105_s15 }
   0xe   : > { %p3362_p3 = por %p50_p2, %p49_p1  ;;  %p35_p4 = scmp.ge.s32.totalorder %s4107_s16, 2 }
   0xf   : > { %p248_p6 = scmp.ne.s32.totalorder %s3233_s28, %s3229_s27  ;;  %p249_p7 = scmp.eq.s32.totalorder %s2229_s14, 3 }
  0x10   : > { %s4109_s16 = smov (%p35_p4, %s4107_s16), 0  ;;  %p3370_p8 = por %p243_p5, %p49_p1 }
  0x11   : > { %4090 = sst [smem:[#allocation10_spill]] %s4109_s16  ;;  %p3374_p9 = por %p249_p7, %p248_p6 }
  0x12   : > { %s37_s21 = ssub.s32 %s3253_s11, %s4109_s16  ;;  %s42_s23 = sadd.s32 1, %s3237_s29 }
  0x13   : > { %s39_s22 = sor.u32 %s38_s17, %s37_s21  ;;  %p2231_p11 = scmp.ge.s32.totalorder %s3257_s12, 4 }
  0x14   : > { %p40_p10 = scmp.eq.s32.totalorder %s39_s22, 0 }
  0x15   : > { %299 = sbr.rel (%p2231_p11) target bundleno = 40 (0x28), region = 44 }
  0x16   : > { %s3382_s24 = scalar_select %p40_p10, %s3237_s29, %s42_s23  }
  0x1c   : > { %302 = sbr.rel (!%p3362_p3) target bundleno = 40 (0x28), region = 48  ;;  %s304_s25 = sand.u32 (%p3362_p3), 1, %s3237_s29  }
  0x1d   : > { %s2233_s26 = sshll.u32 (%p3362_p3), %s3253_s11, 3  ;;  %s2232_s13 = sshll.u32 (%p3362_p3), %s304_s25, 5 }
  0x1e   : > { %s308_s14 = sadd.s32 (%p3362_p3), %s3249_s10, %s2233_s26  ;;  %s4093_s0 = sld [smem:[#allocation11_spill]] (%p3362_p3) }
  0x1f   : > { %s2234_s15 = sshll.u32 (%p3362_p3), %s308_s14, 3  ;;  %s306_s22 = scalar_lea.vmem (%p3362_p3), [#allocation3], %s2232_s13 }
  0x24   : > { %s310_s21 = scalar_lea.vmem %s4093_s0, %s2234_s15 }
  0x25   : > { %v344_v0 = vld [vmem:[%s310_s21] sm:$0xff]  ;;  %v346_v1 = vld [vmem:[%s310_s21 + $0x10] sm:$0xff] }
  0x26   : > { %v348_v2 = vld [vmem:[%s310_s21 + $0x20] sm:$0xff]  ;;  %345 = vst [vmem:[%s306_s22] sm:$0xff] %v344_v0  ;;  %347 = vst [vmem:[%s306_s22 + $0x8] sm:$0xff] %v346_v1  ;;  %v350_v3 = vld [vmem:[%s310_s21 + $0x30] sm:$0xff] }
  0x27   : > { %349 = vst [vmem:[%s306_s22 + $0x10] sm:$0xff] %v348_v2  ;;  %351 = vst [vmem:[%s306_s22 + $0x18] sm:$0xff] %v350_v3 }
  0x28 PF: > { %p2235_p12 = scmp.ge.s32.totalorder %s3257_s12, 1  ;;  %p356_p13 = scmp.lt.s32.totalorder %s3257_s12, 5 }
  0x2a   : > { %p357_p0 = pnand %p2235_p12, %p356_p13 }
  0x2b   : > { %s4083_s15 = sand.u32 (!%p357_p0), 1, %s3233_s28   ;;  %p409_p1 = scmp.lt.s32.totalorder (!%p357_p0), %s3245_s9, 1 }
  0x2c   : > { %360 = sbr.rel (%p357_p0) target bundleno = 997 (0x3e5), region = 86  ;;  %s2236_s16 = sshll.u32 (!%p357_p0), %s4083_s15, 5 }
  0x2d   : > { %s3417_s15 = scalar_lea.vmem (!%p357_p0), [#allocation3], %s2236_s16  ;;  %s3419_s10 = scalar_lea.vmem (!%p357_p0), [#allocation4], %s2236_s16 }
  0x2e   : > { %p2242_p2 = scmp.ne.s32.totalorder (!%p357_p0), %s3241_s30, 0 }
  0x33   : > { %s3400_s18 = scalar_select %p409_p1, %s3245_s9, 1 }
  0x34   : > { %426 = sbr.rel (%p2242_p2) target bundleno = 435 (0x1b3), region = 94  ;;  %vm555_vm0 = vcmask (!%p2242_p2), 31744  }
  0x35   : > { %s2379_s23 = sshll.u32 %s3400_s18, 9  ;;  %s421_s13 = scalar_lea.vmem %s4074_s3, %s3400_s18  ;;  %vm3427_vm1 = vmpackc.low (!%p2242_p2), %vm555_vm0, %vm555_vm0 }
  0x36   : > { %s3410_s21 = scalar_lea.vmem %s4072_s1, %s2379_s23  ;;  %s3415_s11 = scalar_lea.vmem %s4073_s2, %s2379_s23 }
  0x37   : > { %v427_v4 = vld [vmem:[%s3410_s21] sm:$0xff] (!%p2242_p2)  ;;  %v428_v5 = vld [vmem:[%s3410_s21 + $0x8] sm:$0xff] (!%p2242_p2)  ;;  %v429_v10 = vld [vmem:[%s3410_s21 + $0x10] sm:$0xff] (!%p2242_p2) }
  0x38   : > { %v443_v6 = vld [vmem:[%s3410_s21 + $0x80] sm:$0xff] (!%p2242_p2)  ;;  %v2879_v7 = vpack.c.bf16 (!%p2242_p2), %v428_v5, %v427_v4  ;;  %v444_v9 = vld [vmem:[%s3410_s21 + $0x88] sm:$0xff] (!%p2242_p2)  ;;  %v430_v12 = vld [vmem:[%s3410_s21 + $0x18] sm:$0xff] (!%p2242_p2) }
  0x39   : > { %v2927_v11 = vpack.c.bf16 (!%p2242_p2), %v444_v9, %v443_v6  ;;  %v445_v13 = vld [vmem:[%s3410_s21 + $0x90] sm:$0xff] (!%p2242_p2)  ;;  %v446_v14 = vld [vmem:[%s3410_s21 + $0x98] sm:$0xff] (!%p2242_p2)  ;;  %v2885_v15 = vpack.c.bf16 (!%p2242_p2), %v430_v12, %v429_v10  ;;  %v431_v17 = vld [vmem:[%s3410_s21 + $0x20] sm:$0xff] (!%p2242_p2) }
  0x3a   : > { %2881 = vmatprep.subr.msk.bf16.mxu0 (!%p2242_p2), %vm3427_vm1, %v2879_v7  ;;  %v2933_v16 = vpack.c.bf16 (!%p2242_p2), %v446_v14, %v445_v13  ;;  %v432_v18 = vld [vmem:[%s3410_s21 + $0x28] sm:$0xff] (!%p2242_p2)  ;;  %v447_v19 = vld [vmem:[%s3410_s21 + $0xa0] sm:$0xff] (!%p2242_p2)  ;;  %v433_v25 = vld [vmem:[%s3410_s21 + $0x30] sm:$0xff] (!%p2242_p2) }
  0x3b   : > { %2929 = vmatprep.subr.msk.bf16.mxu1 %vm3427_vm1, %v2927_v11  ;;  %2884 = vmatpush3.bf16.xpose.msk.msra.mxu0 %vm3427_vm1, %v2879_v7  ;;  %v448_v20 = vld [vmem:[%s3410_s21 + $0xa8] sm:$0xff]  ;;  %v2891_v21 = vpack.c.bf16 %v432_v18, %v431_v17  ;;  %v491_v23 = vld [vmem:[%s3415_s11] sm:$0xff]  ;;  %v434_v26 = vld [vmem:[%s3410_s21 + $0x38] sm:$0xff] }
  0x3c   : > { %2932 = vmatpush3.bf16.xpose.msk.msra.mxu1 %vm3427_vm1, %v2927_v11  ;;  %2887 = vmatprep.subr.msk.bf16.mxu0 %vm3427_vm1, %v2885_v15  ;;  %v2939_v22 = vpack.c.bf16 %v448_v20, %v447_v19  ;;  %v507_v24 = vld [vmem:[%s3415_s11 + $0x80] sm:$0xff]  ;;  %v449_v27 = vld [vmem:[%s3410_s21 + $0xb0] sm:$0xff]  ;;  %v450_v28 = vld [vmem:[%s3410_s21 + $0xb8] sm:$0xff]  ;;  %v2897_v29 = vpack.c.bf16 %v434_v26, %v433_v25 }
  0x3d   : > { %2935 = vmatprep.subr.msk.bf16.mxu1 %vm3427_vm1, %v2933_v16  ;;  %2587 = vmatprep.mubr.msk.f32.mxu0 %vm555_vm0, %v491_v23  ;;  %v2945_v30 = vpack.c.bf16 %v450_v28, %v449_v27  ;;  %v435_v31 = vld [vmem:[%s3410_s21 + $0x40] sm:$0xff]  ;;  %v436_v32 = vld [vmem:[%s3410_s21 + $0x48] sm:$0xff]  ;;  %v437_v37 = vld [vmem:[%s3410_s21 + $0x50] sm:$0xff] }
  0x3e   : > { %2643 = vmatprep.mubr.msk.f32.mxu1 %vm555_vm0, %v507_v24  ;;  %v451_v33 = vld [vmem:[%s3410_s21 + $0xc0] sm:$0xff]  ;;  %v452_v34 = vld [vmem:[%s3410_s21 + $0xc8] sm:$0xff]  ;;  %v2903_v35 = vpack.c.bf16 %v436_v32, %v435_v31  ;;  %v438_v38 = vld [vmem:[%s3410_s21 + $0x58] sm:$0xff] }
  0x3f   : > { %v2951_v36 = vpack.c.bf16 %v452_v34, %v451_v33  ;;  %v453_v39 = vld [vmem:[%s3410_s21 + $0xd0] sm:$0xff]  ;;  %v454_v40 = vld [vmem:[%s3410_s21 + $0xd8] sm:$0xff]  ;;  %v2909_v41 = vpack.c.bf16 %v438_v38, %v437_v37  ;;  %v439_v43 = vld [vmem:[%s3410_s21 + $0x60] sm:$0xff] }
  0x40   : > { %v2957_v42 = vpack.c.bf16 %v454_v40, %v453_v39  ;;  %v440_v44 = vld [vmem:[%s3410_s21 + $0x68] sm:$0xff]  ;;  %v455_v45 = vld [vmem:[%s3410_s21 + $0xe0] sm:$0xff]  ;;  %v441_v49 = vld [vmem:[%s3410_s21 + $0x70] sm:$0xff] }
  0x41   : > { %v456_v46 = vld [vmem:[%s3410_s21 + $0xe8] sm:$0xff]  ;;  %v2915_v47 = vpack.c.bf16 %v440_v44, %v439_v43  ;;  %v442_v50 = vld [vmem:[%s3410_s21 + $0x78] sm:$0xff]  ;;  %v457_v51 = vld [vmem:[%s3410_s21 + $0xf0] sm:$0xff] }
  0x42   : > { %v2963_v48 = vpack.c.bf16 %v456_v46, %v455_v45  ;;  %v458_v52 = vld [vmem:[%s3410_s21 + $0xf8] sm:$0xff]  ;;  %v2921_v53 = vpack.c.bf16 %v442_v50, %v441_v49  ;;  %v459_v55 = vld [vmem:[%s3410_s21 + $0x100] sm:$0xff]  ;;  %v460_v56 = vld [vmem:[%s3410_s21 + $0x108] sm:$0xff] }
  0x43   : > { %2890 = vmatpush3.bf16.xpose.msk.msra.mxu0 %vm3427_vm1, %v2885_v15  ;;  %v2969_v54 = vpack.c.bf16 %v458_v52, %v457_v51  ;;  %v475_v57 = vld [vmem:[%s3410_s21 + $0x180] sm:$0xff]  ;;  %v476_v58 = vld [vmem:[%s3410_s21 + $0x188] sm:$0xff]  ;;  %v2975_v59 = vpack.c.bf16 %v460_v56, %v459_v55  ;;  %v461_v61 = vld [vmem:[%s3410_s21 + $0x110] sm:$0xff] }
  0x44   : > { %2938 = vmatpush3.bf16.xpose.msk.msra.mxu1 %vm3427_vm1, %v2933_v16  ;;  %2893 = vmatprep.subr.msk.bf16.mxu0 %vm3427_vm1, %v2891_v21  ;;  %v3023_v60 = vpack.c.bf16 %v476_v58, %v475_v57  ;;  %v462_v62 = vld [vmem:[%s3410_s21 + $0x118] sm:$0xff]  ;;  %v477_v63 = vld [vmem:[%s3410_s21 + $0x190] sm:$0xff]  ;;  %v492_v1 = vld [vmem:[%s3415_s11 + $0x8] sm:$0xff] }
  0x45   : > { %2941 = vmatprep.subr.msk.bf16.mxu1 %vm3427_vm1, %v2939_v22  ;;  %v478_v0 = vld [vmem:[%s3410_s21 + $0x198] sm:$0xff]  ;;  %v508_v2 = vld [vmem:[%s3415_s11 + $0x88] sm:$0xff]  ;;  %v2981_v3 = vpack.c.bf16 %v462_v62, %v461_v61  ;;  %v493_v5 = vld [vmem:[%s3415_s11 + $0x10] sm:$0xff] }
  0x46   : > { %v3029_v4 = vpack.c.bf16 %v478_v0, %v477_v63  ;;  %v509_v6 = vld [vmem:[%s3415_s11 + $0x90] sm:$0xff]  ;;  %v494_v7 = vld [vmem:[%s3415_s11 + $0x18] sm:$0xff]  ;;  %v495_v10 = vld [vmem:[%s3415_s11 + $0x20] sm:$0xff] }
  0x47   : > { %v510_v9 = vld [vmem:[%s3415_s11 + $0x98] sm:$0xff]  ;;  %v463_v11 = vld [vmem:[%s3410_s21 + $0x120] sm:$0xff]  ;;  %v464_v12 = vld [vmem:[%s3410_s21 + $0x128] sm:$0xff] }
  0x48   : > { %v511_v13 = vld [vmem:[%s3415_s11 + $0xa0] sm:$0xff]  ;;  %v480_v15 = vld [vmem:[%s3410_s21 + $0x1a8] sm:$0xff]  ;;  %v2987_v17 = vpack.c.bf16 %v464_v12, %v463_v11  ;;  %v497_v20 = vld [vmem:[%s3415_s11 + $0x30] sm:$0xff] }
  0x49   : > { %v479_v14 = vld [vmem:[%s3410_s21 + $0x1a0] sm:$0xff]  ;;  %v496_v16 = vld [vmem:[%s3415_s11 + $0x28] sm:$0xff]  ;;  %v514_v23 = vld [vmem:[%s3415_s11 + $0xb8] sm:$0xff] }
  0x4a   : > { %v512_v18 = vld [vmem:[%s3415_s11 + $0xa8] sm:$0xff]  ;;  %v3035_v19 = vpack.c.bf16 %v480_v15, %v479_v14  ;;  %v499_v24 = vld [vmem:[%s3415_s11 + $0x40] sm:$0xff]  ;;  %v465_v25 = vld [vmem:[%s3410_s21 + $0x130] sm:$0xff] }
  0x4b   : > { %2896 = vmatpush3.bf16.xpose.msk.msra.mxu0 %vm3427_vm1, %v2891_v21  ;;  %v513_v21 = vld [vmem:[%s3415_s11 + $0xb0] sm:$0xff]  ;;  %v466_v26 = vld [vmem:[%s3410_s21 + $0x138] sm:$0xff]  ;;  %v515_v27 = vld [vmem:[%s3415_s11 + $0xc0] sm:$0xff] }
  0x4c   : > { %2944 = vmatpush3.bf16.xpose.msk.msra.mxu1 %vm3427_vm1, %v2939_v22  ;;  %2899 = vmatprep.subr.msk.bf16.mxu0 %vm3427_vm1, %v2897_v29  ;;  %v498_v22 = vld [vmem:[%s3415_s11 + $0x38] sm:$0xff]  ;;  %v481_v28 = vld [vmem:[%s3410_s21 + $0x1b0] sm:$0xff]  ;;  %v2993_v31 = vpack.c.bf16 %v466_v26, %v465_v25  ;;  %v516_v32 = vld [vmem:[%s3415_s11 + $0xc8] sm:$0xff] }
  0x4d   : > { %2947 = vmatprep.subr.msk.bf16.mxu1 %vm3427_vm1, %v2945_v30  ;;  %v501_v34 = vld [vmem:[%s3415_s11 + $0x50] sm:$0xff]  ;;  %v518_v37 = vld [vmem:[%s3415_s11 + $0xd8] sm:$0xff]  ;;  %v503_v38 = vld [vmem:[%s3415_s11 + $0x60] sm:$0xff] }
  0x4e   : > { %v467_v39 = vld [vmem:[%s3410_s21 + $0x140] sm:$0xff]  ;;  %v468_v40 = vld [vmem:[%s3410_s21 + $0x148] sm:$0xff]  ;;  %v521_v49 = vld [vmem:[%s3415_s11 + $0xf0] sm:$0xff] }
  0x4f   : > { %v484_v43 = vld [vmem:[%s3410_s21 + $0x1c8] sm:$0xff]  ;;  %v2999_v45 = vpack.c.bf16 %v468_v40, %v467_v39  ;;  %v506_v50 = vld [vmem:[%s3415_s11 + $0x78] sm:$0xff]  ;;  %v523_v52 = vld [vmem:[%s3415_s11 + $0x100] sm:$0xff] }
  0x50   : > { %v504_v44 = vld [vmem:[%s3415_s11 + $0x68] sm:$0xff]  ;;  %v522_v51 = vld [vmem:[%s3415_s11 + $0xf8] sm:$0xff]  ;;  %v539_v55 = vld [vmem:[%s3415_s11 + $0x180] sm:$0xff] }
  0x51   : > { %v520_v46 = vld [vmem:[%s3415_s11 + $0xe8] sm:$0xff]  ;;  %v485_v56 = vld [vmem:[%s3410_s21 + $0x1d0] sm:$0xff]  ;;  %v486_v57 = vld [vmem:[%s3410_s21 + $0x1d8] sm:$0xff] }
  0x52   : > { %v472_v61 = vld [vmem:[%s3410_s21 + $0x168] sm:$0xff]  ;;  %v487_v62 = vld [vmem:[%s3410_s21 + $0x1e0] sm:$0xff]  ;;  %v525_v11 = vld [vmem:[%s3415_s11 + $0x110] sm:$0xff] }
  0x53   : > { %2902 = vmatpush3.bf16.xpose.msk.msra.mxu0 %vm3427_vm1, %v2897_v29  ;;  %v482_v29 = vld [vmem:[%s3410_s21 + $0x1b8] sm:$0xff]  ;;  %v488_v63 = vld [vmem:[%s3410_s21 + $0x1e8] sm:$0xff]  ;;  %v541_v12 = vld [vmem:[%s3415_s11 + $0x190] sm:$0xff] }
  0x54   : > { %2950 = vmatpush3.bf16.xpose.msk.msra.mxu1 %vm3427_vm1, %v2945_v30  ;;  %2905 = vmatprep.subr.msk.bf16.mxu0 %vm3427_vm1, %v2903_v35  ;;  %v500_v30 = vld [vmem:[%s3415_s11 + $0x48] sm:$0xff]  ;;  %v3041_v33 = vpack.c.bf16 %v482_v29, %v481_v28  ;;  %v542_v8 = vld [vmem:[%s3415_s11 + $0x198] sm:$0xff]  ;;  %v527_v14 = vld [vmem:[%s3415_s11 + $0x120] sm:$0xff] }
  0x55   : > { %2953 = vmatprep.subr.msk.bf16.mxu1 %vm3427_vm1, %v2951_v36  ;;  %v543_v15 = vld [vmem:[%s3415_s11 + $0x1a0] sm:$0xff]  ;;  %v548_v25 = vld [vmem:[%s3415_s11 + $0x1c8] sm:$0xff]  ;;  %v533_v26 = vld [vmem:[%s3415_s11 + $0x150] sm:$0xff] }
  0x56   : > { %v534_v28 = vld [vmem:[%s3415_s11 + $0x158] sm:$0xff]  ;;  %v3751_v39 = vld [vmem:[%s4077_s6 + $0x8] sm:$0xff] }
  0x57   : > { %v550_v29 = vld [vmem:[%s3415_s11 + $0x1d8] sm:$0xff] }
  0x5b   : > { %2908 = vmatpush3.bf16.xpose.msk.msra.mxu0 %vm3427_vm1, %v2903_v35  ;;  %v517_v35 = vld [vmem:[%s3415_s11 + $0xd0] sm:$0xff] }
  0x5c   : > { %2956 = vmatpush3.bf16.xpose.msk.msra.mxu1 %vm3427_vm1, %v2951_v36  ;;  %2911 = vmatprep.subr.msk.bf16.mxu0 %vm3427_vm1, %v2909_v41  ;;  %v502_v36 = vld [vmem:[%s3415_s11 + $0x58] sm:$0xff] }
  0x5d   : > { %2959 = vmatprep.subr.msk.bf16.mxu1 %vm3427_vm1, %v2957_v42 }
  0x63   : > { %2914 = vmatpush3.bf16.xpose.msk.msra.mxu0 %vm3427_vm1, %v2909_v41  ;;  %v519_v41 = vld [vmem:[%s3415_s11 + $0xe0] sm:$0xff] }
  0x64   : > { %2962 = vmatpush3.bf16.xpose.msk.msra.mxu1 %vm3427_vm1, %v2957_v42  ;;  %2917 = vmatprep.subr.msk.bf16.mxu0 %vm3427_vm1, %v2915_v47  ;;  %v483_v42 = vld [vmem:[%s3410_s21 + $0x1c0] sm:$0xff] }
  0x65   : > { %2965 = vmatprep.subr.msk.bf16.mxu1 %vm3427_vm1, %v2963_v48 }
  0x6b   : > { %2920 = vmatpush3.bf16.xpose.msk.msra.mxu0 %vm3427_vm1, %v2915_v47  ;;  %v3047_v47 = vpack.c.bf16 %v484_v43, %v483_v42  ;;  %v3756_v43 = vld [vmem:[%s4077_s6] sm:$0xff] }
  0x6c   : > { %2968 = vmatpush3.bf16.xpose.msk.msra.mxu1 %vm3427_vm1, %v2963_v48  ;;  %2923 = vmatprep.subr.msk.bf16.mxu0 %vm3427_vm1, %v2921_v53  ;;  %v505_v48 = vld [vmem:[%s3415_s11 + $0x70] sm:$0xff] }
  0x6d   : > { %2971 = vmatprep.subr.msk.bf16.mxu1 %vm3427_vm1, %v2969_v54 }
  0x73   : > { %2926 = vmatpush3.bf16.xpose.msk.msra.mxu0 %vm3427_vm1, %v2921_v53  ;;  %v469_v53 = vld [vmem:[%s3410_s21 + $0x150] sm:$0xff] }
  0x74   : > { %2974 = vmatpush3.bf16.xpose.msk.msra.mxu1 %vm3427_vm1, %v2969_v54  ;;  %2977 = vmatprep.subr.msk.bf16.mxu0 %vm3427_vm1, %v2975_v59  ;;  %v470_v54 = vld [vmem:[%s3410_s21 + $0x158] sm:$0xff] }
  0x75   : > { %3025 = vmatprep.subr.msk.bf16.mxu1 %vm3427_vm1, %v3023_v60  ;;  %v3005_v58 = vpack.c.bf16 %v470_v54, %v469_v53 }
  0x7a   : > { %2588 = vmatmul.mubr.msk.f32.vlgmr.msra.gmra.mrb[0].mxu0 %vm555_vm0, %v492_v1  ;;  %v3059_v1 = vpack.c.bf16 %v488_v63, %v487_v62 }
  0x7b   : > { %2644 = vmatmul.mubr.msk.f32.vlgmr.msra.gmra.mrb[0].mxu1 %vm555_vm0, %v508_v2  ;;  %2980 = vmatpush3.bf16.xpose.msk.msra.mxu0 %vm3427_vm1, %v2975_v59  ;;  %v3053_v59 = vpack.c.bf16 %v486_v57, %v485_v56  ;;  %v473_v2 = vld [vmem:[%s3410_s21 + $0x170] sm:$0xff] }
  0x7c   : > { %3028 = vmatpush3.bf16.xpose.msk.msra.mxu1 %vm3427_vm1, %v3023_v60  ;;  %2983 = vmatprep.subr.msk.bf16.mxu0 %vm3427_vm1, %v2981_v3  ;;  %v471_v60 = vld [vmem:[%s3410_s21 + $0x160] sm:$0xff]  ;;  %v3770_v57 = vld [vmem:[%s4077_s6 + $0x10] sm:$0xff] }
  0x7d   : > { %3031 = vmatprep.subr.msk.bf16.mxu1 %vm3427_vm1, %v3029_v4  ;;  %2590 = vmatprep.mubr.msk.f32.mxu0 %vm555_vm0, %v493_v5  ;;  %v3011_v0 = vpack.c.bf16 %v472_v61, %v471_v60  ;;  %v490_v5 = vld [vmem:[%s3410_s21 + $0x1f8] sm:$0xff] }
  0x7e   : > { %2646 = vmatprep.mubr.msk.f32.mxu1 %vm555_vm0, %v509_v6  ;;  %2591 = vmatmul.mubr.msk.f32.gmra.mrb[2].mxu0 %vm555_vm0, %v494_v7 }
  0x7f   : > { %2647 = vmatmul.mubr.msk.f32.gmra.mrb[2].mxu1 %vm555_vm0, %v510_v9  ;;  %2593 = vmatprep.mubr.msk.f32.mxu0 %vm555_vm0, %v495_v10  ;;  %v524_v9 = vld [vmem:[%s3415_s11 + $0x108] sm:$0xff] }
  0x80   : > { %2649 = vmatprep.mubr.msk.f32.mxu1 %vm555_vm0, %v511_v13  ;;  %v540_v10 = vld [vmem:[%s3415_s11 + $0x188] sm:$0xff]  ;;  %v526_v13 = vld [vmem:[%s3415_s11 + $0x118] sm:$0xff] }
  0x82   : > { %2594 = vmatmul.mubr.msk.f32.gmra.mrb[4].mxu0 %vm555_vm0, %v496_v16  ;;  %v528_v16 = vld [vmem:[%s3415_s11 + $0x128] sm:$0xff] }
  0x83   : > { %2986 = vmatpush3.bf16.xpose.msk.msra.mxu0 %vm3427_vm1, %v2981_v3  ;;  %2650 = vmatmul.mubr.msk.f32.gmra.mrb[4].mxu1 %vm555_vm0, %v512_v18  ;;  %v474_v3 = vld [vmem:[%s3410_s21 + $0x178] sm:$0xff]  ;;  %v529_v18 = vld [vmem:[%s3415_s11 + $0x130] sm:$0xff] }
  0x84   : > { %3034 = vmatpush3.bf16.xpose.msk.msra.mxu1 %vm3427_vm1, %v3029_v4  ;;  %2989 = vmatprep.subr.msk.bf16.mxu0 %vm3427_vm1, %v2987_v17  ;;  %v489_v4 = vld [vmem:[%s3410_s21 + $0x1f0] sm:$0xff]  ;;  %v3017_v6 = vpack.c.bf16 %v474_v3, %v473_v2 }
  0x85   : > { %3037 = vmatprep.subr.msk.bf16.mxu1 %vm3427_vm1, %v3035_v19  ;;  %2596 = vmatprep.mubr.msk.f32.mxu0 %vm555_vm0, %v497_v20  ;;  %v3065_v7 = vpack.c.bf16 %v490_v5, %v489_v4  ;;  %v530_v20 = vld [vmem:[%s3415_s11 + $0x138] sm:$0xff]  ;;  %v3778_v4 = vld [vmem:[%s4077_s6 + $0x28] sm:$0xff] }
  0x86   : > { %2652 = vmatprep.mubr.msk.f32.mxu1 %vm555_vm0, %v513_v21  ;;  %2597 = vmatmul.mubr.msk.f32.gmra.mrb[6].mxu0 %vm555_vm0, %v498_v22  ;;  %v546_v21 = vld [vmem:[%s3415_s11 + $0x1b8] sm:$0xff]  ;;  %v531_v22 = vld [vmem:[%s3415_s11 + $0x140] sm:$0xff] }
  0x87   : > { %2653 = vmatmul.mubr.msk.f32.gmra.mrb[6].mxu1 %vm555_vm0, %v514_v23  ;;  %2599 = vmatprep.mubr.msk.f32.mxu0 %vm555_vm0, %v499_v24  ;;  %v547_v23 = vld [vmem:[%s3415_s11 + $0x1c0] sm:$0xff]  ;;  %v532_v24 = vld [vmem:[%s3415_s11 + $0x148] sm:$0xff] }
  0x88   : > { %2655 = vmatprep.mubr.msk.f32.mxu1 %vm555_vm0, %v515_v27  ;;  %v549_v27 = vld [vmem:[%s3415_s11 + $0x1d0] sm:$0xff] }
  0x8a   : > { %2600 = vmatmul.mubr.msk.f32.gmra.mrb[8].mxu0 %vm555_vm0, %v500_v30  ;;  %v535_v30 = vld [vmem:[%s3415_s11 + $0x160] sm:$0xff] }
  0x8b   : > { %2992 = vmatpush3.bf16.xpose.msk.msra.mxu0 %vm3427_vm1, %v2987_v17  ;;  %2656 = vmatmul.mubr.msk.f32.gmra.mrb[8].mxu1 %vm555_vm0, %v516_v32  ;;  %v544_v17 = vld [vmem:[%s3415_s11 + $0x1a8] sm:$0xff] }
  0x8c   : > { %3040 = vmatpush3.bf16.xpose.msk.msra.mxu1 %vm3427_vm1, %v3035_v19  ;;  %2995 = vmatprep.subr.msk.bf16.mxu0 %vm3427_vm1, %v2993_v31  ;;  %v545_v19 = vld [vmem:[%s3415_s11 + $0x1b0] sm:$0xff]  ;;  %v536_v32 = vld [vmem:[%s3415_s11 + $0x168] sm:$0xff] }
  0x8d   : > { %3043 = vmatprep.subr.msk.bf16.mxu1 %vm3427_vm1, %v3041_v33  ;;  %2602 = vmatprep.mubr.msk.f32.mxu0 %vm555_vm0, %v501_v34  ;;  %v537_v34 = vld [vmem:[%s3415_s11 + $0x170] sm:$0xff] }
  0x8e   : > { %2658 = vmatprep.mubr.msk.f32.mxu1 %vm555_vm0, %v517_v35  ;;  %2603 = vmatmul.mubr.msk.f32.gmra.mrb[10].mxu0 %vm555_vm0, %v502_v36  ;;  %v553_v35 = vld [vmem:[%s3415_s11 + $0x1f0] sm:$0xff]  ;;  %v538_v36 = vld [vmem:[%s3415_s11 + $0x178] sm:$0xff] }
  0x8f   : > { %2659 = vmatmul.mubr.msk.f32.gmra.mrb[10].mxu1 %vm555_vm0, %v518_v37  ;;  %2605 = vmatprep.mubr.msk.f32.mxu0 %vm555_vm0, %v503_v38  ;;  %v554_v37 = vld [vmem:[%s3415_s11 + $0x1f8] sm:$0xff] }
  0x90   : > { %2661 = vmatprep.mubr.msk.f32.mxu1 %vm555_vm0, %v519_v41 }
  0x92   : > { %2606 = vmatmul.mubr.msk.f32.gmra.mrb[12].mxu0 %vm555_vm0, %v504_v44 }
  0x93   : > { %2998 = vmatpush3.bf16.xpose.msk.msra.mxu0 %vm3427_vm1, %v2993_v31  ;;  %2662 = vmatmul.mubr.msk.f32.gmra.mrb[12].mxu1 %vm555_vm0, %v520_v46  ;;  %v551_v31 = vld [vmem:[%s3415_s11 + $0x1e0] sm:$0xff] }
  0x94   : > { %3046 = vmatpush3.bf16.xpose.msk.msra.mxu1 %vm3427_vm1, %v3041_v33  ;;  %3001 = vmatprep.subr.msk.bf16.mxu0 %vm3427_vm1, %v2999_v45  ;;  %v552_v33 = vld [vmem:[%s3415_s11 + $0x1e8] sm:$0xff] }
  0x95   : > { %3049 = vmatprep.subr.msk.bf16.mxu1 %vm3427_vm1, %v3047_v47  ;;  %2608 = vmatprep.mubr.msk.f32.mxu0 %vm555_vm0, %v505_v48 }
  0x96   : > { %2664 = vmatprep.mubr.msk.f32.mxu1 %vm555_vm0, %v521_v49  ;;  %2609 = vmatmul.mubr.msk.f32.gmra.mrb[14].mxu0 %vm555_vm0, %v506_v50 }
  0x97   : > { %2665 = vmatmul.mubr.msk.f32.gmra.mrb[14].mxu1 %vm555_vm0, %v522_v51  ;;  %2699 = vmatprep.mubr.msk.f32.mxu0 %vm555_vm0, %v523_v52  ;;  %v3764_v52 = vld [vmem:[%s4077_s6 + $0x18] sm:$0xff] }
  0x98   : > { %2755 = vmatprep.mubr.msk.f32.mxu1 %vm555_vm0, %v539_v55 }
  0x9b   : > { %3004 = vmatpush3.bf16.xpose.msk.msra.mxu0 %vm3427_vm1, %v2999_v45 }
  0x9c   : > { %3052 = vmatpush3.bf16.xpose.msk.msra.mxu1 %vm3427_vm1, %v3047_v47  ;;  %3007 = vmatprep.subr.msk.bf16.mxu0 %vm3427_vm1, %v3005_v58 }
  0x9d   : > { %3055 = vmatprep.subr.msk.bf16.mxu1 %vm3427_vm1, %v3053_v59 }
  0xa3   : > { %3010 = vmatpush3.bf16.xpose.msk.msra.mxu0 %vm3427_vm1, %v3005_v58 }
  0xa4   : > { %3058 = vmatpush3.bf16.xpose.msk.msra.mxu1 %vm3427_vm1, %v3053_v59  ;;  %3013 = vmatprep.subr.msk.bf16.mxu0 %vm3427_vm1, %v3011_v0 }
  0xa5   : > { %3061 = vmatprep.subr.msk.bf16.mxu1 %vm3427_vm1, %v3059_v1 }
  0xab   : > { %3016 = vmatpush3.bf16.xpose.msk.msra.mxu0 %vm3427_vm1, %v3011_v0 }
  0xac   : > { %3064 = vmatpush3.bf16.xpose.msk.msra.mxu1 %vm3427_vm1, %v3059_v1  ;;  %3019 = vmatprep.subr.msk.bf16.mxu0 %vm3427_vm1, %v3017_v6 }
  0xad   : > { %3067 = vmatprep.subr.msk.bf16.mxu1 %vm3427_vm1, %v3065_v7 }
  0xb3   : > { %3022 = vmatpush3.bf16.xpose.msk.msra.mxu0 %vm3427_vm1, %v3017_v6 }
  0xb4   : > { %3070 = vmatpush3.bf16.xpose.msk.msra.mxu1 %vm3427_vm1, %v3065_v7 }
  0xba   : > { %2700 = vmatmul.mubr.msk.f32.vlgmr.msra.gmra.mrb[16].mxu0 %vm555_vm0, %v524_v9 }
  0xbb   : > { %2756 = vmatmul.mubr.msk.f32.vlgmr.msra.gmra.mrb[16].mxu1 %vm555_vm0, %v540_v10  ;;  %2702 = vmatprep.mubr.msk.f32.mxu0 %vm555_vm0, %v525_v11  ;;  %v3784_v10 = vld [vmem:[%s4077_s6 + $0x20] sm:$0xff] }
  0xbc   : > { %2758 = vmatprep.mubr.msk.f32.mxu1 %vm555_vm0, %v541_v12 }
  0xbe   : > { %2703 = vmatmul.mubr.msk.f32.gmra.mrb[18].mxu0 %vm555_vm0, %v526_v13 }
  0xbf   : > { %2759 = vmatmul.mubr.msk.f32.gmra.mrb[18].mxu1 %vm555_vm0, %v542_v8  ;;  %2705 = vmatprep.mubr.msk.f32.mxu0 %vm555_vm0, %v527_v14 }
  0xc0   : > { %2761 = vmatprep.mubr.msk.f32.mxu1 %vm555_vm0, %v543_v15 }
  0xc2   : > { %2706 = vmatmul.mubr.msk.f32.gmra.mrb[20].mxu0 %vm555_vm0, %v528_v16 }
  0xc3   : > { %2762 = vmatmul.mubr.msk.f32.gmra.mrb[20].mxu1 %vm555_vm0, %v544_v17  ;;  %2708 = vmatprep.mubr.msk.f32.mxu0 %vm555_vm0, %v529_v18 }
  0xc4   : > { %2764 = vmatprep.mubr.msk.f32.mxu1 %vm555_vm0, %v545_v19 }
  0xc6   : > { %2709 = vmatmul.mubr.msk.f32.gmra.mrb[22].mxu0 %vm555_vm0, %v530_v20  ;;  %v3792_v20 = vld [vmem:[%s4077_s6 + $0x38] sm:$0xff] }
  0xc7   : > { %2765 = vmatmul.mubr.msk.f32.gmra.mrb[22].mxu1 %vm555_vm0, %v546_v21  ;;  %2711 = vmatprep.mubr.msk.f32.mxu0 %vm555_vm0, %v531_v22 }
  0xc8   : > { %2767 = vmatprep.mubr.msk.f32.mxu1 %vm555_vm0, %v547_v23 }
  0xca   : > { %2712 = vmatmul.mubr.msk.f32.gmra.mrb[24].mxu0 %vm555_vm0, %v532_v24 }
  0xcb   : > { %2768 = vmatmul.mubr.msk.f32.gmra.mrb[24].mxu1 %vm555_vm0, %v548_v25  ;;  %2714 = vmatprep.mubr.msk.f32.mxu0 %vm555_vm0, %v533_v26  ;;  %v3798_v25 = vld [vmem:[%s4077_s6 + $0x30] sm:$0xff] }
  0xcc   : > { %2770 = vmatprep.mubr.msk.f32.mxu1 %vm555_vm0, %v549_v27 }
  0xce   : > { %2715 = vmatmul.mubr.msk.f32.gmra.mrb[26].mxu0 %vm555_vm0, %v534_v28 }
  0xcf   : > { %2771 = vmatmul.mubr.msk.f32.gmra.mrb[26].mxu1 %vm555_vm0, %v550_v29  ;;  %2717 = vmatprep.mubr.msk.f32.mxu0 %vm555_vm0, %v535_v30 }
  0xd0   : > { %2773 = vmatprep.mubr.msk.f32.mxu1 %vm555_vm0, %v551_v31 }
  0xd2   : > { %2718 = vmatmul.mubr.msk.f32.gmra.mrb[28].mxu0 %vm555_vm0, %v536_v32 }
  0xd3   : > { %2774 = vmatmul.mubr.msk.f32.gmra.mrb[28].mxu1 %vm555_vm0, %v552_v33  ;;  %2720 = vmatprep.mubr.msk.f32.mxu0 %vm555_vm0, %v537_v34 }
  0xd4   : > { %2776 = vmatprep.mubr.msk.f32.mxu1 %vm555_vm0, %v553_v35 }
  0xd6   : > { %2721 = vmatmul.mubr.msk.f32.gmra.mrb[30].mxu0 %vm555_vm0, %v538_v36  ;;  %v3806_v36 = vld [vmem:[%s4077_s6 + $0x48] sm:$0xff] }
  0xd7   : > { %2777 = vmatmul.mubr.msk.f32.gmra.mrb[30].mxu1 %vm555_vm0, %v554_v37 }
 0x14d   : > { %v2589_v38 = vpop.f32.mrb[0].mxu0 }
 0x14e   : > { %v1521_v40 = vmul.f32 0.001953125, %v2589_v38  ;;  %v2645_v41 = vpop.f32.mrb[0].mxu1  ;;  %v718_v42 = vpop.f32.mrb[1].mxu0 }
 0x14f   : > { %v1537_v44 = vmul.f32 0.001953125, %v2645_v41  ;;  %v1520_v45 = vmul.f32 0.001953125, %v718_v42  ;;  %v959_v46 = vpop.f32.mrb[1].mxu1  ;;  %v3812_v42 = vld [vmem:[%s4077_s6 + $0x40] sm:$0xff] }
 0x150   : > { %v1601_v47 = vadd.f32 %v3751_v39, %v1521_v40  ;;  %v1536_v48 = vmul.f32 0.001953125, %v959_v46 }
 0x151   : > { %v1617_v49 = vadd.f32 %v3751_v39, %v1537_v44  ;;  %v1600_v50 = vadd.f32 %v3756_v43, %v1520_v45  ;;  %v2592_v51 = vpop.f32.mrb[2].mxu0 }
 0x152   : > { %v1616_v53 = vadd.f32 %v3756_v43, %v1536_v48  ;;  %v1523_v54 = vmul.f32 0.001953125, %v2592_v51  ;;  %v2648_v55 = vpop.f32.mrb[2].mxu1  ;;  %v728_v56 = vpop.f32.mrb[3].mxu0 }
 0x153   : > { %v1664_v58 = vpack.c.bf16 %v1601_v47, %v1600_v50  ;;  %v1539_v59 = vmul.f32 0.001953125, %v2648_v55  ;;  %v1522_v60 = vmul.f32 0.001953125, %v728_v56  ;;  %v969_v61 = vpop.f32.mrb[3].mxu1  ;;  %v3820_v55 = vld [vmem:[%s4077_s6 + $0x58] sm:$0xff] }
 0x154   : > { %v1672_v62 = vpack.c.bf16 %v1617_v49, %v1616_v53  ;;  %v1603_v63 = vadd.f32 %v3764_v52, %v1523_v54  ;;  %v1538_v0 = vmul.f32 0.001953125, %v969_v61  ;;  %v3826_v61 = vld [vmem:[%s4077_s6 + $0x50] sm:$0xff] }
 0x155   : > { %1696 = vst [vmem:[#allocation2] sm:$0xff] %v1664_v58  ;;  %v1619_v1 = vadd.f32 %v3764_v52, %v1539_v59  ;;  %v1602_v2 = vadd.f32 %v3770_v57, %v1522_v60  ;;  %v2595_v3 = vpop.f32.mrb[4].mxu0 }
 0x156   : > { %1704 = vst [vmem:[#allocation2 + $0x40] sm:$0xff] %v1672_v62  ;;  %v1618_v5 = vadd.f32 %v3770_v57, %v1538_v0  ;;  %v1525_v6 = vmul.f32 0.001953125, %v2595_v3  ;;  %v2651_v7 = vpop.f32.mrb[4].mxu1  ;;  %v738_v9 = vpop.f32.mrb[5].mxu0 }
 0x157   : > { %v1665_v11 = vpack.c.bf16 %v1603_v63, %v1602_v2  ;;  %v1541_v12 = vmul.f32 0.001953125, %v2651_v7  ;;  %v1524_v13 = vmul.f32 0.001953125, %v738_v9  ;;  %v979_v8 = vpop.f32.mrb[5].mxu1 }
 0x158   : > { %v1673_v14 = vpack.c.bf16 %v1619_v1, %v1618_v5  ;;  %v1605_v15 = vadd.f32 %v3778_v4, %v1525_v6  ;;  %v1540_v16 = vmul.f32 0.001953125, %v979_v8 }
 0x159   : > { %1697 = vst [vmem:[#allocation2 + $0x8] sm:$0xff] %v1665_v11  ;;  %v1621_v17 = vadd.f32 %v3778_v4, %v1541_v12  ;;  %v1604_v18 = vadd.f32 %v3784_v10, %v1524_v13  ;;  %v2598_v19 = vpop.f32.mrb[6].mxu0  ;;  %v3834_v11 = vld [vmem:[%s4077_s6 + $0x68] sm:$0xff] }
 0x15a   : > { %1705 = vst [vmem:[#allocation2 + $0x48] sm:$0xff] %v1673_v14  ;;  %v1620_v21 = vadd.f32 %v3784_v10, %v1540_v16  ;;  %v1527_v22 = vmul.f32 0.001953125, %v2598_v19  ;;  %v2654_v23 = vpop.f32.mrb[6].mxu1  ;;  %v748_v24 = vpop.f32.mrb[7].mxu0 }
 0x15b   : > { %v1666_v26 = vpack.c.bf16 %v1605_v15, %v1604_v18  ;;  %v1543_v27 = vmul.f32 0.001953125, %v2654_v23  ;;  %v1526_v28 = vmul.f32 0.001953125, %v748_v24  ;;  %v989_v29 = vpop.f32.mrb[7].mxu1  ;;  %v3840_v15 = vld [vmem:[%s4077_s6 + $0x60] sm:$0xff] }
 0x15c   : > { %v1674_v30 = vpack.c.bf16 %v1621_v17, %v1620_v21  ;;  %v1607_v31 = vadd.f32 %v3792_v20, %v1527_v22  ;;  %v1542_v32 = vmul.f32 0.001953125, %v989_v29 }
 0x15d   : > { %1698 = vst [vmem:[#allocation2 + $0x10] sm:$0xff] %v1666_v26  ;;  %v1623_v33 = vadd.f32 %v3792_v20, %v1543_v27  ;;  %v1606_v34 = vadd.f32 %v3798_v25, %v1526_v28  ;;  %v2601_v35 = vpop.f32.mrb[8].mxu0  ;;  %v3848_v28 = vld [vmem:[%s4077_s6 + $0x78] sm:$0xff] }
 0x15e   : > { %1706 = vst [vmem:[#allocation2 + $0x50] sm:$0xff] %v1674_v30  ;;  %v1622_v37 = vadd.f32 %v3798_v25, %v1542_v32  ;;  %v1529_v38 = vmul.f32 0.001953125, %v2601_v35  ;;  %v2657_v40 = vpop.f32.mrb[8].mxu1  ;;  %v758_v41 = vpop.f32.mrb[9].mxu0 }
 0x15f   : > { %v1667_v44 = vpack.c.bf16 %v1607_v31, %v1606_v34  ;;  %v1545_v45 = vmul.f32 0.001953125, %v2657_v40  ;;  %v1528_v46 = vmul.f32 0.001953125, %v758_v41  ;;  %v999_v47 = vpop.f32.mrb[9].mxu1 }
 0x160   : > { %v1675_v48 = vpack.c.bf16 %v1623_v33, %v1622_v37  ;;  %v1609_v49 = vadd.f32 %v3806_v36, %v1529_v38  ;;  %v1544_v50 = vmul.f32 0.001953125, %v999_v47  ;;  %v3854_v33 = vld [vmem:[%s4077_s6 + $0x70] sm:$0xff] }
 0x161   : > { %1699 = vst [vmem:[#allocation2 + $0x18] sm:$0xff] %v1667_v44  ;;  %v1625_v51 = vadd.f32 %v3806_v36, %v1545_v45  ;;  %v1608_v53 = vadd.f32 %v3812_v42, %v1528_v46  ;;  %v2604_v54 = vpop.f32.mrb[10].mxu0 }
 0x162   : > { %1707 = vst [vmem:[#allocation2 + $0x58] sm:$0xff] %v1675_v48  ;;  %v1624_v56 = vadd.f32 %v3812_v42, %v1544_v50  ;;  %v1531_v58 = vmul.f32 0.001953125, %v2604_v54  ;;  %v2660_v59 = vpop.f32.mrb[10].mxu1  ;;  %v768_v60 = vpop.f32.mrb[11].mxu0 }
 0x163   : > { %v1668_v62 = vpack.c.bf16 %v1609_v49, %v1608_v53  ;;  %v1547_v63 = vmul.f32 0.001953125, %v2660_v59  ;;  %v1530_v0 = vmul.f32 0.001953125, %v768_v60  ;;  %v1009_v1 = vpop.f32.mrb[11].mxu1 }
 0x164   : > { %v1676_v2 = vpack.c.bf16 %v1625_v51, %v1624_v56  ;;  %v1611_v3 = vadd.f32 %v3820_v55, %v1531_v58  ;;  %v1546_v5 = vmul.f32 0.001953125, %v1009_v1 }
 0x165   : > { %1700 = vst [vmem:[#allocation2 + $0x20] sm:$0xff] %v1668_v62  ;;  %v1627_v6 = vadd.f32 %v3820_v55, %v1547_v63  ;;  %v1610_v7 = vadd.f32 %v3826_v61, %v1530_v0  ;;  %v2607_v9 = vpop.f32.mrb[12].mxu0 }
 0x166   : > { %1708 = vst [vmem:[#allocation2 + $0x60] sm:$0xff] %v1676_v2  ;;  %v1626_v12 = vadd.f32 %v3826_v61, %v1546_v5  ;;  %v1533_v13 = vmul.f32 0.001953125, %v2607_v9  ;;  %v2663_v8 = vpop.f32.mrb[12].mxu1  ;;  %v778_v14 = vpop.f32.mrb[13].mxu0 }
 0x167   : > { %v1669_v16 = vpack.c.bf16 %v1611_v3, %v1610_v7  ;;  %v1549_v17 = vmul.f32 0.001953125, %v2663_v8  ;;  %v1532_v18 = vmul.f32 0.001953125, %v778_v14  ;;  %v1019_v19 = vpop.f32.mrb[13].mxu1 }
 0x168   : > { %v1677_v21 = vpack.c.bf16 %v1627_v6, %v1626_v12  ;;  %v1613_v22 = vadd.f32 %v3834_v11, %v1533_v13  ;;  %v1548_v23 = vmul.f32 0.001953125, %v1019_v19 }
 0x169   : > { %1701 = vst [vmem:[#allocation2 + $0x28] sm:$0xff] %v1669_v16  ;;  %v1629_v24 = vadd.f32 %v3834_v11, %v1549_v17  ;;  %v1612_v26 = vadd.f32 %v3840_v15, %v1532_v18  ;;  %v2610_v27 = vpop.f32.mrb[14].mxu0 }
 0x16a   : > { %1709 = vst [vmem:[#allocation2 + $0x68] sm:$0xff] %v1677_v21  ;;  %v1628_v29 = vadd.f32 %v3840_v15, %v1548_v23  ;;  %v1535_v30 = vmul.f32 0.001953125, %v2610_v27  ;;  %v2666_v31 = vpop.f32.mrb[14].mxu1  ;;  %v788_v32 = vpop.f32.mrb[15].mxu0 }
 0x16b   : > { %v1670_v34 = vpack.c.bf16 %v1613_v22, %v1612_v26  ;;  %v1551_v35 = vmul.f32 0.001953125, %v2666_v31  ;;  %v1534_v37 = vmul.f32 0.001953125, %v788_v32  ;;  %v1029_v38 = vpop.f32.mrb[15].mxu1 }
 0x16c   : > { %v1678_v40 = vpack.c.bf16 %v1629_v24, %v1628_v29  ;;  %v1615_v41 = vadd.f32 %v3848_v28, %v1535_v30  ;;  %v1550_v44 = vmul.f32 0.001953125, %v1029_v38 }
 0x16d   : > { %1702 = vst [vmem:[#allocation2 + $0x30] sm:$0xff] %v1670_v34  ;;  %v1631_v45 = vadd.f32 %v3848_v28, %v1551_v35  ;;  %v1614_v46 = vadd.f32 %v3854_v33, %v1534_v37 }
 0x16e   : > { %1710 = vst [vmem:[#allocation2 + $0x70] sm:$0xff] %v1678_v40  ;;  %v1630_v47 = vadd.f32 %v3854_v33, %v1550_v44 }
 0x16f   : > { %v1671_v48 = vpack.c.bf16 %v1615_v41, %v1614_v46 }
 0x170   : > { %v1679_v49 = vpack.c.bf16 %v1631_v45, %v1630_v47 }
 0x171   : > { %1703 = vst [vmem:[#allocation2 + $0x38] sm:$0xff] %v1671_v48 }
 0x172   : > { %1711 = vst [vmem:[#allocation2 + $0x78] sm:$0xff] %v1679_v49 }
 0x18d   : > { %v2701_v50 = vpop.f32.mrb[16].mxu0 }
 0x18e   : > { %v1553_v51 = vmul.f32 0.001953125, %v2701_v50  ;;  %v2757_v53 = vpop.f32.mrb[16].mxu1  ;;  %v1200_v54 = vpop.f32.mrb[17].mxu0 }
 0x18f   : > { %v1569_v56 = vmul.f32 0.001953125, %v2757_v53  ;;  %v1552_v58 = vmul.f32 0.001953125, %v1200_v54  ;;  %v1441_v59 = vpop.f32.mrb[17].mxu1 }
 0x190   : > { %v1633_v60 = vadd.f32 %v3751_v39, %v1553_v51  ;;  %v1568_v62 = vmul.f32 0.001953125, %v1441_v59 }
 0x191   : > { %v1649_v63 = vadd.f32 %v3751_v39, %v1569_v56  ;;  %v1632_v0 = vadd.f32 %v3756_v43, %v1552_v58  ;;  %v2704_v1 = vpop.f32.mrb[18].mxu0 }
 0x192   : > { %v1648_v2 = vadd.f32 %v3756_v43, %v1568_v62  ;;  %v1555_v3 = vmul.f32 0.001953125, %v2704_v1  ;;  %v2760_v5 = vpop.f32.mrb[18].mxu1  ;;  %v1210_v6 = vpop.f32.mrb[19].mxu0 }
 0x193   : > { %v1680_v7 = vpack.c.bf16 %v1633_v60, %v1632_v0  ;;  %v1571_v9 = vmul.f32 0.001953125, %v2760_v5  ;;  %v1554_v12 = vmul.f32 0.001953125, %v1210_v6  ;;  %v1451_v13 = vpop.f32.mrb[19].mxu1 }
 0x194   : > { %v1688_v8 = vpack.c.bf16 %v1649_v63, %v1648_v2  ;;  %v1635_v14 = vadd.f32 %v3764_v52, %v1555_v3  ;;  %v1570_v16 = vmul.f32 0.001953125, %v1451_v13 }
 0x195   : > { %1712 = vst [vmem:[#allocation2 + $0x80] sm:$0xff] %v1680_v7  ;;  %v1651_v17 = vadd.f32 %v3764_v52, %v1571_v9  ;;  %v1634_v39 = vadd.f32 %v3770_v57, %v1554_v12  ;;  %v2707_v18 = vpop.f32.mrb[20].mxu0 }
 0x196   : > { %1720 = vst [vmem:[#allocation2 + $0xc0] sm:$0xff] %v1688_v8  ;;  %v1650_v43 = vadd.f32 %v3770_v57, %v1570_v16  ;;  %v1557_v19 = vmul.f32 0.001953125, %v2707_v18  ;;  %v2763_v21 = vpop.f32.mrb[20].mxu1  ;;  %v1220_v22 = vpop.f32.mrb[21].mxu0 }
 0x197   : > { %v1681_v23 = vpack.c.bf16 %v1635_v14, %v1634_v39  ;;  %v1573_v24 = vmul.f32 0.001953125, %v2763_v21  ;;  %v1556_v26 = vmul.f32 0.001953125, %v1220_v22  ;;  %v1461_v27 = vpop.f32.mrb[21].mxu1 }
 0x198   : > { %v1689_v29 = vpack.c.bf16 %v1651_v17, %v1650_v43  ;;  %v1637_v30 = vadd.f32 %v3778_v4, %v1557_v19  ;;  %v1572_v31 = vmul.f32 0.001953125, %v1461_v27 }
 0x199   : > { %1713 = vst [vmem:[#allocation2 + $0x88] sm:$0xff] %v1681_v23  ;;  %v1653_v52 = vadd.f32 %v3778_v4, %v1573_v24  ;;  %v1636_v32 = vadd.f32 %v3784_v10, %v1556_v26  ;;  %v2710_v34 = vpop.f32.mrb[22].mxu0 }
 0x19a   : > { %1721 = vst [vmem:[#allocation2 + $0xc8] sm:$0xff] %v1689_v29  ;;  %v1652_v57 = vadd.f32 %v3784_v10, %v1572_v31  ;;  %v1559_v35 = vmul.f32 0.001953125, %v2710_v34  ;;  %v2766_v37 = vpop.f32.mrb[22].mxu1  ;;  %v1230_v38 = vpop.f32.mrb[23].mxu0 }
 0x19b   : > { %v1682_v40 = vpack.c.bf16 %v1637_v30, %v1636_v32  ;;  %v1575_v41 = vmul.f32 0.001953125, %v2766_v37  ;;  %v1558_v44 = vmul.f32 0.001953125, %v1230_v38  ;;  %v1471_v45 = vpop.f32.mrb[23].mxu1 }
 0x19c   : > { %v1690_v46 = vpack.c.bf16 %v1653_v52, %v1652_v57  ;;  %v1639_v47 = vadd.f32 %v3792_v20, %v1559_v35  ;;  %v1574_v48 = vmul.f32 0.001953125, %v1471_v45 }
 0x19d   : > { %1714 = vst [vmem:[#allocation2 + $0x90] sm:$0xff] %v1682_v40  ;;  %v1655_v4 = vadd.f32 %v3792_v20, %v1575_v41  ;;  %v1638_v49 = vadd.f32 %v3798_v25, %v1558_v44  ;;  %v2713_v50 = vpop.f32.mrb[24].mxu0 }
 0x19e   : > { %1722 = vst [vmem:[#allocation2 + $0xd0] sm:$0xff] %v1690_v46  ;;  %v1654_v10 = vadd.f32 %v3798_v25, %v1574_v48  ;;  %v1561_v51 = vmul.f32 0.001953125, %v2713_v50  ;;  %v2769_v53 = vpop.f32.mrb[24].mxu1  ;;  %v1240_v54 = vpop.f32.mrb[25].mxu0 }
 0x19f   : > { %v1683_v56 = vpack.c.bf16 %v1639_v47, %v1638_v49  ;;  %v1577_v58 = vmul.f32 0.001953125, %v2769_v53  ;;  %v1560_v59 = vmul.f32 0.001953125, %v1240_v54  ;;  %v1481_v60 = vpop.f32.mrb[25].mxu1 }
 0x1a0   : > { %v1691_v62 = vpack.c.bf16 %v1655_v4, %v1654_v10  ;;  %v1641_v63 = vadd.f32 %v3806_v36, %v1561_v51  ;;  %v1576_v0 = vmul.f32 0.001953125, %v1481_v60 }
 0x1a1   : > { %1715 = vst [vmem:[#allocation2 + $0x98] sm:$0xff] %v1683_v56  ;;  %v1657_v20 = vadd.f32 %v3806_v36, %v1577_v58  ;;  %v1640_v1 = vadd.f32 %v3812_v42, %v1560_v59  ;;  %v2716_v2 = vpop.f32.mrb[26].mxu0 }
 0x1a2   : > { %1723 = vst [vmem:[#allocation2 + $0xd8] sm:$0xff] %v1691_v62  ;;  %v1656_v25 = vadd.f32 %v3812_v42, %v1576_v0  ;;  %v1563_v3 = vmul.f32 0.001953125, %v2716_v2  ;;  %v2772_v5 = vpop.f32.mrb[26].mxu1  ;;  %v1250_v6 = vpop.f32.mrb[27].mxu0 }
 0x1a3   : > { %v1684_v7 = vpack.c.bf16 %v1641_v63, %v1640_v1  ;;  %v1579_v9 = vmul.f32 0.001953125, %v2772_v5  ;;  %v1562_v12 = vmul.f32 0.001953125, %v1250_v6  ;;  %v1491_v13 = vpop.f32.mrb[27].mxu1 }
 0x1a4   : > { %v1692_v8 = vpack.c.bf16 %v1657_v20, %v1656_v25  ;;  %v1643_v14 = vadd.f32 %v3820_v55, %v1563_v3  ;;  %v1578_v16 = vmul.f32 0.001953125, %v1491_v13 }
 0x1a5   : > { %1716 = vst [vmem:[#allocation2 + $0xa0] sm:$0xff] %v1684_v7  ;;  %v1659_v36 = vadd.f32 %v3820_v55, %v1579_v9  ;;  %v1642_v17 = vadd.f32 %v3826_v61, %v1562_v12  ;;  %v2719_v39 = vpop.f32.mrb[28].mxu0 }
 0x1a6   : > { %1724 = vst [vmem:[#allocation2 + $0xe0] sm:$0xff] %v1692_v8  ;;  %v1658_v42 = vadd.f32 %v3826_v61, %v1578_v16  ;;  %v1565_v18 = vmul.f32 0.001953125, %v2719_v39  ;;  %v2775_v43 = vpop.f32.mrb[28].mxu1  ;;  %v1260_v19 = vpop.f32.mrb[29].mxu0 }
 0x1a7   : > { %v1685_v21 = vpack.c.bf16 %v1643_v14, %v1642_v17  ;;  %v1581_v22 = vmul.f32 0.001953125, %v2775_v43  ;;  %v1564_v23 = vmul.f32 0.001953125, %v1260_v19  ;;  %v1501_v24 = vpop.f32.mrb[29].mxu1 }
 0x1a8   : > { %v1693_v26 = vpack.c.bf16 %v1659_v36, %v1658_v42  ;;  %v1645_v27 = vadd.f32 %v3834_v11, %v1565_v18  ;;  %v1580_v29 = vmul.f32 0.001953125, %v1501_v24 }
 0x1a9   : > { %1717 = vst [vmem:[#allocation2 + $0xa8] sm:$0xff] %v1685_v21  ;;  %v1661_v55 = vadd.f32 %v3834_v11, %v1581_v22  ;;  %v1644_v30 = vadd.f32 %v3840_v15, %v1564_v23  ;;  %v2722_v31 = vpop.f32.mrb[30].mxu0 }
 0x1aa   : > { %1725 = vst [vmem:[#allocation2 + $0xe8] sm:$0xff] %v1693_v26  ;;  %v1660_v61 = vadd.f32 %v3840_v15, %v1580_v29  ;;  %v1567_v52 = vmul.f32 0.001953125, %v2722_v31  ;;  %v2778_v32 = vpop.f32.mrb[30].mxu1  ;;  %v1270_v34 = vpop.f32.mrb[31].mxu0 }
 0x1ab   : > { %v1686_v57 = vpack.c.bf16 %v1645_v27, %v1644_v30  ;;  %v1583_v35 = vmul.f32 0.001953125, %v2778_v32  ;;  %v1566_v37 = vmul.f32 0.001953125, %v1270_v34  ;;  %v1511_v38 = vpop.f32.mrb[31].mxu1 }
 0x1ac   : > { %v1694_v40 = vpack.c.bf16 %v1661_v55, %v1660_v61  ;;  %v1647_v41 = vadd.f32 %v3848_v28, %v1567_v52  ;;  %v1582_v44 = vmul.f32 0.001953125, %v1511_v38 }
 0x1ad   : > { %1718 = vst [vmem:[#allocation2 + $0xb0] sm:$0xff] %v1686_v57  ;;  %v1663_v11 = vadd.f32 %v3848_v28, %v1583_v35  ;;  %v1646_v45 = vadd.f32 %v3854_v33, %v1566_v37 }
 0x1ae   : > { %1726 = vst [vmem:[#allocation2 + $0xf0] sm:$0xff] %v1694_v40  ;;  %v1662_v46 = vadd.f32 %v3854_v33, %v1582_v44 }
 0x1af   : > { %v1687_v15 = vpack.c.bf16 %v1647_v41, %v1646_v45 }
 0x1b0   : > { %v1695_v47 = vpack.c.bf16 %v1663_v11, %v1662_v46 }
 0x1b1   : > { %1719 = vst [vmem:[#allocation2 + $0xb8] sm:$0xff] %v1687_v15 }
 0x1b2   : > { %1727 = vst [vmem:[#allocation2 + $0xf8] sm:$0xff] %v1695_v47 }
 0x1b3 PF: > { %v1734_v48 = vld [vmem:[%s4075_s4] sm:$0xff]  ;;  %v1735_v28 = vld [vmem:[%s4075_s4 + $0x8] sm:$0xff]  ;;  %v1736_v4 = vld [vmem:[%s4075_s4 + $0x10] sm:$0xff]  ;;  %v3259_v16 = vmov 0.0   ;;  %vm3260_vm2 = vmmov 0   ;;  %v1823_v57 = vlaneseq  ;;  %s2375_s18 = sshll.u32 %s3245_s9, 3 }
 0x1b4   : > { %v1750_v33 = vpack.c.bf16 %v1735_v28, %v1734_v48  ;;  %v1737_v49 = vld [vmem:[%s4075_s4 + $0x18] sm:$0xff]  ;;  %v1738_v10 = vld [vmem:[%s4075_s4 + $0x20] sm:$0xff]  ;;  %v1739_v51 = vld [vmem:[%s4075_s4 + $0x28] sm:$0xff]  ;;  %2799 = vmatprep.subr.bf16.mxu1 %v3259_v16  ;;  %2815 = vmatprep.mubr.msk.bf16.mxu1 %vm3260_vm2, %v3259_v16  ;;  %s2103_s0 = sshll.u32 %s3419_s10, 4  ;;  %s3261_s11 = smov [#allocation4]   ;;  %s4013_s0 = int_to_ptr.vmem [resolvable:$true] %s2103_s0 }
 0x1b5   : > { %v1751_v50 = vpack.c.bf16 %v1737_v49, %v1736_v4  ;;  %v1752_v53 = vpack.c.bf16 %v1739_v51, %v1738_v10  ;;  %v1728_v54 = vld [vmem:[%s3417_s15] sm:$0xff]  ;;  %v1729_v56 = vld [vmem:[%s3417_s15 + $0x8] sm:$0xff]  ;;  %v1740_v58 = vld [vmem:[%s4075_s4 + $0x30] sm:$0xff]  ;;  %v1824_v41 = vand.u32 127, %v1823_v57  ;;  %s3167_s26 = sshll.u32 %s3261_s11, 4  ;;  %s3168_s26 = int_to_ptr.vmem [resolvable:$false] %s3167_s26 }
 0x1b6   : > { %2779 = vmatprep.subr.bf16.mxu0 %v1750_v33  ;;  %v1741_v59 = vld [vmem:[%s4075_s4 + $0x38] sm:$0xff]  ;;  %v1732_v60 = vpack.c.bf16 %v1729_v56, %v1728_v54  ;;  %v1742_v63 = vld [vmem:[%s4075_s4 + $0x40] sm:$0xff]  ;;  %v1743_v0 = vld [vmem:[%s4075_s4 + $0x48] sm:$0xff]  ;;  %s3169_s14 = scalar_lea.vmem %s3168_s26, 1024  ;;  %p3170_p6 = scmp.lt.s32.totalorder %s4013_s0, %s3168_s26 }
 0x1b7   : > { %2780 = vmatpush3.bf16.msra.mxu0 %v1750_v33  ;;  %v1753_v62 = vpack.c.bf16 %v1741_v59, %v1740_v58  ;;  %v1754_v20 = vpack.c.bf16 %v1743_v0, %v1742_v63  ;;  %v1744_v1 = vld [vmem:[%s4075_s4 + $0x50] sm:$0xff]  ;;  %v1745_v2 = vld [vmem:[%s4075_s4 + $0x58] sm:$0xff]  ;;  %v1746_v3 = vld [vmem:[%s4075_s4 + $0x60] sm:$0xff]  ;;  %vm1825_vm3 = vcmp.lt.s32.totalorder %v1824_v41, 64 }
 0x1b8   : > { %2781 = vmatprep.subr.bf16.mxu0 %v1751_v50  ;;  %2795 = vmatprep.mubr.bf16.mxu0 %v1732_v60  ;;  %v1755_v25 = vpack.c.bf16 %v1745_v2, %v1744_v1  ;;  %v1747_v5 = vld [vmem:[%s4075_s4 + $0x68] sm:$0xff]  ;;  %v1748_v7 = vld [vmem:[%s4075_s4 + $0x70] sm:$0xff]  ;;  %v1749_v9 = vld [vmem:[%s4075_s4 + $0x78] sm:$0xff] }
 0x1b9   : > { %v1756_v6 = vpack.c.bf16 %v1747_v5, %v1746_v3  ;;  %v1757_v12 = vpack.c.bf16 %v1749_v9, %v1748_v7  ;;  %v1730_v13 = vld [vmem:[%s3417_s15 + $0x10] sm:$0xff]  ;;  %v1731_v8 = vld [vmem:[%s3417_s15 + $0x18] sm:$0xff]  ;;  %v1854_v36 = vld [vmem:[#allocation2] sm:$0xff]  ;;  %s3163_s15 = scalar_lea.vmem %s4013_s0, 512 }
 0x1ba   : > { %v1733_v14 = vpack.c.bf16 %v1731_v8, %v1730_v13  ;;  %v1862_v17 = vld [vmem:[#allocation2 + $0x40] sm:$0xff]  ;;  %2800 = vmatpush3.bf16.msra.mxu1 %v1854_v36  ;;  %v1855_v39 = vld [vmem:[#allocation2 + $0x8] sm:$0xff]  ;;  %v1856_v18 = vld [vmem:[#allocation2 + $0x10] sm:$0xff]  ;;  %p3164_p3 = scmp.ne.s32.totalorder %s4013_s0, %s3163_s15  ;;  %p3171_p7 = scmp.lt.s32.totalorder %s3169_s14, %s3163_s15 }
 0x1bb   : > { %2782 = vmatpush3.bf16.msra.mxu0 %v1751_v50  ;;  %2801 = vmatprep.subr.bf16.mxu1 %v3259_v16  ;;  %v1863_v42 = vld [vmem:[#allocation2 + $0x48] sm:$0xff]  ;;  %v1864_v43 = vld [vmem:[#allocation2 + $0x50] sm:$0xff]  ;;  %v1857_v19 = vld [vmem:[#allocation2 + $0x18] sm:$0xff] }
 0x1bc   : > { %2783 = vmatprep.subr.bf16.mxu0 %v1752_v53  ;;  %v1865_v21 = vld [vmem:[#allocation2 + $0x58] sm:$0xff]  ;;  %v1858_v22 = vld [vmem:[#allocation2 + $0x20] sm:$0xff]  ;;  %v1859_v24 = vld [vmem:[#allocation2 + $0x28] sm:$0xff]  ;;  %p3165_p4 = pnand %p3164_p3, %p3370_p8  ;;  %p3172_p10 = por %p3171_p7, %p3170_p6 }
 0x1bd   : > { %v1866_v23 = vld [vmem:[#allocation2 + $0x60] sm:$0xff]  ;;  %v1867_v26 = vld [vmem:[#allocation2 + $0x68] sm:$0xff]  ;;  %v1860_v27 = vld [vmem:[#allocation2 + $0x30] sm:$0xff] }
 0x1be   : > { %2802 = vmatpush3.bf16.msra.mxu1 %v1855_v39  ;;  %v1868_v29 = vld [vmem:[#allocation2 + $0x70] sm:$0xff]  ;;  %v1861_v55 = vld [vmem:[#allocation2 + $0x38] sm:$0xff]  ;;  %v2371_v61 = vld [vmem:[%s4076_s5] ss:$0 sm:$0xff]  ;;  %p3166_p5 = pneg %p3165_p4 }
 0x1bf   : > { %2784 = vmatpush3.bf16.msra.mxu0 %v1752_v53  ;;  %2803 = vmatprep.subr.bf16.mxu1 %v3259_v16  ;;  %v1869_v30 = vld [vmem:[#allocation2 + $0x78] sm:$0xff]  ;;  %v1878_v60 = vld [vmem:[#allocation2 + $0xc0] sm:$0xff]  ;;  %v1879_v0 = vld [vmem:[#allocation2 + $0xc8] sm:$0xff] }
 0x1c0   : > { %2785 = vmatprep.subr.bf16.mxu0 %v1753_v62  ;;  %v1870_v63 = vld [vmem:[#allocation2 + $0x80] sm:$0xff]  ;;  %v1880_v2 = vld [vmem:[#allocation2 + $0xd0] sm:$0xff]  ;;  %v1881_v5 = vld [vmem:[#allocation2 + $0xd8] sm:$0xff]  ;;  %p3173_p11 = pnand %p3172_p10, %p3166_p5 }
 0x1c1   : > { %v1872_v3 = vld [vmem:[#allocation2 + $0x90] sm:$0xff]  ;;  %v1882_v7 = vld [vmem:[#allocation2 + $0xe0] sm:$0xff]  ;;  %v1875_v8 = vld [vmem:[#allocation2 + $0xa8] sm:$0xff] }
 0x1c2   : > { %2804 = vmatpush3.bf16.msra.mxu1 %v1856_v18  ;;  %v1874_v9 = vld [vmem:[#allocation2 + $0xa0] sm:$0xff]  ;;  %v1884_v36 = vld [vmem:[#allocation2 + $0xf0] sm:$0xff] }
 0x1c3   : > { %2786 = vmatpush3.bf16.msra.mxu0 %v1753_v62  ;;  %2805 = vmatprep.subr.bf16.mxu1 %v3259_v16  ;;  %v1876_v39 = vld [vmem:[#allocation2 + $0xb0] sm:$0xff] }
 0x1c4   : > { %2787 = vmatprep.subr.bf16.mxu0 %v1754_v20 }
 0x1c6   : > { %2806 = vmatpush3.bf16.msra.mxu1 %v1857_v19  ;;  %v1885_v19 = vld [vmem:[#allocation2 + $0xf8] sm:$0xff] }
 0x1c7   : > { %2788 = vmatpush3.bf16.msra.mxu0 %v1754_v20  ;;  %2807 = vmatprep.subr.bf16.mxu1 %v3259_v16  ;;  %v1871_v20 = vld [vmem:[#allocation2 + $0x88] sm:$0xff] }
 0x1c8   : > { %2789 = vmatprep.subr.bf16.mxu0 %v1755_v25 }
 0x1ca   : > { %2808 = vmatpush3.bf16.msra.mxu1 %v1858_v22  ;;  %v1877_v22 = vld [vmem:[#allocation2 + $0xb8] sm:$0xff] }
 0x1cb   : > { %2790 = vmatpush3.bf16.msra.mxu0 %v1755_v25  ;;  %2809 = vmatprep.subr.bf16.mxu1 %v3259_v16 }
 0x1cc   : > { %2791 = vmatprep.subr.bf16.mxu0 %v1756_v6 }
 0x1ce   : > { %2810 = vmatpush3.bf16.msra.mxu1 %v1859_v24 }
 0x1cf   : > { %2792 = vmatpush3.bf16.msra.mxu0 %v1756_v6  ;;  %2811 = vmatprep.subr.bf16.mxu1 %v3259_v16  ;;  %v1873_v6 = vld [vmem:[#allocation2 + $0x98] sm:$0xff] }
 0x1d0   : > { %2793 = vmatprep.subr.bf16.mxu0 %v1757_v12 }
 0x1d2   : > { %2812 = vmatpush3.bf16.msra.mxu1 %v1860_v27  ;;  %v2372_v27 = vld [vmem:[%s4078_s7] ss:$0 sm:$0xff] }
 0x1d3   : > { %2794 = vmatpush3.bf16.msra.mxu0 %v1757_v12  ;;  %2813 = vmatprep.subr.bf16.mxu1 %v3259_v16  ;;  %v1883_v12 = vld [vmem:[#allocation2 + $0xe8] sm:$0xff] }
 0x1d4   : > { %2819 = vmatprep.subr.bf16.mxu0 %v3259_v16 }
 0x1d6   : > { %2796 = vmatmul.mubr.bf16.vlgmr.msra.gmra.mrb[0].mxu0 %v1733_v14  ;;  %2814 = vmatpush3.bf16.msra.mxu1 %v1861_v55 }
 0x1d7   : > { %2820 = vmatpush3.bf16.msra.mxu0 %v1862_v17  ;;  %2835 = vmatprep.mubr.msk.bf16.mxu0 %vm3260_vm2, %v3259_v16 }
 0x1d8   : > { %2821 = vmatprep.subr.bf16.mxu0 %v3259_v16  ;;  %2839 = vmatprep.subr.bf16.mxu1 %v3259_v16 }
 0x1db   : > { %2822 = vmatpush3.bf16.msra.mxu0 %v1863_v42 }
 0x1dc   : > { %2823 = vmatprep.subr.bf16.mxu0 %v3259_v16 }
 0x1df   : > { %2824 = vmatpush3.bf16.msra.mxu0 %v1864_v43 }
 0x1e0   : > { %2825 = vmatprep.subr.bf16.mxu0 %v3259_v16 }
 0x1e3   : > { %2826 = vmatpush3.bf16.msra.mxu0 %v1865_v21 }
 0x1e4   : > { %2827 = vmatprep.subr.bf16.mxu0 %v3259_v16 }
 0x1e7   : > { %2828 = vmatpush3.bf16.msra.mxu0 %v1866_v23 }
 0x1e8   : > { %2829 = vmatprep.subr.bf16.mxu0 %v3259_v16 }
 0x1eb   : > { %2830 = vmatpush3.bf16.msra.mxu0 %v1867_v26 }
 0x1ec   : > { %2831 = vmatprep.subr.bf16.mxu0 %v3259_v16 }
 0x1ef   : > { %2832 = vmatpush3.bf16.msra.mxu0 %v1868_v29  ;;  %v2373_v29 = vld [vmem:[%s421_s13] ss:$0 sm:$0xff]  ;;  %s2100_s13 = sadd.s32 %s3241_s30, %s2375_s18  ;;  %s4096_s30 = sand.u32 1, %s3233_s28  }
 0x1f0   : > { %2833 = vmatprep.subr.bf16.mxu0 %v3259_v16  ;;  %s2376_s22 = sshll.u32 %s2100_s13, 7  ;;  %s4019_s9 = scalar_lea.sflag [#allocation5], %s4096_s30 }
 0x1f1   : > { %s4011_s25 = scalar_lea.hbm %s4079_s8, %s2376_s22 }
 0x1f3   : > { %2834 = vmatpush3.bf16.msra.mxu0 %v1869_v30 }
 0x1f4   : > { %2859 = vmatprep.subr.bf16.mxu0 %v3259_v16 }
 0x2a9   : > { %v2797_v31 = vpop.f32.mrb[0].mxu0 }
 0x2aa   : > { %v1792_v52 = vpop.f32.mrb[1].mxu0  ;;  %v1816_v38 = vadd.f32 %v2797_v31, %v2371_v61 }
 0x2ab   : > { %v2798_v32 = vpop.f32.mrb[2].mxu0  ;;  %v1814_v35 = vadd.f32 %v2371_v61, %v1792_v52 }
 0x2ac   : > { %v1795_v34 = vpop.f32.mrb[3].mxu0  ;;  %v1817_v44 = vadd.f32 %v2798_v32, %v2371_v61 }
 0x2ad   : > { %v1815_v37 = vadd.f32 %v2371_v61, %v1795_v34 }
 0x2af   : > { %v1818_v40 = vadd.f32 %v1815_v37, %v1814_v35 }
 0x2b1   : > { %v1819_v11 = vadd.f32 %v1818_v40, %v1816_v38 }
 0x2b3   : > { %v1820_v45 = vadd.f32 %v1819_v11, %v1817_v44 }
 0x2b5   : > { %v1822_v46 = vmul.f32 0.25, %v1820_v45 }
 0x2b7   : > { %v1827_v15 = vsel %vm1825_vm3, %v1815_v37, %v1822_v46  ;;  %v1826_v47 = vsel %vm1825_vm3, %v1814_v35, %v1822_v46  ;;  %v3969_v48 = vsel %vm1825_vm3, %v1816_v38, %v1822_v46  ;;  %v3971_v28 = vsel %vm1825_vm3, %v1817_v44, %v1822_v46 }
 0x2b8   : > { %v1835_v4 = vmul.f32 0.70710677, %v1827_v15  ;;  %v1834_v33 = vmul.f32 0.70710677, %v1826_v47  ;;  %v1831_v10 = vmul.f32 0.5, %v1827_v15  ;;  %v1830_v53 = vmul.f32 0.5, %v1826_v47 }
 0x2b9   : > { %v1837_v1 = vmul.f32 0.70710677, %v3971_v28  ;;  %v1836_v25 = vmul.f32 0.70710677, %v3969_v48  ;;  %v1833_v18 = vmul.f32 0.5, %v3971_v28  ;;  %v1832_v43 = vmul.f32 0.5, %v3969_v48 }
 0x2ba   : > { %3147 = verf.f32 %v1835_v4 }
 0x2bb   : > { %3149 = verf.f32 %v1834_v33 }
 0x2bc   : > { %3151 = verf.f32 %v1837_v1 }
 0x2bd   : > { %3153 = verf.f32 %v1836_v25 }
 0x2c4   : > { %v3148_v49 = vpop.eup %3147 }
 0x2c5   : > { %v3150_v50 = vpop.eup %3149  ;;  %v1843_v51 = vadd.f32 1.0, %v3148_v49 }
 0x2c6   : > { %v1842_v54 = vadd.f32 1.0, %v3150_v50  ;;  %v3152_v13 = vpop.eup %3151 }
 0x2c7   : > { %v1847_v56 = vmul.f32 %v1843_v51, %v1831_v10  ;;  %v3154_v14 = vpop.eup %3153  ;;  %v1845_v17 = vadd.f32 1.0, %v3152_v13 }
 0x2c8   : > { %v1846_v58 = vmul.f32 %v1842_v54, %v1830_v53  ;;  %v1844_v42 = vadd.f32 1.0, %v3154_v14 }
 0x2c9   : > { %v1851_v59 = vpack.c.bf16 %v1847_v56, %v1847_v56  ;;  %v1849_v21 = vmul.f32 %v1845_v17, %v1833_v18 }
 0x2ca   : > { %v1850_v62 = vpack.c.bf16 %v1846_v58, %v1846_v58  ;;  %v1848_v23 = vmul.f32 %v1844_v42, %v1832_v43 }
 0x2cb   : > { %2836 = vmatmul.mubr.bf16.vlgmr.msra.gmra.mrb[4].mxu0 %v1851_v59  ;;  %v1853_v24 = vpack.c.bf16 %v1849_v21, %v1849_v21 }
 0x2cc   : > { %2816 = vmatmul.mubr.bf16.vlgmr.msra.gmra.mrb[0].mxu1 %v1850_v62  ;;  %2860 = vmatpush3.bf16.msra.mxu0 %v1878_v60  ;;  %v1852_v26 = vpack.c.bf16 %v1848_v23, %v1848_v23 }
 0x2cd   : > { %2840 = vmatpush3.bf16.msra.mxu1 %v1870_v63  ;;  %2861 = vmatprep.subr.bf16.mxu0 %v3259_v16 }
 0x2ce   : > { %2841 = vmatprep.subr.bf16.mxu1 %v3259_v16  ;;  %2855 = vmatprep.mubr.msk.bf16.mxu1 %vm3260_vm2, %v3259_v16 }
 0x2cf   : > { %2875 = vmatprep.mubr.msk.bf16.mxu0 %vm3260_vm2, %v3259_v16 }
 0x2d0   : > { %2862 = vmatpush3.bf16.msra.mxu0 %v1879_v0 }
 0x2d1   : > { %2842 = vmatpush3.bf16.msra.mxu1 %v1871_v20  ;;  %2863 = vmatprep.subr.bf16.mxu0 %v3259_v16 }
 0x2d2   : > { %2843 = vmatprep.subr.bf16.mxu1 %v3259_v16 }
 0x2d4   : > { %2864 = vmatpush3.bf16.msra.mxu0 %v1880_v2 }
 0x2d5   : > { %2844 = vmatpush3.bf16.msra.mxu1 %v1872_v3  ;;  %2865 = vmatprep.subr.bf16.mxu0 %v3259_v16 }
 0x2d6   : > { %2845 = vmatprep.subr.bf16.mxu1 %v3259_v16 }
 0x2d8   : > { %2866 = vmatpush3.bf16.msra.mxu0 %v1881_v5 }
 0x2d9   : > { %2846 = vmatpush3.bf16.msra.mxu1 %v1873_v6  ;;  %2867 = vmatprep.subr.bf16.mxu0 %v3259_v16 }
 0x2da   : > { %2847 = vmatprep.subr.bf16.mxu1 %v3259_v16 }
 0x2dc   : > { %2868 = vmatpush3.bf16.msra.mxu0 %v1882_v7 }
 0x2dd   : > { %2848 = vmatpush3.bf16.msra.mxu1 %v1874_v9  ;;  %2869 = vmatprep.subr.bf16.mxu0 %v3259_v16 }
 0x2de   : > { %2849 = vmatprep.subr.bf16.mxu1 %v3259_v16 }
 0x2e0   : > { %2870 = vmatpush3.bf16.msra.mxu0 %v1883_v12 }
 0x2e1   : > { %2850 = vmatpush3.bf16.msra.mxu1 %v1875_v8  ;;  %2871 = vmatprep.subr.bf16.mxu0 %v3259_v16 }
 0x2e2   : > { %2851 = vmatprep.subr.bf16.mxu1 %v3259_v16 }
 0x2e4   : > { %2872 = vmatpush3.bf16.msra.mxu0 %v1884_v36 }
 0x2e5   : > { %2852 = vmatpush3.bf16.msra.mxu1 %v1876_v39  ;;  %2873 = vmatprep.subr.bf16.mxu0 %v3259_v16 }
 0x2e6   : > { %2853 = vmatprep.subr.bf16.mxu1 %v3259_v16 }
 0x2e8   : > { %2874 = vmatpush3.bf16.msra.mxu0 %v1885_v19 }
 0x2e9   : > { %2854 = vmatpush3.bf16.msra.mxu1 %v1877_v22 }
 0x2eb   : > { %2876 = vmatmul.mubr.bf16.vlgmr.msra.gmra.mrb[8].mxu0 %v1853_v24 }
 0x2ec   : > { %2856 = vmatmul.mubr.bf16.vlgmr.msra.gmra.mrb[4].mxu1 %v1852_v26 }
 0x39e   : > { %v1967_v55 = vpop.f32.mrb[4].mxu0 }
 0x39f   : > { %v1927_v30 = vpop.f32.mrb[0].mxu1  ;;  %v1968_v16 = vadd.f32 %v2372_v27, %v1967_v55  ;;  %v2837_v31 = vpop.f32.mrb[5].mxu0 }
 0x3a0   : > { %v1928_v61 = vadd.f32 %v2372_v27, %v1927_v30  ;;  %v2817_v52 = vpop.f32.mrb[1].mxu1  ;;  %v1970_v32 = vpop.f32.mrb[6].mxu0 }
 0x3a1   : > { %v2061_v34 = vadd.f32 %v2373_v29, %v1968_v16  ;;  %v1930_v57 = vpop.f32.mrb[2].mxu1  ;;  %v2838_v35 = vpop.f32.mrb[7].mxu0 }
 0x3a2   : > { %v2060_v37 = vadd.f32 %v2373_v29, %v1928_v61  ;;  %v2818_v38 = vpop.f32.mrb[3].mxu1 }
 0x3a3   : > { %v2069_v40 = vmul.f32 0.70710677, %v2061_v34  ;;  %v2065_v45 = vmul.f32 0.5, %v2061_v34 }
 0x3a4   : > { %v2068_v41 = vmul.f32 0.70710677, %v2060_v37  ;;  %v2064_v15 = vmul.f32 0.5, %v2060_v37 }
 0x3a5   : > { %3155 = verf.f32 %v2069_v40 }
 0x3a6   : > { %3157 = verf.f32 %v2068_v41 }
 0x3af   : > { %v3156_v44 = vpop.eup %3155 }
 0x3b0   : > { %v3158_v11 = vpop.eup %3157  ;;  %v2077_v46 = vadd.f32 1.0, %v3156_v44 }
 0x3b1   : > { %v2076_v47 = vadd.f32 1.0, %v3158_v11 }
 0x3b2   : > { %v2081_v48 = vmul.f32 %v2077_v46, %v2065_v45 }
 0x3b3   : > { %v2080_v28 = vmul.f32 %v2076_v47, %v2064_v15 }
 0x3b4   : > { %2085 = vst [vmem:[%s3419_s10 + $0x8] sm:$0xff] %v2081_v48 }
 0x3b5   : > { %2084 = vst [vmem:[%s3419_s10] sm:$0xff] %v2080_v28 }
 0x3be   : > { %v2047_v4 = vpop.f32.mrb[8].mxu0 }
 0x3bf   : > { %v2007_v33 = vpop.f32.mrb[4].mxu1  ;;  %v2048_v49 = vadd.f32 %v2372_v27, %v2047_v4  ;;  %v2877_v50 = vpop.f32.mrb[9].mxu0 }
 0x3c0   : > { %v2008_v10 = vadd.f32 %v2372_v27, %v2007_v33  ;;  %v2857_v51 = vpop.f32.mrb[5].mxu1  ;;  %v2050_v53 = vpop.f32.mrb[10].mxu0 }
 0x3c1   : > { %v2063_v54 = vadd.f32 %v2373_v29, %v2048_v49  ;;  %v2010_v56 = vpop.f32.mrb[6].mxu1  ;;  %v2878_v58 = vpop.f32.mrb[11].mxu0 }
 0x3c2   : > { %v2062_v59 = vadd.f32 %v2373_v29, %v2008_v10  ;;  %v2858_v60 = vpop.f32.mrb[7].mxu1 }
 0x3c3   : > { %v2071_v62 = vmul.f32 0.70710677, %v2063_v54  ;;  %v2067_v1 = vmul.f32 0.5, %v2063_v54 }
 0x3c4   : > { %v2070_v63 = vmul.f32 0.70710677, %v2062_v59  ;;  %v2066_v25 = vmul.f32 0.5, %v2062_v59 }
 0x3c5   : > { %3159 = verf.f32 %v2071_v62 }
 0x3c6   : > { %3161 = verf.f32 %v2070_v63 }
 0x3cf   : > { %v3160_v0 = vpop.eup %3159 }
 0x3d0   : > { %v3162_v20 = vpop.eup %3161  ;;  %v2079_v2 = vadd.f32 1.0, %v3160_v0 }
 0x3d1   : > { %v2078_v3 = vadd.f32 1.0, %v3162_v20 }
 0x3d2   : > { %v2083_v5 = vmul.f32 %v2079_v2, %v2067_v1 }
 0x3d3   : > { %v2082_v6 = vmul.f32 %v2078_v3, %v2066_v25 }
 0x3d4   : > { %2087 = vst [vmem:[%s3419_s10 + $0x18] sm:$0xff] %v2083_v5 }
 0x3d5   : > { %2086 = vst [vmem:[%s3419_s10 + $0x10] sm:$0xff] %v2082_v6 }
 0x3d6   : > { %3176 = shalt.err (!%p3173_p11)
}
 0x3d7   : > { %s3177_s10 = scalar_lea.hbm %s4011_s25, 512  ;;  %s3181_s18 = scalar_lea.hbm %s4079_s8, 2048 }
 0x3d8   : > { %p3178_p12 = scmp.ne.s32.totalorder %s4011_s25, %s3177_s10  ;;  %p3182_p1 = scmp.lt.u32.totalorder %s4011_s25, %s4079_s8 }
 0x3d9   : > { %p3183_p2 = scmp.lt.u32.totalorder %s3181_s18, %s3177_s10  ;;  %p3185_p4 = scmp.lt.u32.totalorder %s3177_s10, %s4011_s25 }
 0x3da   : > { %p3179_p13 = pnand %p3178_p12, %p3370_p8 }
 0x3db   : > { %p3184_p3 = por %p3183_p2, %p3182_p1 }
 0x3dc   : > { %p3180_p0 = pneg %p3179_p13 }
 0x3dd   : > { %p3186_p5 = por %p3185_p4, %p3184_p3 }
 0x3df   : > { %p3187_p6 = pnand %p3186_p5, %p3180_p0 }
 0x3e1   : > { %3190 = shalt.err (!%p3187_p6)
}
 0x3e2   : > { %s3262_s16 = smov 128   ;;  %s3263_s23 = smov 256  }
 0x3e3   : > { %s3264_s30 = smov 8  }
 0x3e4   : > { %3071 = dma.vmem_to_hbm [thread:$0]  (%p3370_p8), %s4013_s0, 512, %s4011_s25, %s4019_s9, %s3262_s16, %s3263_s23, %s3264_s30  }
 0x3e5 PF: > { %p3077_p7 = scmp.ge.s32.totalorder %s3257_s12, 2  ;;  %s2118_s15 = sand.u32 1, %s3229_s27  }
 0x3e6   : > { %s2119_s11 = scalar_lea.sflag [#allocation5], %s2118_s15 }
 0x3e7   : > { %p3074_p10 = pnand %p3077_p7, %p3374_p9 }
 0x3e9   : > { %3224 = dma.done.wait (!%p3074_p10), %s2119_s11, 512  }
 0x3ea   : > { %3226 = vsyncadd (!%p3074_p10), %s2119_s11, 4294966784  ;;  %s21_s12 = sadd.s32 1, %s3257_s12   ;;  %s4097_s30 = sld [smem:[#allocation7_spill]] }
 0x3eb   : > { %p18_p11 = scmp.ge.s32.totalorder %s21_s12, 6   ;;  %s4098_s9 = sld [smem:[#allocation8_spill]] }
 0x3ec   : > { %s4099_s10 = sld [smem:[#allocation9_spill]]  ;;  %s4100_s11 = sld [smem:[#allocation10_spill]] }
 0x3ed   : > { %s4101_s27 = smov %s3233_s28  ;;  %s4102_s28 = smov %s3237_s29 }
 0x3ee   : > { %s4103_s29 = smov %s3382_s24  ;;  %20 = sbr.rel (!%p18_p11) target bundleno = 7 (0x7), region = 143 }
 0x3f5   :  { %2124 = vsyncpa [#allocation5], 1 }
 0x3f6   :  { %2126 = vsyncpa [#allocation5 + $0x1], 1 }

// kernel: tpu_custom_call.1
= control target key start
LH: loop header
LB: loop body
LE: loop exit
PB: predicated region body
PF: predicated region fallthrough
CT: control target
= control target key end

     0   :  { %s4062_s0 = inlined_call_operand.vmem [shape: f32[2,4,16,128], index: 0, kind: input, shape index: {}]   ;;  %s4063_s1 = inlined_call_operand.vmem [shape: f32[2,4,128,4], index: 1, kind: input, shape index: {}]   ;;  %s4064_s2 = inlined_call_operand.vmem [shape: f32[2,4,128,4], index: 2, kind: input, shape index: {}]   ;;  %s4065_s3 = inlined_call_operand.vmem [shape: f32[2,1,128], index: 3, kind: input, shape index: {}]   ;;  %s4066_s4 = inlined_call_operand.vmem [shape: f32[128,128], index: 4, kind: input, shape index: {}]   ;;  %s4067_s5 = inlined_call_operand.vmem [shape: f32[1,128], index: 5, kind: input, shape index: {}]   ;;  %s4068_s6 = inlined_call_operand.vmem [shape: f32[128,128], index: 6, kind: input, shape index: {}]   ;;  %s4069_s7 = inlined_call_operand.vmem [shape: f32[1,128], index: 7, kind: input, shape index: {}]   ;;  %s4070_s8 = inlined_call_operand.hbm [shape: f32[2,4,16,128], index: 8, kind: output, shape index: {}]  }
   0x1   :  { %4076 = sst [smem:[#allocation11_spill]] %s4062_s0 }
   0x2   :  { %13 = vsyncpa [#allocation5], 0 }
   0x3   :  { %15 = vsyncpa [#allocation5 + $0x1], 0  ;;  %s3301_s27 = smov 0   ;;  %s3303_s28 = smov 0  }
   0x4   :  { %s3305_s29 = smov 0   ;;  %s3307_s30 = smov 0  }
   0x5   :  { %s3309_s9 = smov 0   ;;  %s3311_s10 = smov 0  }
   0x6   :  { %s3313_s11 = smov 0   ;;  %s3315_s12 = smov 0  }
   0x7 LB: > { %4077 = sst [smem:[#allocation7_spill]] %s3240_s10  ;;  %s2219_s13 = sadd.s32 4294967295, %s3248_s12   ;;  %s3248_s12 = sphi %s3315_s12, %s21_s12   ;;  %s3244_s11 = sphi %s3313_s11, %s4091_s11   ;;  %s3240_s10 = sphi %s3311_s10, %s4090_s10   ;;  %s3236_s9 = sphi %s3309_s9, %s4089_s9   ;;  %s3232_s30 = sphi %s3307_s30, %s4088_s30   ;;  %s3228_s29 = sphi %s3305_s29, %s4094_s29   ;;  %s3224_s28 = sphi %s3303_s28, %s4093_s28   ;;  %s3220_s27 = sphi %s3301_s27, %s4092_s27  }
   0x8   : > { %4078 = sst [smem:[#allocation8_spill]] %s3244_s11  ;;  %s2220_s14 = sadd.s32 4294967294, %s3248_s12  }
   0x9   : > { %s30_s15 = sadd.s32 1, %s3240_s10  ;;  %s33_s16 = sadd.s32 1, %s3244_s11 }
   0xa   : > { %p31_p0 = scmp.ge.s32.totalorder %s30_s15, 2  ;;  %p49_p1 = scmp.ne.s32.totalorder %s3228_s29, %s3224_s28 }
   0xb   : > { %p50_p2 = scmp.eq.s32.totalorder %s3248_s12, 0  ;;  %p243_p5 = scmp.eq.s32.totalorder %s2219_s13, 3 }
   0xc   : > { %s4096_s15 = smov (%p31_p0, %s30_s15), 0  ;;  %s4098_s16 = smov (!%p31_p0, %s33_s16), %s3244_s11 }
   0xd   : > { %4079 = sst [smem:[#allocation9_spill]] %s4096_s15  ;;  %s38_s17 = ssub.s32 %s3240_s10, %s4096_s15 }
   0xe   : > { %p3353_p3 = por %p50_p2, %p49_p1  ;;  %p35_p4 = scmp.ge.s32.totalorder %s4098_s16, 2 }
   0xf   : > { %p248_p6 = scmp.ne.s32.totalorder %s3224_s28, %s3220_s27  ;;  %p249_p7 = scmp.eq.s32.totalorder %s2220_s14, 3 }
  0x10   : > { %s4100_s16 = smov (%p35_p4, %s4098_s16), 0  ;;  %p3361_p8 = por %p243_p5, %p49_p1 }
  0x11   : > { %4081 = sst [smem:[#allocation10_spill]] %s4100_s16  ;;  %p3365_p9 = por %p249_p7, %p248_p6 }
  0x12   : > { %s37_s21 = ssub.s32 %s3244_s11, %s4100_s16  ;;  %s42_s23 = sadd.s32 1, %s3228_s29 }
  0x13   : > { %s39_s22 = sor.u32 %s38_s17, %s37_s21  ;;  %p2222_p11 = scmp.ge.s32.totalorder %s3248_s12, 4 }
  0x14   : > { %p40_p10 = scmp.eq.s32.totalorder %s39_s22, 0 }
  0x15   : > { %277 = sbr.rel (%p2222_p11) target bundleno = 40 (0x28), region = 32 }
  0x16   : > { %s3373_s24 = scalar_select %p40_p10, %s3228_s29, %s42_s23  }
  0x1c   : > { %280 = sbr.rel (!%p3353_p3) target bundleno = 40 (0x28), region = 36  ;;  %s282_s25 = sand.u32 (%p3353_p3), 1, %s3228_s29  }
  0x1d   : > { %s2224_s26 = sshll.u32 (%p3353_p3), %s3244_s11, 3  ;;  %s2223_s13 = sshll.u32 (%p3353_p3), %s282_s25, 5 }
  0x1e   : > { %s286_s14 = sadd.s32 (%p3353_p3), %s3240_s10, %s2224_s26  ;;  %s4084_s0 = sld [smem:[#allocation11_spill]] (%p3353_p3) }
  0x1f   : > { %s2225_s15 = sshll.u32 (%p3353_p3), %s286_s14, 3  ;;  %s284_s22 = scalar_lea.vmem (%p3353_p3), [#allocation3], %s2223_s13 }
  0x24   : > { %s288_s21 = scalar_lea.vmem %s4084_s0, %s2225_s15 }
  0x25   : > { %v322_v0 = vld [vmem:[%s288_s21] sm:$0xff]  ;;  %v324_v1 = vld [vmem:[%s288_s21 + $0x10] sm:$0xff] }
  0x26   : > { %v326_v2 = vld [vmem:[%s288_s21 + $0x20] sm:$0xff]  ;;  %323 = vst [vmem:[%s284_s22] sm:$0xff] %v322_v0  ;;  %325 = vst [vmem:[%s284_s22 + $0x8] sm:$0xff] %v324_v1  ;;  %v328_v3 = vld [vmem:[%s288_s21 + $0x30] sm:$0xff] }
  0x27   : > { %327 = vst [vmem:[%s284_s22 + $0x10] sm:$0xff] %v326_v2  ;;  %329 = vst [vmem:[%s284_s22 + $0x18] sm:$0xff] %v328_v3 }
  0x28 PF: > { %p2226_p12 = scmp.ge.s32.totalorder %s3248_s12, 1  ;;  %p356_p13 = scmp.lt.s32.totalorder %s3248_s12, 5 }
  0x2a   : > { %p357_p0 = pnand %p2226_p12, %p356_p13 }
  0x2b   : > { %s4074_s15 = sand.u32 (!%p357_p0), 1, %s3224_s28   ;;  %p409_p1 = scmp.lt.s32.totalorder (!%p357_p0), %s3236_s9, 1 }
  0x2c   : > { %360 = sbr.rel (%p357_p0) target bundleno = 997 (0x3e5), region = 86  ;;  %s2227_s16 = sshll.u32 (!%p357_p0), %s4074_s15, 5 }
  0x2d   : > { %s3408_s15 = scalar_lea.vmem (!%p357_p0), [#allocation3], %s2227_s16  ;;  %s3410_s10 = scalar_lea.vmem (!%p357_p0), [#allocation4], %s2227_s16 }
  0x2e   : > { %p2233_p2 = scmp.ne.s32.totalorder (!%p357_p0), %s3232_s30, 0 }
  0x33   : > { %s3391_s18 = scalar_select %p409_p1, %s3236_s9, 1 }
  0x34   : > { %426 = sbr.rel (%p2233_p2) target bundleno = 435 (0x1b3), region = 94  ;;  %vm555_vm0 = vcmask (!%p2233_p2), 31744  }
  0x35   : > { %s2370_s23 = sshll.u32 %s3391_s18, 9  ;;  %s421_s13 = scalar_lea.vmem %s4065_s3, %s3391_s18  ;;  %vm3418_vm1 = vmpackc.low (!%p2233_p2), %vm555_vm0, %vm555_vm0 }
  0x36   : > { %s3401_s21 = scalar_lea.vmem %s4063_s1, %s2370_s23  ;;  %s3406_s11 = scalar_lea.vmem %s4064_s2, %s2370_s23 }
  0x37   : > { %v427_v4 = vld [vmem:[%s3401_s21] sm:$0xff] (!%p2233_p2)  ;;  %v428_v5 = vld [vmem:[%s3401_s21 + $0x8] sm:$0xff] (!%p2233_p2)  ;;  %v429_v10 = vld [vmem:[%s3401_s21 + $0x10] sm:$0xff] (!%p2233_p2) }
  0x38   : > { %v443_v6 = vld [vmem:[%s3401_s21 + $0x80] sm:$0xff] (!%p2233_p2)  ;;  %v2870_v7 = vpack.c.bf16 (!%p2233_p2), %v428_v5, %v427_v4  ;;  %v444_v9 = vld [vmem:[%s3401_s21 + $0x88] sm:$0xff] (!%p2233_p2)  ;;  %v430_v12 = vld [vmem:[%s3401_s21 + $0x18] sm:$0xff] (!%p2233_p2) }
  0x39   : > { %v2918_v11 = vpack.c.bf16 (!%p2233_p2), %v444_v9, %v443_v6  ;;  %v445_v13 = vld [vmem:[%s3401_s21 + $0x90] sm:$0xff] (!%p2233_p2)  ;;  %v446_v14 = vld [vmem:[%s3401_s21 + $0x98] sm:$0xff] (!%p2233_p2)  ;;  %v2876_v15 = vpack.c.bf16 (!%p2233_p2), %v430_v12, %v429_v10  ;;  %v431_v17 = vld [vmem:[%s3401_s21 + $0x20] sm:$0xff] (!%p2233_p2) }
  0x3a   : > { %2872 = vmatprep.subr.msk.bf16.mxu0 (!%p2233_p2), %vm3418_vm1, %v2870_v7  ;;  %v2924_v16 = vpack.c.bf16 (!%p2233_p2), %v446_v14, %v445_v13  ;;  %v432_v18 = vld [vmem:[%s3401_s21 + $0x28] sm:$0xff] (!%p2233_p2)  ;;  %v447_v19 = vld [vmem:[%s3401_s21 + $0xa0] sm:$0xff] (!%p2233_p2)  ;;  %v433_v25 = vld [vmem:[%s3401_s21 + $0x30] sm:$0xff] (!%p2233_p2) }
  0x3b   : > { %2920 = vmatprep.subr.msk.bf16.mxu1 %vm3418_vm1, %v2918_v11  ;;  %2875 = vmatpush3.bf16.xpose.msk.msra.mxu0 %vm3418_vm1, %v2870_v7  ;;  %v448_v20 = vld [vmem:[%s3401_s21 + $0xa8] sm:$0xff]  ;;  %v2882_v21 = vpack.c.bf16 %v432_v18, %v431_v17  ;;  %v491_v23 = vld [vmem:[%s3406_s11] sm:$0xff]  ;;  %v434_v26 = vld [vmem:[%s3401_s21 + $0x38] sm:$0xff] }
  0x3c   : > { %2923 = vmatpush3.bf16.xpose.msk.msra.mxu1 %vm3418_vm1, %v2918_v11  ;;  %2878 = vmatprep.subr.msk.bf16.mxu0 %vm3418_vm1, %v2876_v15  ;;  %v2930_v22 = vpack.c.bf16 %v448_v20, %v447_v19  ;;  %v507_v24 = vld [vmem:[%s3406_s11 + $0x80] sm:$0xff]  ;;  %v449_v27 = vld [vmem:[%s3401_s21 + $0xb0] sm:$0xff]  ;;  %v450_v28 = vld [vmem:[%s3401_s21 + $0xb8] sm:$0xff]  ;;  %v2888_v29 = vpack.c.bf16 %v434_v26, %v433_v25 }
  0x3d   : > { %2926 = vmatprep.subr.msk.bf16.mxu1 %vm3418_vm1, %v2924_v16  ;;  %2578 = vmatprep.mubr.msk.f32.mxu0 %vm555_vm0, %v491_v23  ;;  %v2936_v30 = vpack.c.bf16 %v450_v28, %v449_v27  ;;  %v435_v31 = vld [vmem:[%s3401_s21 + $0x40] sm:$0xff]  ;;  %v436_v32 = vld [vmem:[%s3401_s21 + $0x48] sm:$0xff]  ;;  %v437_v37 = vld [vmem:[%s3401_s21 + $0x50] sm:$0xff] }
  0x3e   : > { %2634 = vmatprep.mubr.msk.f32.mxu1 %vm555_vm0, %v507_v24  ;;  %v451_v33 = vld [vmem:[%s3401_s21 + $0xc0] sm:$0xff]  ;;  %v452_v34 = vld [vmem:[%s3401_s21 + $0xc8] sm:$0xff]  ;;  %v2894_v35 = vpack.c.bf16 %v436_v32, %v435_v31  ;;  %v438_v38 = vld [vmem:[%s3401_s21 + $0x58] sm:$0xff] }
  0x3f   : > { %v2942_v36 = vpack.c.bf16 %v452_v34, %v451_v33  ;;  %v453_v39 = vld [vmem:[%s3401_s21 + $0xd0] sm:$0xff]  ;;  %v454_v40 = vld [vmem:[%s3401_s21 + $0xd8] sm:$0xff]  ;;  %v2900_v41 = vpack.c.bf16 %v438_v38, %v437_v37  ;;  %v439_v43 = vld [vmem:[%s3401_s21 + $0x60] sm:$0xff] }
  0x40   : > { %v2948_v42 = vpack.c.bf16 %v454_v40, %v453_v39  ;;  %v440_v44 = vld [vmem:[%s3401_s21 + $0x68] sm:$0xff]  ;;  %v455_v45 = vld [vmem:[%s3401_s21 + $0xe0] sm:$0xff]  ;;  %v441_v49 = vld [vmem:[%s3401_s21 + $0x70] sm:$0xff] }
  0x41   : > { %v456_v46 = vld [vmem:[%s3401_s21 + $0xe8] sm:$0xff]  ;;  %v2906_v47 = vpack.c.bf16 %v440_v44, %v439_v43  ;;  %v442_v50 = vld [vmem:[%s3401_s21 + $0x78] sm:$0xff]  ;;  %v457_v51 = vld [vmem:[%s3401_s21 + $0xf0] sm:$0xff] }
  0x42   : > { %v2954_v48 = vpack.c.bf16 %v456_v46, %v455_v45  ;;  %v458_v52 = vld [vmem:[%s3401_s21 + $0xf8] sm:$0xff]  ;;  %v2912_v53 = vpack.c.bf16 %v442_v50, %v441_v49  ;;  %v459_v55 = vld [vmem:[%s3401_s21 + $0x100] sm:$0xff]  ;;  %v460_v56 = vld [vmem:[%s3401_s21 + $0x108] sm:$0xff] }
  0x43   : > { %2881 = vmatpush3.bf16.xpose.msk.msra.mxu0 %vm3418_vm1, %v2876_v15  ;;  %v2960_v54 = vpack.c.bf16 %v458_v52, %v457_v51  ;;  %v475_v57 = vld [vmem:[%s3401_s21 + $0x180] sm:$0xff]  ;;  %v476_v58 = vld [vmem:[%s3401_s21 + $0x188] sm:$0xff]  ;;  %v2966_v59 = vpack.c.bf16 %v460_v56, %v459_v55  ;;  %v461_v61 = vld [vmem:[%s3401_s21 + $0x110] sm:$0xff] }
  0x44   : > { %2929 = vmatpush3.bf16.xpose.msk.msra.mxu1 %vm3418_vm1, %v2924_v16  ;;  %2884 = vmatprep.subr.msk.bf16.mxu0 %vm3418_vm1, %v2882_v21  ;;  %v3014_v60 = vpack.c.bf16 %v476_v58, %v475_v57  ;;  %v462_v62 = vld [vmem:[%s3401_s21 + $0x118] sm:$0xff]  ;;  %v477_v63 = vld [vmem:[%s3401_s21 + $0x190] sm:$0xff]  ;;  %v492_v1 = vld [vmem:[%s3406_s11 + $0x8] sm:$0xff] }
  0x45   : > { %2932 = vmatprep.subr.msk.bf16.mxu1 %vm3418_vm1, %v2930_v22  ;;  %v478_v0 = vld [vmem:[%s3401_s21 + $0x198] sm:$0xff]  ;;  %v508_v2 = vld [vmem:[%s3406_s11 + $0x88] sm:$0xff]  ;;  %v2972_v3 = vpack.c.bf16 %v462_v62, %v461_v61  ;;  %v493_v5 = vld [vmem:[%s3406_s11 + $0x10] sm:$0xff] }
  0x46   : > { %v3020_v4 = vpack.c.bf16 %v478_v0, %v477_v63  ;;  %v509_v6 = vld [vmem:[%s3406_s11 + $0x90] sm:$0xff]  ;;  %v494_v7 = vld [vmem:[%s3406_s11 + $0x18] sm:$0xff]  ;;  %v495_v10 = vld [vmem:[%s3406_s11 + $0x20] sm:$0xff] }
  0x47   : > { %v510_v9 = vld [vmem:[%s3406_s11 + $0x98] sm:$0xff]  ;;  %v463_v11 = vld [vmem:[%s3401_s21 + $0x120] sm:$0xff]  ;;  %v464_v12 = vld [vmem:[%s3401_s21 + $0x128] sm:$0xff] }
  0x48   : > { %v511_v13 = vld [vmem:[%s3406_s11 + $0xa0] sm:$0xff]  ;;  %v480_v15 = vld [vmem:[%s3401_s21 + $0x1a8] sm:$0xff]  ;;  %v2978_v17 = vpack.c.bf16 %v464_v12, %v463_v11  ;;  %v497_v20 = vld [vmem:[%s3406_s11 + $0x30] sm:$0xff] }
  0x49   : > { %v479_v14 = vld [vmem:[%s3401_s21 + $0x1a0] sm:$0xff]  ;;  %v496_v16 = vld [vmem:[%s3406_s11 + $0x28] sm:$0xff]  ;;  %v514_v23 = vld [vmem:[%s3406_s11 + $0xb8] sm:$0xff] }
  0x4a   : > { %v512_v18 = vld [vmem:[%s3406_s11 + $0xa8] sm:$0xff]  ;;  %v3026_v19 = vpack.c.bf16 %v480_v15, %v479_v14  ;;  %v499_v24 = vld [vmem:[%s3406_s11 + $0x40] sm:$0xff]  ;;  %v465_v25 = vld [vmem:[%s3401_s21 + $0x130] sm:$0xff] }
  0x4b   : > { %2887 = vmatpush3.bf16.xpose.msk.msra.mxu0 %vm3418_vm1, %v2882_v21  ;;  %v513_v21 = vld [vmem:[%s3406_s11 + $0xb0] sm:$0xff]  ;;  %v466_v26 = vld [vmem:[%s3401_s21 + $0x138] sm:$0xff]  ;;  %v515_v27 = vld [vmem:[%s3406_s11 + $0xc0] sm:$0xff] }
  0x4c   : > { %2935 = vmatpush3.bf16.xpose.msk.msra.mxu1 %vm3418_vm1, %v2930_v22  ;;  %2890 = vmatprep.subr.msk.bf16.mxu0 %vm3418_vm1, %v2888_v29  ;;  %v498_v22 = vld [vmem:[%s3406_s11 + $0x38] sm:$0xff]  ;;  %v481_v28 = vld [vmem:[%s3401_s21 + $0x1b0] sm:$0xff]  ;;  %v2984_v31 = vpack.c.bf16 %v466_v26, %v465_v25  ;;  %v516_v32 = vld [vmem:[%s3406_s11 + $0xc8] sm:$0xff] }
  0x4d   : > { %2938 = vmatprep.subr.msk.bf16.mxu1 %vm3418_vm1, %v2936_v30  ;;  %v501_v34 = vld [vmem:[%s3406_s11 + $0x50] sm:$0xff]  ;;  %v518_v37 = vld [vmem:[%s3406_s11 + $0xd8] sm:$0xff]  ;;  %v503_v38 = vld [vmem:[%s3406_s11 + $0x60] sm:$0xff] }
  0x4e   : > { %v467_v39 = vld [vmem:[%s3401_s21 + $0x140] sm:$0xff]  ;;  %v468_v40 = vld [vmem:[%s3401_s21 + $0x148] sm:$0xff]  ;;  %v521_v49 = vld [vmem:[%s3406_s11 + $0xf0] sm:$0xff] }
  0x4f   : > { %v484_v43 = vld [vmem:[%s3401_s21 + $0x1c8] sm:$0xff]  ;;  %v2990_v45 = vpack.c.bf16 %v468_v40, %v467_v39  ;;  %v506_v50 = vld [vmem:[%s3406_s11 + $0x78] sm:$0xff]  ;;  %v523_v52 = vld [vmem:[%s3406_s11 + $0x100] sm:$0xff] }
  0x50   : > { %v504_v44 = vld [vmem:[%s3406_s11 + $0x68] sm:$0xff]  ;;  %v522_v51 = vld [vmem:[%s3406_s11 + $0xf8] sm:$0xff]  ;;  %v539_v55 = vld [vmem:[%s3406_s11 + $0x180] sm:$0xff] }
  0x51   : > { %v520_v46 = vld [vmem:[%s3406_s11 + $0xe8] sm:$0xff]  ;;  %v485_v56 = vld [vmem:[%s3401_s21 + $0x1d0] sm:$0xff]  ;;  %v486_v57 = vld [vmem:[%s3401_s21 + $0x1d8] sm:$0xff] }
  0x52   : > { %v472_v61 = vld [vmem:[%s3401_s21 + $0x168] sm:$0xff]  ;;  %v487_v62 = vld [vmem:[%s3401_s21 + $0x1e0] sm:$0xff]  ;;  %v525_v11 = vld [vmem:[%s3406_s11 + $0x110] sm:$0xff] }
  0x53   : > { %2893 = vmatpush3.bf16.xpose.msk.msra.mxu0 %vm3418_vm1, %v2888_v29  ;;  %v482_v29 = vld [vmem:[%s3401_s21 + $0x1b8] sm:$0xff]  ;;  %v488_v63 = vld [vmem:[%s3401_s21 + $0x1e8] sm:$0xff]  ;;  %v541_v12 = vld [vmem:[%s3406_s11 + $0x190] sm:$0xff] }
  0x54   : > { %2941 = vmatpush3.bf16.xpose.msk.msra.mxu1 %vm3418_vm1, %v2936_v30  ;;  %2896 = vmatprep.subr.msk.bf16.mxu0 %vm3418_vm1, %v2894_v35  ;;  %v500_v30 = vld [vmem:[%s3406_s11 + $0x48] sm:$0xff]  ;;  %v3032_v33 = vpack.c.bf16 %v482_v29, %v481_v28  ;;  %v542_v8 = vld [vmem:[%s3406_s11 + $0x198] sm:$0xff]  ;;  %v527_v14 = vld [vmem:[%s3406_s11 + $0x120] sm:$0xff] }
  0x55   : > { %2944 = vmatprep.subr.msk.bf16.mxu1 %vm3418_vm1, %v2942_v36  ;;  %v543_v15 = vld [vmem:[%s3406_s11 + $0x1a0] sm:$0xff]  ;;  %v548_v25 = vld [vmem:[%s3406_s11 + $0x1c8] sm:$0xff]  ;;  %v533_v26 = vld [vmem:[%s3406_s11 + $0x150] sm:$0xff] }
  0x56   : > { %v534_v28 = vld [vmem:[%s3406_s11 + $0x158] sm:$0xff]  ;;  %v3742_v39 = vld [vmem:[%s4068_s6 + $0x8] sm:$0xff] }
  0x57   : > { %v550_v29 = vld [vmem:[%s3406_s11 + $0x1d8] sm:$0xff] }
  0x5b   : > { %2899 = vmatpush3.bf16.xpose.msk.msra.mxu0 %vm3418_vm1, %v2894_v35  ;;  %v517_v35 = vld [vmem:[%s3406_s11 + $0xd0] sm:$0xff] }
  0x5c   : > { %2947 = vmatpush3.bf16.xpose.msk.msra.mxu1 %vm3418_vm1, %v2942_v36  ;;  %2902 = vmatprep.subr.msk.bf16.mxu0 %vm3418_vm1, %v2900_v41  ;;  %v502_v36 = vld [vmem:[%s3406_s11 + $0x58] sm:$0xff] }
  0x5d   : > { %2950 = vmatprep.subr.msk.bf16.mxu1 %vm3418_vm1, %v2948_v42 }
  0x63   : > { %2905 = vmatpush3.bf16.xpose.msk.msra.mxu0 %vm3418_vm1, %v2900_v41  ;;  %v519_v41 = vld [vmem:[%s3406_s11 + $0xe0] sm:$0xff] }
  0x64   : > { %2953 = vmatpush3.bf16.xpose.msk.msra.mxu1 %vm3418_vm1, %v2948_v42  ;;  %2908 = vmatprep.subr.msk.bf16.mxu0 %vm3418_vm1, %v2906_v47  ;;  %v483_v42 = vld [vmem:[%s3401_s21 + $0x1c0] sm:$0xff] }
  0x65   : > { %2956 = vmatprep.subr.msk.bf16.mxu1 %vm3418_vm1, %v2954_v48 }
  0x6b   : > { %2911 = vmatpush3.bf16.xpose.msk.msra.mxu0 %vm3418_vm1, %v2906_v47  ;;  %v3038_v47 = vpack.c.bf16 %v484_v43, %v483_v42  ;;  %v3747_v43 = vld [vmem:[%s4068_s6] sm:$0xff] }
  0x6c   : > { %2959 = vmatpush3.bf16.xpose.msk.msra.mxu1 %vm3418_vm1, %v2954_v48  ;;  %2914 = vmatprep.subr.msk.bf16.mxu0 %vm3418_vm1, %v2912_v53  ;;  %v505_v48 = vld [vmem:[%s3406_s11 + $0x70] sm:$0xff] }
  0x6d   : > { %2962 = vmatprep.subr.msk.bf16.mxu1 %vm3418_vm1, %v2960_v54 }
  0x73   : > { %2917 = vmatpush3.bf16.xpose.msk.msra.mxu0 %vm3418_vm1, %v2912_v53  ;;  %v469_v53 = vld [vmem:[%s3401_s21 + $0x150] sm:$0xff] }
  0x74   : > { %2965 = vmatpush3.bf16.xpose.msk.msra.mxu1 %vm3418_vm1, %v2960_v54  ;;  %2968 = vmatprep.subr.msk.bf16.mxu0 %vm3418_vm1, %v2966_v59  ;;  %v470_v54 = vld [vmem:[%s3401_s21 + $0x158] sm:$0xff] }
  0x75   : > { %3016 = vmatprep.subr.msk.bf16.mxu1 %vm3418_vm1, %v3014_v60  ;;  %v2996_v58 = vpack.c.bf16 %v470_v54, %v469_v53 }
  0x7a   : > { %2579 = vmatmul.mubr.msk.f32.vlgmr.msra.gmra.mrb[0].mxu0 %vm555_vm0, %v492_v1  ;;  %v3050_v1 = vpack.c.bf16 %v488_v63, %v487_v62 }
  0x7b   : > { %2635 = vmatmul.mubr.msk.f32.vlgmr.msra.gmra.mrb[0].mxu1 %vm555_vm0, %v508_v2  ;;  %2971 = vmatpush3.bf16.xpose.msk.msra.mxu0 %vm3418_vm1, %v2966_v59  ;;  %v3044_v59 = vpack.c.bf16 %v486_v57, %v485_v56  ;;  %v473_v2 = vld [vmem:[%s3401_s21 + $0x170] sm:$0xff] }
  0x7c   : > { %3019 = vmatpush3.bf16.xpose.msk.msra.mxu1 %vm3418_vm1, %v3014_v60  ;;  %2974 = vmatprep.subr.msk.bf16.mxu0 %vm3418_vm1, %v2972_v3  ;;  %v471_v60 = vld [vmem:[%s3401_s21 + $0x160] sm:$0xff]  ;;  %v3761_v57 = vld [vmem:[%s4068_s6 + $0x10] sm:$0xff] }
  0x7d   : > { %3022 = vmatprep.subr.msk.bf16.mxu1 %vm3418_vm1, %v3020_v4  ;;  %2581 = vmatprep.mubr.msk.f32.mxu0 %vm555_vm0, %v493_v5  ;;  %v3002_v0 = vpack.c.bf16 %v472_v61, %v471_v60  ;;  %v490_v5 = vld [vmem:[%s3401_s21 + $0x1f8] sm:$0xff] }
  0x7e   : > { %2637 = vmatprep.mubr.msk.f32.mxu1 %vm555_vm0, %v509_v6  ;;  %2582 = vmatmul.mubr.msk.f32.gmra.mrb[2].mxu0 %vm555_vm0, %v494_v7 }
  0x7f   : > { %2638 = vmatmul.mubr.msk.f32.gmra.mrb[2].mxu1 %vm555_vm0, %v510_v9  ;;  %2584 = vmatprep.mubr.msk.f32.mxu0 %vm555_vm0, %v495_v10  ;;  %v524_v9 = vld [vmem:[%s3406_s11 + $0x108] sm:$0xff] }
  0x80   : > { %2640 = vmatprep.mubr.msk.f32.mxu1 %vm555_vm0, %v511_v13  ;;  %v540_v10 = vld [vmem:[%s3406_s11 + $0x188] sm:$0xff]  ;;  %v526_v13 = vld [vmem:[%s3406_s11 + $0x118] sm:$0xff] }
  0x82   : > { %2585 = vmatmul.mubr.msk.f32.gmra.mrb[4].mxu0 %vm555_vm0, %v496_v16  ;;  %v528_v16 = vld [vmem:[%s3406_s11 + $0x128] sm:$0xff] }
  0x83   : > { %2977 = vmatpush3.bf16.xpose.msk.msra.mxu0 %vm3418_vm1, %v2972_v3  ;;  %2641 = vmatmul.mubr.msk.f32.gmra.mrb[4].mxu1 %vm555_vm0, %v512_v18  ;;  %v474_v3 = vld [vmem:[%s3401_s21 + $0x178] sm:$0xff]  ;;  %v529_v18 = vld [vmem:[%s3406_s11 + $0x130] sm:$0xff] }
  0x84   : > { %3025 = vmatpush3.bf16.xpose.msk.msra.mxu1 %vm3418_vm1, %v3020_v4  ;;  %2980 = vmatprep.subr.msk.bf16.mxu0 %vm3418_vm1, %v2978_v17  ;;  %v489_v4 = vld [vmem:[%s3401_s21 + $0x1f0] sm:$0xff]  ;;  %v3008_v6 = vpack.c.bf16 %v474_v3, %v473_v2 }
  0x85   : > { %3028 = vmatprep.subr.msk.bf16.mxu1 %vm3418_vm1, %v3026_v19  ;;  %2587 = vmatprep.mubr.msk.f32.mxu0 %vm555_vm0, %v497_v20  ;;  %v3056_v7 = vpack.c.bf16 %v490_v5, %v489_v4  ;;  %v530_v20 = vld [vmem:[%s3406_s11 + $0x138] sm:$0xff]  ;;  %v3769_v4 = vld [vmem:[%s4068_s6 + $0x28] sm:$0xff] }
  0x86   : > { %2643 = vmatprep.mubr.msk.f32.mxu1 %vm555_vm0, %v513_v21  ;;  %2588 = vmatmul.mubr.msk.f32.gmra.mrb[6].mxu0 %vm555_vm0, %v498_v22  ;;  %v546_v21 = vld [vmem:[%s3406_s11 + $0x1b8] sm:$0xff]  ;;  %v531_v22 = vld [vmem:[%s3406_s11 + $0x140] sm:$0xff] }
  0x87   : > { %2644 = vmatmul.mubr.msk.f32.gmra.mrb[6].mxu1 %vm555_vm0, %v514_v23  ;;  %2590 = vmatprep.mubr.msk.f32.mxu0 %vm555_vm0, %v499_v24  ;;  %v547_v23 = vld [vmem:[%s3406_s11 + $0x1c0] sm:$0xff]  ;;  %v532_v24 = vld [vmem:[%s3406_s11 + $0x148] sm:$0xff] }
  0x88   : > { %2646 = vmatprep.mubr.msk.f32.mxu1 %vm555_vm0, %v515_v27  ;;  %v549_v27 = vld [vmem:[%s3406_s11 + $0x1d0] sm:$0xff] }
  0x8a   : > { %2591 = vmatmul.mubr.msk.f32.gmra.mrb[8].mxu0 %vm555_vm0, %v500_v30  ;;  %v535_v30 = vld [vmem:[%s3406_s11 + $0x160] sm:$0xff] }
  0x8b   : > { %2983 = vmatpush3.bf16.xpose.msk.msra.mxu0 %vm3418_vm1, %v2978_v17  ;;  %2647 = vmatmul.mubr.msk.f32.gmra.mrb[8].mxu1 %vm555_vm0, %v516_v32  ;;  %v544_v17 = vld [vmem:[%s3406_s11 + $0x1a8] sm:$0xff] }
  0x8c   : > { %3031 = vmatpush3.bf16.xpose.msk.msra.mxu1 %vm3418_vm1, %v3026_v19  ;;  %2986 = vmatprep.subr.msk.bf16.mxu0 %vm3418_vm1, %v2984_v31  ;;  %v545_v19 = vld [vmem:[%s3406_s11 + $0x1b0] sm:$0xff]  ;;  %v536_v32 = vld [vmem:[%s3406_s11 + $0x168] sm:$0xff] }
  0x8d   : > { %3034 = vmatprep.subr.msk.bf16.mxu1 %vm3418_vm1, %v3032_v33  ;;  %2593 = vmatprep.mubr.msk.f32.mxu0 %vm555_vm0, %v501_v34  ;;  %v537_v34 = vld [vmem:[%s3406_s11 + $0x170] sm:$0xff] }
  0x8e   : > { %2649 = vmatprep.mubr.msk.f32.mxu1 %vm555_vm0, %v517_v35  ;;  %2594 = vmatmul.mubr.msk.f32.gmra.mrb[10].mxu0 %vm555_vm0, %v502_v36  ;;  %v553_v35 = vld [vmem:[%s3406_s11 + $0x1f0] sm:$0xff]  ;;  %v538_v36 = vld [vmem:[%s3406_s11 + $0x178] sm:$0xff] }
  0x8f   : > { %2650 = vmatmul.mubr.msk.f32.gmra.mrb[10].mxu1 %vm555_vm0, %v518_v37  ;;  %2596 = vmatprep.mubr.msk.f32.mxu0 %vm555_vm0, %v503_v38  ;;  %v554_v37 = vld [vmem:[%s3406_s11 + $0x1f8] sm:$0xff] }
  0x90   : > { %2652 = vmatprep.mubr.msk.f32.mxu1 %vm555_vm0, %v519_v41 }
  0x92   : > { %2597 = vmatmul.mubr.msk.f32.gmra.mrb[12].mxu0 %vm555_vm0, %v504_v44 }
  0x93   : > { %2989 = vmatpush3.bf16.xpose.msk.msra.mxu0 %vm3418_vm1, %v2984_v31  ;;  %2653 = vmatmul.mubr.msk.f32.gmra.mrb[12].mxu1 %vm555_vm0, %v520_v46  ;;  %v551_v31 = vld [vmem:[%s3406_s11 + $0x1e0] sm:$0xff] }
  0x94   : > { %3037 = vmatpush3.bf16.xpose.msk.msra.mxu1 %vm3418_vm1, %v3032_v33  ;;  %2992 = vmatprep.subr.msk.bf16.mxu0 %vm3418_vm1, %v2990_v45  ;;  %v552_v33 = vld [vmem:[%s3406_s11 + $0x1e8] sm:$0xff] }
  0x95   : > { %3040 = vmatprep.subr.msk.bf16.mxu1 %vm3418_vm1, %v3038_v47  ;;  %2599 = vmatprep.mubr.msk.f32.mxu0 %vm555_vm0, %v505_v48 }
  0x96   : > { %2655 = vmatprep.mubr.msk.f32.mxu1 %vm555_vm0, %v521_v49  ;;  %2600 = vmatmul.mubr.msk.f32.gmra.mrb[14].mxu0 %vm555_vm0, %v506_v50 }
  0x97   : > { %2656 = vmatmul.mubr.msk.f32.gmra.mrb[14].mxu1 %vm555_vm0, %v522_v51  ;;  %2690 = vmatprep.mubr.msk.f32.mxu0 %vm555_vm0, %v523_v52  ;;  %v3755_v52 = vld [vmem:[%s4068_s6 + $0x18] sm:$0xff] }
  0x98   : > { %2746 = vmatprep.mubr.msk.f32.mxu1 %vm555_vm0, %v539_v55 }
  0x9b   : > { %2995 = vmatpush3.bf16.xpose.msk.msra.mxu0 %vm3418_vm1, %v2990_v45 }
  0x9c   : > { %3043 = vmatpush3.bf16.xpose.msk.msra.mxu1 %vm3418_vm1, %v3038_v47  ;;  %2998 = vmatprep.subr.msk.bf16.mxu0 %vm3418_vm1, %v2996_v58 }
  0x9d   : > { %3046 = vmatprep.subr.msk.bf16.mxu1 %vm3418_vm1, %v3044_v59 }
  0xa3   : > { %3001 = vmatpush3.bf16.xpose.msk.msra.mxu0 %vm3418_vm1, %v2996_v58 }
  0xa4   : > { %3049 = vmatpush3.bf16.xpose.msk.msra.mxu1 %vm3418_vm1, %v3044_v59  ;;  %3004 = vmatprep.subr.msk.bf16.mxu0 %vm3418_vm1, %v3002_v0 }
  0xa5   : > { %3052 = vmatprep.subr.msk.bf16.mxu1 %vm3418_vm1, %v3050_v1 }
  0xab   : > { %3007 = vmatpush3.bf16.xpose.msk.msra.mxu0 %vm3418_vm1, %v3002_v0 }
  0xac   : > { %3055 = vmatpush3.bf16.xpose.msk.msra.mxu1 %vm3418_vm1, %v3050_v1  ;;  %3010 = vmatprep.subr.msk.bf16.mxu0 %vm3418_vm1, %v3008_v6 }
  0xad   : > { %3058 = vmatprep.subr.msk.bf16.mxu1 %vm3418_vm1, %v3056_v7 }
  0xb3   : > { %3013 = vmatpush3.bf16.xpose.msk.msra.mxu0 %vm3418_vm1, %v3008_v6 }
  0xb4   : > { %3061 = vmatpush3.bf16.xpose.msk.msra.mxu1 %vm3418_vm1, %v3056_v7 }
  0xba   : > { %2691 = vmatmul.mubr.msk.f32.vlgmr.msra.gmra.mrb[16].mxu0 %vm555_vm0, %v524_v9 }
  0xbb   : > { %2747 = vmatmul.mubr.msk.f32.vlgmr.msra.gmra.mrb[16].mxu1 %vm555_vm0, %v540_v10  ;;  %2693 = vmatprep.mubr.msk.f32.mxu0 %vm555_vm0, %v525_v11  ;;  %v3775_v10 = vld [vmem:[%s4068_s6 + $0x20] sm:$0xff] }
  0xbc   : > { %2749 = vmatprep.mubr.msk.f32.mxu1 %vm555_vm0, %v541_v12 }
  0xbe   : > { %2694 = vmatmul.mubr.msk.f32.gmra.mrb[18].mxu0 %vm555_vm0, %v526_v13 }
  0xbf   : > { %2750 = vmatmul.mubr.msk.f32.gmra.mrb[18].mxu1 %vm555_vm0, %v542_v8  ;;  %2696 = vmatprep.mubr.msk.f32.mxu0 %vm555_vm0, %v527_v14 }
  0xc0   : > { %2752 = vmatprep.mubr.msk.f32.mxu1 %vm555_vm0, %v543_v15 }
  0xc2   : > { %2697 = vmatmul.mubr.msk.f32.gmra.mrb[20].mxu0 %vm555_vm0, %v528_v16 }
  0xc3   : > { %2753 = vmatmul.mubr.msk.f32.gmra.mrb[20].mxu1 %vm555_vm0, %v544_v17  ;;  %2699 = vmatprep.mubr.msk.f32.mxu0 %vm555_vm0, %v529_v18 }
  0xc4   : > { %2755 = vmatprep.mubr.msk.f32.mxu1 %vm555_vm0, %v545_v19 }
  0xc6   : > { %2700 = vmatmul.mubr.msk.f32.gmra.mrb[22].mxu0 %vm555_vm0, %v530_v20  ;;  %v3783_v20 = vld [vmem:[%s4068_s6 + $0x38] sm:$0xff] }
  0xc7   : > { %2756 = vmatmul.mubr.msk.f32.gmra.mrb[22].mxu1 %vm555_vm0, %v546_v21  ;;  %2702 = vmatprep.mubr.msk.f32.mxu0 %vm555_vm0, %v531_v22 }
  0xc8   : > { %2758 = vmatprep.mubr.msk.f32.mxu1 %vm555_vm0, %v547_v23 }
  0xca   : > { %2703 = vmatmul.mubr.msk.f32.gmra.mrb[24].mxu0 %vm555_vm0, %v532_v24 }
  0xcb   : > { %2759 = vmatmul.mubr.msk.f32.gmra.mrb[24].mxu1 %vm555_vm0, %v548_v25  ;;  %2705 = vmatprep.mubr.msk.f32.mxu0 %vm555_vm0, %v533_v26  ;;  %v3789_v25 = vld [vmem:[%s4068_s6 + $0x30] sm:$0xff] }
  0xcc   : > { %2761 = vmatprep.mubr.msk.f32.mxu1 %vm555_vm0, %v549_v27 }
  0xce   : > { %2706 = vmatmul.mubr.msk.f32.gmra.mrb[26].mxu0 %vm555_vm0, %v534_v28 }
  0xcf   : > { %2762 = vmatmul.mubr.msk.f32.gmra.mrb[26].mxu1 %vm555_vm0, %v550_v29  ;;  %2708 = vmatprep.mubr.msk.f32.mxu0 %vm555_vm0, %v535_v30 }
  0xd0   : > { %2764 = vmatprep.mubr.msk.f32.mxu1 %vm555_vm0, %v551_v31 }
  0xd2   : > { %2709 = vmatmul.mubr.msk.f32.gmra.mrb[28].mxu0 %vm555_vm0, %v536_v32 }
  0xd3   : > { %2765 = vmatmul.mubr.msk.f32.gmra.mrb[28].mxu1 %vm555_vm0, %v552_v33  ;;  %2711 = vmatprep.mubr.msk.f32.mxu0 %vm555_vm0, %v537_v34 }
  0xd4   : > { %2767 = vmatprep.mubr.msk.f32.mxu1 %vm555_vm0, %v553_v35 }
  0xd6   : > { %2712 = vmatmul.mubr.msk.f32.gmra.mrb[30].mxu0 %vm555_vm0, %v538_v36  ;;  %v3797_v36 = vld [vmem:[%s4068_s6 + $0x48] sm:$0xff] }
  0xd7   : > { %2768 = vmatmul.mubr.msk.f32.gmra.mrb[30].mxu1 %vm555_vm0, %v554_v37 }
 0x14d   : > { %v2580_v38 = vpop.f32.mrb[0].mxu0 }
 0x14e   : > { %v1521_v40 = vmul.f32 0.001953125, %v2580_v38  ;;  %v2636_v41 = vpop.f32.mrb[0].mxu1  ;;  %v718_v42 = vpop.f32.mrb[1].mxu0 }
 0x14f   : > { %v1537_v44 = vmul.f32 0.001953125, %v2636_v41  ;;  %v1520_v45 = vmul.f32 0.001953125, %v718_v42  ;;  %v959_v46 = vpop.f32.mrb[1].mxu1  ;;  %v3803_v42 = vld [vmem:[%s4068_s6 + $0x40] sm:$0xff] }
 0x150   : > { %v1601_v47 = vadd.f32 %v3742_v39, %v1521_v40  ;;  %v1536_v48 = vmul.f32 0.001953125, %v959_v46 }
 0x151   : > { %v1617_v49 = vadd.f32 %v3742_v39, %v1537_v44  ;;  %v1600_v50 = vadd.f32 %v3747_v43, %v1520_v45  ;;  %v2583_v51 = vpop.f32.mrb[2].mxu0 }
 0x152   : > { %v1616_v53 = vadd.f32 %v3747_v43, %v1536_v48  ;;  %v1523_v54 = vmul.f32 0.001953125, %v2583_v51  ;;  %v2639_v55 = vpop.f32.mrb[2].mxu1  ;;  %v728_v56 = vpop.f32.mrb[3].mxu0 }
 0x153   : > { %v1664_v58 = vpack.c.bf16 %v1601_v47, %v1600_v50  ;;  %v1539_v59 = vmul.f32 0.001953125, %v2639_v55  ;;  %v1522_v60 = vmul.f32 0.001953125, %v728_v56  ;;  %v969_v61 = vpop.f32.mrb[3].mxu1  ;;  %v3811_v55 = vld [vmem:[%s4068_s6 + $0x58] sm:$0xff] }
 0x154   : > { %v1672_v62 = vpack.c.bf16 %v1617_v49, %v1616_v53  ;;  %v1603_v63 = vadd.f32 %v3755_v52, %v1523_v54  ;;  %v1538_v0 = vmul.f32 0.001953125, %v969_v61  ;;  %v3817_v61 = vld [vmem:[%s4068_s6 + $0x50] sm:$0xff] }
 0x155   : > { %1696 = vst [vmem:[#allocation2] sm:$0xff] %v1664_v58  ;;  %v1619_v1 = vadd.f32 %v3755_v52, %v1539_v59  ;;  %v1602_v2 = vadd.f32 %v3761_v57, %v1522_v60  ;;  %v2586_v3 = vpop.f32.mrb[4].mxu0 }
 0x156   : > { %1704 = vst [vmem:[#allocation2 + $0x40] sm:$0xff] %v1672_v62  ;;  %v1618_v5 = vadd.f32 %v3761_v57, %v1538_v0  ;;  %v1525_v6 = vmul.f32 0.001953125, %v2586_v3  ;;  %v2642_v7 = vpop.f32.mrb[4].mxu1  ;;  %v738_v9 = vpop.f32.mrb[5].mxu0 }
 0x157   : > { %v1665_v11 = vpack.c.bf16 %v1603_v63, %v1602_v2  ;;  %v1541_v12 = vmul.f32 0.001953125, %v2642_v7  ;;  %v1524_v13 = vmul.f32 0.001953125, %v738_v9  ;;  %v979_v8 = vpop.f32.mrb[5].mxu1 }
 0x158   : > { %v1673_v14 = vpack.c.bf16 %v1619_v1, %v1618_v5  ;;  %v1605_v15 = vadd.f32 %v3769_v4, %v1525_v6  ;;  %v1540_v16 = vmul.f32 0.001953125, %v979_v8 }
 0x159   : > { %1697 = vst [vmem:[#allocation2 + $0x8] sm:$0xff] %v1665_v11  ;;  %v1621_v17 = vadd.f32 %v3769_v4, %v1541_v12  ;;  %v1604_v18 = vadd.f32 %v3775_v10, %v1524_v13  ;;  %v2589_v19 = vpop.f32.mrb[6].mxu0  ;;  %v3825_v11 = vld [vmem:[%s4068_s6 + $0x68] sm:$0xff] }
 0x15a   : > { %1705 = vst [vmem:[#allocation2 + $0x48] sm:$0xff] %v1673_v14  ;;  %v1620_v21 = vadd.f32 %v3775_v10, %v1540_v16  ;;  %v1527_v22 = vmul.f32 0.001953125, %v2589_v19  ;;  %v2645_v23 = vpop.f32.mrb[6].mxu1  ;;  %v748_v24 = vpop.f32.mrb[7].mxu0 }
 0x15b   : > { %v1666_v26 = vpack.c.bf16 %v1605_v15, %v1604_v18  ;;  %v1543_v27 = vmul.f32 0.001953125, %v2645_v23  ;;  %v1526_v28 = vmul.f32 0.001953125, %v748_v24  ;;  %v989_v29 = vpop.f32.mrb[7].mxu1  ;;  %v3831_v15 = vld [vmem:[%s4068_s6 + $0x60] sm:$0xff] }
 0x15c   : > { %v1674_v30 = vpack.c.bf16 %v1621_v17, %v1620_v21  ;;  %v1607_v31 = vadd.f32 %v3783_v20, %v1527_v22  ;;  %v1542_v32 = vmul.f32 0.001953125, %v989_v29 }
 0x15d   : > { %1698 = vst [vmem:[#allocation2 + $0x10] sm:$0xff] %v1666_v26  ;;  %v1623_v33 = vadd.f32 %v3783_v20, %v1543_v27  ;;  %v1606_v34 = vadd.f32 %v3789_v25, %v1526_v28  ;;  %v2592_v35 = vpop.f32.mrb[8].mxu0  ;;  %v3839_v28 = vld [vmem:[%s4068_s6 + $0x78] sm:$0xff] }
 0x15e   : > { %1706 = vst [vmem:[#allocation2 + $0x50] sm:$0xff] %v1674_v30  ;;  %v1622_v37 = vadd.f32 %v3789_v25, %v1542_v32  ;;  %v1529_v38 = vmul.f32 0.001953125, %v2592_v35  ;;  %v2648_v40 = vpop.f32.mrb[8].mxu1  ;;  %v758_v41 = vpop.f32.mrb[9].mxu0 }
 0x15f   : > { %v1667_v44 = vpack.c.bf16 %v1607_v31, %v1606_v34  ;;  %v1545_v45 = vmul.f32 0.001953125, %v2648_v40  ;;  %v1528_v46 = vmul.f32 0.001953125, %v758_v41  ;;  %v999_v47 = vpop.f32.mrb[9].mxu1 }
 0x160   : > { %v1675_v48 = vpack.c.bf16 %v1623_v33, %v1622_v37  ;;  %v1609_v49 = vadd.f32 %v3797_v36, %v1529_v38  ;;  %v1544_v50 = vmul.f32 0.001953125, %v999_v47  ;;  %v3845_v33 = vld [vmem:[%s4068_s6 + $0x70] sm:$0xff] }
 0x161   : > { %1699 = vst [vmem:[#allocation2 + $0x18] sm:$0xff] %v1667_v44  ;;  %v1625_v51 = vadd.f32 %v3797_v36, %v1545_v45  ;;  %v1608_v53 = vadd.f32 %v3803_v42, %v1528_v46  ;;  %v2595_v54 = vpop.f32.mrb[10].mxu0 }
 0x162   : > { %1707 = vst [vmem:[#allocation2 + $0x58] sm:$0xff] %v1675_v48  ;;  %v1624_v56 = vadd.f32 %v3803_v42, %v1544_v50  ;;  %v1531_v58 = vmul.f32 0.001953125, %v2595_v54  ;;  %v2651_v59 = vpop.f32.mrb[10].mxu1  ;;  %v768_v60 = vpop.f32.mrb[11].mxu0 }
 0x163   : > { %v1668_v62 = vpack.c.bf16 %v1609_v49, %v1608_v53  ;;  %v1547_v63 = vmul.f32 0.001953125, %v2651_v59  ;;  %v1530_v0 = vmul.f32 0.001953125, %v768_v60  ;;  %v1009_v1 = vpop.f32.mrb[11].mxu1 }
 0x164   : > { %v1676_v2 = vpack.c.bf16 %v1625_v51, %v1624_v56  ;;  %v1611_v3 = vadd.f32 %v3811_v55, %v1531_v58  ;;  %v1546_v5 = vmul.f32 0.001953125, %v1009_v1 }
 0x165   : > { %1700 = vst [vmem:[#allocation2 + $0x20] sm:$0xff] %v1668_v62  ;;  %v1627_v6 = vadd.f32 %v3811_v55, %v1547_v63  ;;  %v1610_v7 = vadd.f32 %v3817_v61, %v1530_v0  ;;  %v2598_v9 = vpop.f32.mrb[12].mxu0 }
 0x166   : > { %1708 = vst [vmem:[#allocation2 + $0x60] sm:$0xff] %v1676_v2  ;;  %v1626_v12 = vadd.f32 %v3817_v61, %v1546_v5  ;;  %v1533_v13 = vmul.f32 0.001953125, %v2598_v9  ;;  %v2654_v8 = vpop.f32.mrb[12].mxu1  ;;  %v778_v14 = vpop.f32.mrb[13].mxu0 }
 0x167   : > { %v1669_v16 = vpack.c.bf16 %v1611_v3, %v1610_v7  ;;  %v1549_v17 = vmul.f32 0.001953125, %v2654_v8  ;;  %v1532_v18 = vmul.f32 0.001953125, %v778_v14  ;;  %v1019_v19 = vpop.f32.mrb[13].mxu1 }
 0x168   : > { %v1677_v21 = vpack.c.bf16 %v1627_v6, %v1626_v12  ;;  %v1613_v22 = vadd.f32 %v3825_v11, %v1533_v13  ;;  %v1548_v23 = vmul.f32 0.001953125, %v1019_v19 }
 0x169   : > { %1701 = vst [vmem:[#allocation2 + $0x28] sm:$0xff] %v1669_v16  ;;  %v1629_v24 = vadd.f32 %v3825_v11, %v1549_v17  ;;  %v1612_v26 = vadd.f32 %v3831_v15, %v1532_v18  ;;  %v2601_v27 = vpop.f32.mrb[14].mxu0 }
 0x16a   : > { %1709 = vst [vmem:[#allocation2 + $0x68] sm:$0xff] %v1677_v21  ;;  %v1628_v29 = vadd.f32 %v3831_v15, %v1548_v23  ;;  %v1535_v30 = vmul.f32 0.001953125, %v2601_v27  ;;  %v2657_v31 = vpop.f32.mrb[14].mxu1  ;;  %v788_v32 = vpop.f32.mrb[15].mxu0 }
 0x16b   : > { %v1670_v34 = vpack.c.bf16 %v1613_v22, %v1612_v26  ;;  %v1551_v35 = vmul.f32 0.001953125, %v2657_v31  ;;  %v1534_v37 = vmul.f32 0.001953125, %v788_v32  ;;  %v1029_v38 = vpop.f32.mrb[15].mxu1 }
 0x16c   : > { %v1678_v40 = vpack.c.bf16 %v1629_v24, %v1628_v29  ;;  %v1615_v41 = vadd.f32 %v3839_v28, %v1535_v30  ;;  %v1550_v44 = vmul.f32 0.001953125, %v1029_v38 }
 0x16d   : > { %1702 = vst [vmem:[#allocation2 + $0x30] sm:$0xff] %v1670_v34  ;;  %v1631_v45 = vadd.f32 %v3839_v28, %v1551_v35  ;;  %v1614_v46 = vadd.f32 %v3845_v33, %v1534_v37 }
 0x16e   : > { %1710 = vst [vmem:[#allocation2 + $0x70] sm:$0xff] %v1678_v40  ;;  %v1630_v47 = vadd.f32 %v3845_v33, %v1550_v44 }
 0x16f   : > { %v1671_v48 = vpack.c.bf16 %v1615_v41, %v1614_v46 }
 0x170   : > { %v1679_v49 = vpack.c.bf16 %v1631_v45, %v1630_v47 }
 0x171   : > { %1703 = vst [vmem:[#allocation2 + $0x38] sm:$0xff] %v1671_v48 }
 0x172   : > { %1711 = vst [vmem:[#allocation2 + $0x78] sm:$0xff] %v1679_v49 }
 0x18d   : > { %v2692_v50 = vpop.f32.mrb[16].mxu0 }
 0x18e   : > { %v1553_v51 = vmul.f32 0.001953125, %v2692_v50  ;;  %v2748_v53 = vpop.f32.mrb[16].mxu1  ;;  %v1200_v54 = vpop.f32.mrb[17].mxu0 }
 0x18f   : > { %v1569_v56 = vmul.f32 0.001953125, %v2748_v53  ;;  %v1552_v58 = vmul.f32 0.001953125, %v1200_v54  ;;  %v1441_v59 = vpop.f32.mrb[17].mxu1 }
 0x190   : > { %v1633_v60 = vadd.f32 %v3742_v39, %v1553_v51  ;;  %v1568_v62 = vmul.f32 0.001953125, %v1441_v59 }
 0x191   : > { %v1649_v63 = vadd.f32 %v3742_v39, %v1569_v56  ;;  %v1632_v0 = vadd.f32 %v3747_v43, %v1552_v58  ;;  %v2695_v1 = vpop.f32.mrb[18].mxu0 }
 0x192   : > { %v1648_v2 = vadd.f32 %v3747_v43, %v1568_v62  ;;  %v1555_v3 = vmul.f32 0.001953125, %v2695_v1  ;;  %v2751_v5 = vpop.f32.mrb[18].mxu1  ;;  %v1210_v6 = vpop.f32.mrb[19].mxu0 }
 0x193   : > { %v1680_v7 = vpack.c.bf16 %v1633_v60, %v1632_v0  ;;  %v1571_v9 = vmul.f32 0.001953125, %v2751_v5  ;;  %v1554_v12 = vmul.f32 0.001953125, %v1210_v6  ;;  %v1451_v13 = vpop.f32.mrb[19].mxu1 }
 0x194   : > { %v1688_v8 = vpack.c.bf16 %v1649_v63, %v1648_v2  ;;  %v1635_v14 = vadd.f32 %v3755_v52, %v1555_v3  ;;  %v1570_v16 = vmul.f32 0.001953125, %v1451_v13 }
 0x195   : > { %1712 = vst [vmem:[#allocation2 + $0x80] sm:$0xff] %v1680_v7  ;;  %v1651_v17 = vadd.f32 %v3755_v52, %v1571_v9  ;;  %v1634_v39 = vadd.f32 %v3761_v57, %v1554_v12  ;;  %v2698_v18 = vpop.f32.mrb[20].mxu0 }
 0x196   : > { %1720 = vst [vmem:[#allocation2 + $0xc0] sm:$0xff] %v1688_v8  ;;  %v1650_v43 = vadd.f32 %v3761_v57, %v1570_v16  ;;  %v1557_v19 = vmul.f32 0.001953125, %v2698_v18  ;;  %v2754_v21 = vpop.f32.mrb[20].mxu1  ;;  %v1220_v22 = vpop.f32.mrb[21].mxu0 }
 0x197   : > { %v1681_v23 = vpack.c.bf16 %v1635_v14, %v1634_v39  ;;  %v1573_v24 = vmul.f32 0.001953125, %v2754_v21  ;;  %v1556_v26 = vmul.f32 0.001953125, %v1220_v22  ;;  %v1461_v27 = vpop.f32.mrb[21].mxu1 }
 0x198   : > { %v1689_v29 = vpack.c.bf16 %v1651_v17, %v1650_v43  ;;  %v1637_v30 = vadd.f32 %v3769_v4, %v1557_v19  ;;  %v1572_v31 = vmul.f32 0.001953125, %v1461_v27 }
 0x199   : > { %1713 = vst [vmem:[#allocation2 + $0x88] sm:$0xff] %v1681_v23  ;;  %v1653_v52 = vadd.f32 %v3769_v4, %v1573_v24  ;;  %v1636_v32 = vadd.f32 %v3775_v10, %v1556_v26  ;;  %v2701_v34 = vpop.f32.mrb[22].mxu0 }
 0x19a   : > { %1721 = vst [vmem:[#allocation2 + $0xc8] sm:$0xff] %v1689_v29  ;;  %v1652_v57 = vadd.f32 %v3775_v10, %v1572_v31  ;;  %v1559_v35 = vmul.f32 0.001953125, %v2701_v34  ;;  %v2757_v37 = vpop.f32.mrb[22].mxu1  ;;  %v1230_v38 = vpop.f32.mrb[23].mxu0 }
 0x19b   : > { %v1682_v40 = vpack.c.bf16 %v1637_v30, %v1636_v32  ;;  %v1575_v41 = vmul.f32 0.001953125, %v2757_v37  ;;  %v1558_v44 = vmul.f32 0.001953125, %v1230_v38  ;;  %v1471_v45 = vpop.f32.mrb[23].mxu1 }
 0x19c   : > { %v1690_v46 = vpack.c.bf16 %v1653_v52, %v1652_v57  ;;  %v1639_v47 = vadd.f32 %v3783_v20, %v1559_v35  ;;  %v1574_v48 = vmul.f32 0.001953125, %v1471_v45 }
 0x19d   : > { %1714 = vst [vmem:[#allocation2 + $0x90] sm:$0xff] %v1682_v40  ;;  %v1655_v4 = vadd.f32 %v3783_v20, %v1575_v41  ;;  %v1638_v49 = vadd.f32 %v3789_v25, %v1558_v44  ;;  %v2704_v50 = vpop.f32.mrb[24].mxu0 }
 0x19e   : > { %1722 = vst [vmem:[#allocation2 + $0xd0] sm:$0xff] %v1690_v46  ;;  %v1654_v10 = vadd.f32 %v3789_v25, %v1574_v48  ;;  %v1561_v51 = vmul.f32 0.001953125, %v2704_v50  ;;  %v2760_v53 = vpop.f32.mrb[24].mxu1  ;;  %v1240_v54 = vpop.f32.mrb[25].mxu0 }
 0x19f   : > { %v1683_v56 = vpack.c.bf16 %v1639_v47, %v1638_v49  ;;  %v1577_v58 = vmul.f32 0.001953125, %v2760_v53  ;;  %v1560_v59 = vmul.f32 0.001953125, %v1240_v54  ;;  %v1481_v60 = vpop.f32.mrb[25].mxu1 }
 0x1a0   : > { %v1691_v62 = vpack.c.bf16 %v1655_v4, %v1654_v10  ;;  %v1641_v63 = vadd.f32 %v3797_v36, %v1561_v51  ;;  %v1576_v0 = vmul.f32 0.001953125, %v1481_v60 }
 0x1a1   : > { %1715 = vst [vmem:[#allocation2 + $0x98] sm:$0xff] %v1683_v56  ;;  %v1657_v20 = vadd.f32 %v3797_v36, %v1577_v58  ;;  %v1640_v1 = vadd.f32 %v3803_v42, %v1560_v59  ;;  %v2707_v2 = vpop.f32.mrb[26].mxu0 }
 0x1a2   : > { %1723 = vst [vmem:[#allocation2 + $0xd8] sm:$0xff] %v1691_v62  ;;  %v1656_v25 = vadd.f32 %v3803_v42, %v1576_v0  ;;  %v1563_v3 = vmul.f32 0.001953125, %v2707_v2  ;;  %v2763_v5 = vpop.f32.mrb[26].mxu1  ;;  %v1250_v6 = vpop.f32.mrb[27].mxu0 }
 0x1a3   : > { %v1684_v7 = vpack.c.bf16 %v1641_v63, %v1640_v1  ;;  %v1579_v9 = vmul.f32 0.001953125, %v2763_v5  ;;  %v1562_v12 = vmul.f32 0.001953125, %v1250_v6  ;;  %v1491_v13 = vpop.f32.mrb[27].mxu1 }
 0x1a4   : > { %v1692_v8 = vpack.c.bf16 %v1657_v20, %v1656_v25  ;;  %v1643_v14 = vadd.f32 %v3811_v55, %v1563_v3  ;;  %v1578_v16 = vmul.f32 0.001953125, %v1491_v13 }
 0x1a5   : > { %1716 = vst [vmem:[#allocation2 + $0xa0] sm:$0xff] %v1684_v7  ;;  %v1659_v36 = vadd.f32 %v3811_v55, %v1579_v9  ;;  %v1642_v17 = vadd.f32 %v3817_v61, %v1562_v12  ;;  %v2710_v39 = vpop.f32.mrb[28].mxu0 }
 0x1a6   : > { %1724 = vst [vmem:[#allocation2 + $0xe0] sm:$0xff] %v1692_v8  ;;  %v1658_v42 = vadd.f32 %v3817_v61, %v1578_v16  ;;  %v1565_v18 = vmul.f32 0.001953125, %v2710_v39  ;;  %v2766_v43 = vpop.f32.mrb[28].mxu1  ;;  %v1260_v19 = vpop.f32.mrb[29].mxu0 }
 0x1a7   : > { %v1685_v21 = vpack.c.bf16 %v1643_v14, %v1642_v17  ;;  %v1581_v22 = vmul.f32 0.001953125, %v2766_v43  ;;  %v1564_v23 = vmul.f32 0.001953125, %v1260_v19  ;;  %v1501_v24 = vpop.f32.mrb[29].mxu1 }
 0x1a8   : > { %v1693_v26 = vpack.c.bf16 %v1659_v36, %v1658_v42  ;;  %v1645_v27 = vadd.f32 %v3825_v11, %v1565_v18  ;;  %v1580_v29 = vmul.f32 0.001953125, %v1501_v24 }
 0x1a9   : > { %1717 = vst [vmem:[#allocation2 + $0xa8] sm:$0xff] %v1685_v21  ;;  %v1661_v55 = vadd.f32 %v3825_v11, %v1581_v22  ;;  %v1644_v30 = vadd.f32 %v3831_v15, %v1564_v23  ;;  %v2713_v31 = vpop.f32.mrb[30].mxu0 }
 0x1aa   : > { %1725 = vst [vmem:[#allocation2 + $0xe8] sm:$0xff] %v1693_v26  ;;  %v1660_v61 = vadd.f32 %v3831_v15, %v1580_v29  ;;  %v1567_v52 = vmul.f32 0.001953125, %v2713_v31  ;;  %v2769_v32 = vpop.f32.mrb[30].mxu1  ;;  %v1270_v34 = vpop.f32.mrb[31].mxu0 }
 0x1ab   : > { %v1686_v57 = vpack.c.bf16 %v1645_v27, %v1644_v30  ;;  %v1583_v35 = vmul.f32 0.001953125, %v2769_v32  ;;  %v1566_v37 = vmul.f32 0.001953125, %v1270_v34  ;;  %v1511_v38 = vpop.f32.mrb[31].mxu1 }
 0x1ac   : > { %v1694_v40 = vpack.c.bf16 %v1661_v55, %v1660_v61  ;;  %v1647_v41 = vadd.f32 %v3839_v28, %v1567_v52  ;;  %v1582_v44 = vmul.f32 0.001953125, %v1511_v38 }
 0x1ad   : > { %1718 = vst [vmem:[#allocation2 + $0xb0] sm:$0xff] %v1686_v57  ;;  %v1663_v11 = vadd.f32 %v3839_v28, %v1583_v35  ;;  %v1646_v45 = vadd.f32 %v3845_v33, %v1566_v37 }
 0x1ae   : > { %1726 = vst [vmem:[#allocation2 + $0xf0] sm:$0xff] %v1694_v40  ;;  %v1662_v46 = vadd.f32 %v3845_v33, %v1582_v44 }
 0x1af   : > { %v1687_v15 = vpack.c.bf16 %v1647_v41, %v1646_v45 }
 0x1b0   : > { %v1695_v47 = vpack.c.bf16 %v1663_v11, %v1662_v46 }
 0x1b1   : > { %1719 = vst [vmem:[#allocation2 + $0xb8] sm:$0xff] %v1687_v15 }
 0x1b2   : > { %1727 = vst [vmem:[#allocation2 + $0xf8] sm:$0xff] %v1695_v47 }
 0x1b3 PF: > { %v1734_v48 = vld [vmem:[%s4066_s4] sm:$0xff]  ;;  %v1735_v28 = vld [vmem:[%s4066_s4 + $0x8] sm:$0xff]  ;;  %v1736_v4 = vld [vmem:[%s4066_s4 + $0x10] sm:$0xff]  ;;  %v3250_v16 = vmov 0.0   ;;  %vm3251_vm2 = vmmov 0   ;;  %v1823_v57 = vlaneseq  ;;  %s2366_s18 = sshll.u32 %s3236_s9, 3 }
 0x1b4   : > { %v1750_v33 = vpack.c.bf16 %v1735_v28, %v1734_v48  ;;  %v1737_v49 = vld [vmem:[%s4066_s4 + $0x18] sm:$0xff]  ;;  %v1738_v10 = vld [vmem:[%s4066_s4 + $0x20] sm:$0xff]  ;;  %v1739_v51 = vld [vmem:[%s4066_s4 + $0x28] sm:$0xff]  ;;  %2790 = vmatprep.subr.bf16.mxu1 %v3250_v16  ;;  %2806 = vmatprep.mubr.msk.bf16.mxu1 %vm3251_vm2, %v3250_v16  ;;  %s2103_s0 = sshll.u32 %s3410_s10, 4  ;;  %s3252_s11 = smov [#allocation4]   ;;  %s4004_s0 = int_to_ptr.vmem [resolvable:$true] %s2103_s0 }
 0x1b5   : > { %v1751_v50 = vpack.c.bf16 %v1737_v49, %v1736_v4  ;;  %v1752_v53 = vpack.c.bf16 %v1739_v51, %v1738_v10  ;;  %v1728_v54 = vld [vmem:[%s3408_s15] sm:$0xff]  ;;  %v1729_v56 = vld [vmem:[%s3408_s15 + $0x8] sm:$0xff]  ;;  %v1740_v58 = vld [vmem:[%s4066_s4 + $0x30] sm:$0xff]  ;;  %v1824_v41 = vand.u32 127, %v1823_v57  ;;  %s3158_s26 = sshll.u32 %s3252_s11, 4  ;;  %s3159_s26 = int_to_ptr.vmem [resolvable:$false] %s3158_s26 }
 0x1b6   : > { %2770 = vmatprep.subr.bf16.mxu0 %v1750_v33  ;;  %v1741_v59 = vld [vmem:[%s4066_s4 + $0x38] sm:$0xff]  ;;  %v1732_v60 = vpack.c.bf16 %v1729_v56, %v1728_v54  ;;  %v1742_v63 = vld [vmem:[%s4066_s4 + $0x40] sm:$0xff]  ;;  %v1743_v0 = vld [vmem:[%s4066_s4 + $0x48] sm:$0xff]  ;;  %s3160_s14 = scalar_lea.vmem %s3159_s26, 1024  ;;  %p3161_p6 = scmp.lt.s32.totalorder %s4004_s0, %s3159_s26 }
 0x1b7   : > { %2771 = vmatpush3.bf16.msra.mxu0 %v1750_v33  ;;  %v1753_v62 = vpack.c.bf16 %v1741_v59, %v1740_v58  ;;  %v1754_v20 = vpack.c.bf16 %v1743_v0, %v1742_v63  ;;  %v1744_v1 = vld [vmem:[%s4066_s4 + $0x50] sm:$0xff]  ;;  %v1745_v2 = vld [vmem:[%s4066_s4 + $0x58] sm:$0xff]  ;;  %v1746_v3 = vld [vmem:[%s4066_s4 + $0x60] sm:$0xff]  ;;  %vm1825_vm3 = vcmp.lt.s32.totalorder %v1824_v41, 64 }
 0x1b8   : > { %2772 = vmatprep.subr.bf16.mxu0 %v1751_v50  ;;  %2786 = vmatprep.mubr.bf16.mxu0 %v1732_v60  ;;  %v1755_v25 = vpack.c.bf16 %v1745_v2, %v1744_v1  ;;  %v1747_v5 = vld [vmem:[%s4066_s4 + $0x68] sm:$0xff]  ;;  %v1748_v7 = vld [vmem:[%s4066_s4 + $0x70] sm:$0xff]  ;;  %v1749_v9 = vld [vmem:[%s4066_s4 + $0x78] sm:$0xff] }
 0x1b9   : > { %v1756_v6 = vpack.c.bf16 %v1747_v5, %v1746_v3  ;;  %v1757_v12 = vpack.c.bf16 %v1749_v9, %v1748_v7  ;;  %v1730_v13 = vld [vmem:[%s3408_s15 + $0x10] sm:$0xff]  ;;  %v1731_v8 = vld [vmem:[%s3408_s15 + $0x18] sm:$0xff]  ;;  %v1854_v36 = vld [vmem:[#allocation2] sm:$0xff]  ;;  %s3154_s15 = scalar_lea.vmem %s4004_s0, 512 }
 0x1ba   : > { %v1733_v14 = vpack.c.bf16 %v1731_v8, %v1730_v13  ;;  %v1862_v17 = vld [vmem:[#allocation2 + $0x40] sm:$0xff]  ;;  %2791 = vmatpush3.bf16.msra.mxu1 %v1854_v36  ;;  %v1855_v39 = vld [vmem:[#allocation2 + $0x8] sm:$0xff]  ;;  %v1856_v18 = vld [vmem:[#allocation2 + $0x10] sm:$0xff]  ;;  %p3155_p3 = scmp.ne.s32.totalorder %s4004_s0, %s3154_s15  ;;  %p3162_p7 = scmp.lt.s32.totalorder %s3160_s14, %s3154_s15 }
 0x1bb   : > { %2773 = vmatpush3.bf16.msra.mxu0 %v1751_v50  ;;  %2792 = vmatprep.subr.bf16.mxu1 %v3250_v16  ;;  %v1863_v42 = vld [vmem:[#allocation2 + $0x48] sm:$0xff]  ;;  %v1864_v43 = vld [vmem:[#allocation2 + $0x50] sm:$0xff]  ;;  %v1857_v19 = vld [vmem:[#allocation2 + $0x18] sm:$0xff] }
 0x1bc   : > { %2774 = vmatprep.subr.bf16.mxu0 %v1752_v53  ;;  %v1865_v21 = vld [vmem:[#allocation2 + $0x58] sm:$0xff]  ;;  %v1858_v22 = vld [vmem:[#allocation2 + $0x20] sm:$0xff]  ;;  %v1859_v24 = vld [vmem:[#allocation2 + $0x28] sm:$0xff]  ;;  %p3156_p4 = pnand %p3155_p3, %p3361_p8  ;;  %p3163_p10 = por %p3162_p7, %p3161_p6 }
 0x1bd   : > { %v1866_v23 = vld [vmem:[#allocation2 + $0x60] sm:$0xff]  ;;  %v1867_v26 = vld [vmem:[#allocation2 + $0x68] sm:$0xff]  ;;  %v1860_v27 = vld [vmem:[#allocation2 + $0x30] sm:$0xff] }
 0x1be   : > { %2793 = vmatpush3.bf16.msra.mxu1 %v1855_v39  ;;  %v1868_v29 = vld [vmem:[#allocation2 + $0x70] sm:$0xff]  ;;  %v1861_v55 = vld [vmem:[#allocation2 + $0x38] sm:$0xff]  ;;  %v2362_v61 = vld [vmem:[%s4067_s5] ss:$0 sm:$0xff]  ;;  %p3157_p5 = pneg %p3156_p4 }
 0x1bf   : > { %2775 = vmatpush3.bf16.msra.mxu0 %v1752_v53  ;;  %2794 = vmatprep.subr.bf16.mxu1 %v3250_v16  ;;  %v1869_v30 = vld [vmem:[#allocation2 + $0x78] sm:$0xff]  ;;  %v1878_v60 = vld [vmem:[#allocation2 + $0xc0] sm:$0xff]  ;;  %v1879_v0 = vld [vmem:[#allocation2 + $0xc8] sm:$0xff] }
 0x1c0   : > { %2776 = vmatprep.subr.bf16.mxu0 %v1753_v62  ;;  %v1870_v63 = vld [vmem:[#allocation2 + $0x80] sm:$0xff]  ;;  %v1880_v2 = vld [vmem:[#allocation2 + $0xd0] sm:$0xff]  ;;  %v1881_v5 = vld [vmem:[#allocation2 + $0xd8] sm:$0xff]  ;;  %p3164_p11 = pnand %p3163_p10, %p3157_p5 }
 0x1c1   : > { %v1872_v3 = vld [vmem:[#allocation2 + $0x90] sm:$0xff]  ;;  %v1882_v7 = vld [vmem:[#allocation2 + $0xe0] sm:$0xff]  ;;  %v1875_v8 = vld [vmem:[#allocation2 + $0xa8] sm:$0xff] }
 0x1c2   : > { %2795 = vmatpush3.bf16.msra.mxu1 %v1856_v18  ;;  %v1874_v9 = vld [vmem:[#allocation2 + $0xa0] sm:$0xff]  ;;  %v1884_v36 = vld [vmem:[#allocation2 + $0xf0] sm:$0xff] }
 0x1c3   : > { %2777 = vmatpush3.bf16.msra.mxu0 %v1753_v62  ;;  %2796 = vmatprep.subr.bf16.mxu1 %v3250_v16  ;;  %v1876_v39 = vld [vmem:[#allocation2 + $0xb0] sm:$0xff] }
 0x1c4   : > { %2778 = vmatprep.subr.bf16.mxu0 %v1754_v20 }
 0x1c6   : > { %2797 = vmatpush3.bf16.msra.mxu1 %v1857_v19  ;;  %v1885_v19 = vld [vmem:[#allocation2 + $0xf8] sm:$0xff] }
 0x1c7   : > { %2779 = vmatpush3.bf16.msra.mxu0 %v1754_v20  ;;  %2798 = vmatprep.subr.bf16.mxu1 %v3250_v16  ;;  %v1871_v20 = vld [vmem:[#allocation2 + $0x88] sm:$0xff] }
 0x1c8   : > { %2780 = vmatprep.subr.bf16.mxu0 %v1755_v25 }
 0x1ca   : > { %2799 = vmatpush3.bf16.msra.mxu1 %v1858_v22  ;;  %v1877_v22 = vld [vmem:[#allocation2 + $0xb8] sm:$0xff] }
 0x1cb   : > { %2781 = vmatpush3.bf16.msra.mxu0 %v1755_v25  ;;  %2800 = vmatprep.subr.bf16.mxu1 %v3250_v16 }
 0x1cc   : > { %2782 = vmatprep.subr.bf16.mxu0 %v1756_v6 }
 0x1ce   : > { %2801 = vmatpush3.bf16.msra.mxu1 %v1859_v24 }
 0x1cf   : > { %2783 = vmatpush3.bf16.msra.mxu0 %v1756_v6  ;;  %2802 = vmatprep.subr.bf16.mxu1 %v3250_v16  ;;  %v1873_v6 = vld [vmem:[#allocation2 + $0x98] sm:$0xff] }
 0x1d0   : > { %2784 = vmatprep.subr.bf16.mxu0 %v1757_v12 }
 0x1d2   : > { %2803 = vmatpush3.bf16.msra.mxu1 %v1860_v27  ;;  %v2363_v27 = vld [vmem:[%s4069_s7] ss:$0 sm:$0xff] }
 0x1d3   : > { %2785 = vmatpush3.bf16.msra.mxu0 %v1757_v12  ;;  %2804 = vmatprep.subr.bf16.mxu1 %v3250_v16  ;;  %v1883_v12 = vld [vmem:[#allocation2 + $0xe8] sm:$0xff] }
 0x1d4   : > { %2810 = vmatprep.subr.bf16.mxu0 %v3250_v16 }
 0x1d6   : > { %2787 = vmatmul.mubr.bf16.vlgmr.msra.gmra.mrb[0].mxu0 %v1733_v14  ;;  %2805 = vmatpush3.bf16.msra.mxu1 %v1861_v55 }
 0x1d7   : > { %2811 = vmatpush3.bf16.msra.mxu0 %v1862_v17  ;;  %2826 = vmatprep.mubr.msk.bf16.mxu0 %vm3251_vm2, %v3250_v16 }
 0x1d8   : > { %2812 = vmatprep.subr.bf16.mxu0 %v3250_v16  ;;  %2830 = vmatprep.subr.bf16.mxu1 %v3250_v16 }
 0x1db   : > { %2813 = vmatpush3.bf16.msra.mxu0 %v1863_v42 }
 0x1dc   : > { %2814 = vmatprep.subr.bf16.mxu0 %v3250_v16 }
 0x1df   : > { %2815 = vmatpush3.bf16.msra.mxu0 %v1864_v43 }
 0x1e0   : > { %2816 = vmatprep.subr.bf16.mxu0 %v3250_v16 }
 0x1e3   : > { %2817 = vmatpush3.bf16.msra.mxu0 %v1865_v21 }
 0x1e4   : > { %2818 = vmatprep.subr.bf16.mxu0 %v3250_v16 }
 0x1e7   : > { %2819 = vmatpush3.bf16.msra.mxu0 %v1866_v23 }
 0x1e8   : > { %2820 = vmatprep.subr.bf16.mxu0 %v3250_v16 }
 0x1eb   : > { %2821 = vmatpush3.bf16.msra.mxu0 %v1867_v26 }
 0x1ec   : > { %2822 = vmatprep.subr.bf16.mxu0 %v3250_v16 }
 0x1ef   : > { %2823 = vmatpush3.bf16.msra.mxu0 %v1868_v29  ;;  %v2364_v29 = vld [vmem:[%s421_s13] ss:$0 sm:$0xff]  ;;  %s2100_s13 = sadd.s32 %s3232_s30, %s2366_s18  ;;  %s4087_s30 = sand.u32 1, %s3224_s28  }
 0x1f0   : > { %2824 = vmatprep.subr.bf16.mxu0 %v3250_v16  ;;  %s2367_s22 = sshll.u32 %s2100_s13, 7  ;;  %s4010_s9 = scalar_lea.sflag [#allocation5], %s4087_s30 }
 0x1f1   : > { %s4002_s25 = scalar_lea.hbm %s4070_s8, %s2367_s22 }
 0x1f3   : > { %2825 = vmatpush3.bf16.msra.mxu0 %v1869_v30 }
 0x1f4   : > { %2850 = vmatprep.subr.bf16.mxu0 %v3250_v16 }
 0x2a9   : > { %v2788_v31 = vpop.f32.mrb[0].mxu0 }
 0x2aa   : > { %v1792_v52 = vpop.f32.mrb[1].mxu0  ;;  %v1816_v38 = vadd.f32 %v2788_v31, %v2362_v61 }
 0x2ab   : > { %v2789_v32 = vpop.f32.mrb[2].mxu0  ;;  %v1814_v35 = vadd.f32 %v2362_v61, %v1792_v52 }
 0x2ac   : > { %v1795_v34 = vpop.f32.mrb[3].mxu0  ;;  %v1817_v44 = vadd.f32 %v2789_v32, %v2362_v61 }
 0x2ad   : > { %v1815_v37 = vadd.f32 %v2362_v61, %v1795_v34 }
 0x2af   : > { %v1818_v40 = vadd.f32 %v1815_v37, %v1814_v35 }
 0x2b1   : > { %v1819_v11 = vadd.f32 %v1818_v40, %v1816_v38 }
 0x2b3   : > { %v1820_v45 = vadd.f32 %v1819_v11, %v1817_v44 }
 0x2b5   : > { %v1822_v46 = vmul.f32 0.25, %v1820_v45 }
 0x2b7   : > { %v1827_v15 = vsel %vm1825_vm3, %v1815_v37, %v1822_v46  ;;  %v1826_v47 = vsel %vm1825_vm3, %v1814_v35, %v1822_v46  ;;  %v3960_v48 = vsel %vm1825_vm3, %v1816_v38, %v1822_v46  ;;  %v3962_v28 = vsel %vm1825_vm3, %v1817_v44, %v1822_v46 }
 0x2b8   : > { %v1835_v4 = vmul.f32 0.70710677, %v1827_v15  ;;  %v1834_v33 = vmul.f32 0.70710677, %v1826_v47  ;;  %v1831_v10 = vmul.f32 0.5, %v1827_v15  ;;  %v1830_v53 = vmul.f32 0.5, %v1826_v47 }
 0x2b9   : > { %v1837_v1 = vmul.f32 0.70710677, %v3962_v28  ;;  %v1836_v25 = vmul.f32 0.70710677, %v3960_v48  ;;  %v1833_v18 = vmul.f32 0.5, %v3962_v28  ;;  %v1832_v43 = vmul.f32 0.5, %v3960_v48 }
 0x2ba   : > { %3138 = verf.f32 %v1835_v4 }
 0x2bb   : > { %3140 = verf.f32 %v1834_v33 }
 0x2bc   : > { %3142 = verf.f32 %v1837_v1 }
 0x2bd   : > { %3144 = verf.f32 %v1836_v25 }
 0x2c4   : > { %v3139_v49 = vpop.eup %3138 }
 0x2c5   : > { %v3141_v50 = vpop.eup %3140  ;;  %v1843_v51 = vadd.f32 1.0, %v3139_v49 }
 0x2c6   : > { %v1842_v54 = vadd.f32 1.0, %v3141_v50  ;;  %v3143_v13 = vpop.eup %3142 }
 0x2c7   : > { %v1847_v56 = vmul.f32 %v1843_v51, %v1831_v10  ;;  %v3145_v14 = vpop.eup %3144  ;;  %v1845_v17 = vadd.f32 1.0, %v3143_v13 }
 0x2c8   : > { %v1846_v58 = vmul.f32 %v1842_v54, %v1830_v53  ;;  %v1844_v42 = vadd.f32 1.0, %v3145_v14 }
 0x2c9   : > { %v1851_v59 = vpack.c.bf16 %v1847_v56, %v1847_v56  ;;  %v1849_v21 = vmul.f32 %v1845_v17, %v1833_v18 }
 0x2ca   : > { %v1850_v62 = vpack.c.bf16 %v1846_v58, %v1846_v58  ;;  %v1848_v23 = vmul.f32 %v1844_v42, %v1832_v43 }
 0x2cb   : > { %2827 = vmatmul.mubr.bf16.vlgmr.msra.gmra.mrb[4].mxu0 %v1851_v59  ;;  %v1853_v24 = vpack.c.bf16 %v1849_v21, %v1849_v21 }
 0x2cc   : > { %2807 = vmatmul.mubr.bf16.vlgmr.msra.gmra.mrb[0].mxu1 %v1850_v62  ;;  %2851 = vmatpush3.bf16.msra.mxu0 %v1878_v60  ;;  %v1852_v26 = vpack.c.bf16 %v1848_v23, %v1848_v23 }
 0x2cd   : > { %2831 = vmatpush3.bf16.msra.mxu1 %v1870_v63  ;;  %2852 = vmatprep.subr.bf16.mxu0 %v3250_v16 }
 0x2ce   : > { %2832 = vmatprep.subr.bf16.mxu1 %v3250_v16  ;;  %2846 = vmatprep.mubr.msk.bf16.mxu1 %vm3251_vm2, %v3250_v16 }
 0x2cf   : > { %2866 = vmatprep.mubr.msk.bf16.mxu0 %vm3251_vm2, %v3250_v16 }
 0x2d0   : > { %2853 = vmatpush3.bf16.msra.mxu0 %v1879_v0 }
 0x2d1   : > { %2833 = vmatpush3.bf16.msra.mxu1 %v1871_v20  ;;  %2854 = vmatprep.subr.bf16.mxu0 %v3250_v16 }
 0x2d2   : > { %2834 = vmatprep.subr.bf16.mxu1 %v3250_v16 }
 0x2d4   : > { %2855 = vmatpush3.bf16.msra.mxu0 %v1880_v2 }
 0x2d5   : > { %2835 = vmatpush3.bf16.msra.mxu1 %v1872_v3  ;;  %2856 = vmatprep.subr.bf16.mxu0 %v3250_v16 }
 0x2d6   : > { %2836 = vmatprep.subr.bf16.mxu1 %v3250_v16 }
 0x2d8   : > { %2857 = vmatpush3.bf16.msra.mxu0 %v1881_v5 }
 0x2d9   : > { %2837 = vmatpush3.bf16.msra.mxu1 %v1873_v6  ;;  %2858 = vmatprep.subr.bf16.mxu0 %v3250_v16 }
 0x2da   : > { %2838 = vmatprep.subr.bf16.mxu1 %v3250_v16 }
 0x2dc   : > { %2859 = vmatpush3.bf16.msra.mxu0 %v1882_v7 }
 0x2dd   : > { %2839 = vmatpush3.bf16.msra.mxu1 %v1874_v9  ;;  %2860 = vmatprep.subr.bf16.mxu0 %v3250_v16 }
 0x2de   : > { %2840 = vmatprep.subr.bf16.mxu1 %v3250_v16 }
 0x2e0   : > { %2861 = vmatpush3.bf16.msra.mxu0 %v1883_v12 }
 0x2e1   : > { %2841 = vmatpush3.bf16.msra.mxu1 %v1875_v8  ;;  %2862 = vmatprep.subr.bf16.mxu0 %v3250_v16 }
 0x2e2   : > { %2842 = vmatprep.subr.bf16.mxu1 %v3250_v16 }
 0x2e4   : > { %2863 = vmatpush3.bf16.msra.mxu0 %v1884_v36 }
 0x2e5   : > { %2843 = vmatpush3.bf16.msra.mxu1 %v1876_v39  ;;  %2864 = vmatprep.subr.bf16.mxu0 %v3250_v16 }
 0x2e6   : > { %2844 = vmatprep.subr.bf16.mxu1 %v3250_v16 }
 0x2e8   : > { %2865 = vmatpush3.bf16.msra.mxu0 %v1885_v19 }
 0x2e9   : > { %2845 = vmatpush3.bf16.msra.mxu1 %v1877_v22 }
 0x2eb   : > { %2867 = vmatmul.mubr.bf16.vlgmr.msra.gmra.mrb[8].mxu0 %v1853_v24 }
 0x2ec   : > { %2847 = vmatmul.mubr.bf16.vlgmr.msra.gmra.mrb[4].mxu1 %v1852_v26 }
 0x39e   : > { %v1967_v55 = vpop.f32.mrb[4].mxu0 }
 0x39f   : > { %v1927_v30 = vpop.f32.mrb[0].mxu1  ;;  %v1968_v16 = vadd.f32 %v2363_v27, %v1967_v55  ;;  %v2828_v31 = vpop.f32.mrb[5].mxu0 }
 0x3a0   : > { %v1928_v61 = vadd.f32 %v2363_v27, %v1927_v30  ;;  %v2808_v52 = vpop.f32.mrb[1].mxu1  ;;  %v1970_v32 = vpop.f32.mrb[6].mxu0 }
 0x3a1   : > { %v2061_v34 = vadd.f32 %v2364_v29, %v1968_v16  ;;  %v1930_v57 = vpop.f32.mrb[2].mxu1  ;;  %v2829_v35 = vpop.f32.mrb[7].mxu0 }
 0x3a2   : > { %v2060_v37 = vadd.f32 %v2364_v29, %v1928_v61  ;;  %v2809_v38 = vpop.f32.mrb[3].mxu1 }
 0x3a3   : > { %v2069_v40 = vmul.f32 0.70710677, %v2061_v34  ;;  %v2065_v45 = vmul.f32 0.5, %v2061_v34 }
 0x3a4   : > { %v2068_v41 = vmul.f32 0.70710677, %v2060_v37  ;;  %v2064_v15 = vmul.f32 0.5, %v2060_v37 }
 0x3a5   : > { %3146 = verf.f32 %v2069_v40 }
 0x3a6   : > { %3148 = verf.f32 %v2068_v41 }
 0x3af   : > { %v3147_v44 = vpop.eup %3146 }
 0x3b0   : > { %v3149_v11 = vpop.eup %3148  ;;  %v2077_v46 = vadd.f32 1.0, %v3147_v44 }
 0x3b1   : > { %v2076_v47 = vadd.f32 1.0, %v3149_v11 }
 0x3b2   : > { %v2081_v48 = vmul.f32 %v2077_v46, %v2065_v45 }
 0x3b3   : > { %v2080_v28 = vmul.f32 %v2076_v47, %v2064_v15 }
 0x3b4   : > { %2085 = vst [vmem:[%s3410_s10 + $0x8] sm:$0xff] %v2081_v48 }
 0x3b5   : > { %2084 = vst [vmem:[%s3410_s10] sm:$0xff] %v2080_v28 }
 0x3be   : > { %v2047_v4 = vpop.f32.mrb[8].mxu0 }
 0x3bf   : > { %v2007_v33 = vpop.f32.mrb[4].mxu1  ;;  %v2048_v49 = vadd.f32 %v2363_v27, %v2047_v4  ;;  %v2868_v50 = vpop.f32.mrb[9].mxu0 }
 0x3c0   : > { %v2008_v10 = vadd.f32 %v2363_v27, %v2007_v33  ;;  %v2848_v51 = vpop.f32.mrb[5].mxu1  ;;  %v2050_v53 = vpop.f32.mrb[10].mxu0 }
 0x3c1   : > { %v2063_v54 = vadd.f32 %v2364_v29, %v2048_v49  ;;  %v2010_v56 = vpop.f32.mrb[6].mxu1  ;;  %v2869_v58 = vpop.f32.mrb[11].mxu0 }
 0x3c2   : > { %v2062_v59 = vadd.f32 %v2364_v29, %v2008_v10  ;;  %v2849_v60 = vpop.f32.mrb[7].mxu1 }
 0x3c3   : > { %v2071_v62 = vmul.f32 0.70710677, %v2063_v54  ;;  %v2067_v1 = vmul.f32 0.5, %v2063_v54 }
 0x3c4   : > { %v2070_v63 = vmul.f32 0.70710677, %v2062_v59  ;;  %v2066_v25 = vmul.f32 0.5, %v2062_v59 }
 0x3c5   : > { %3150 = verf.f32 %v2071_v62 }
 0x3c6   : > { %3152 = verf.f32 %v2070_v63 }
 0x3cf   : > { %v3151_v0 = vpop.eup %3150 }
 0x3d0   : > { %v3153_v20 = vpop.eup %3152  ;;  %v2079_v2 = vadd.f32 1.0, %v3151_v0 }
 0x3d1   : > { %v2078_v3 = vadd.f32 1.0, %v3153_v20 }
 0x3d2   : > { %v2083_v5 = vmul.f32 %v2079_v2, %v2067_v1 }
 0x3d3   : > { %v2082_v6 = vmul.f32 %v2078_v3, %v2066_v25 }
 0x3d4   : > { %2087 = vst [vmem:[%s3410_s10 + $0x18] sm:$0xff] %v2083_v5 }
 0x3d5   : > { %2086 = vst [vmem:[%s3410_s10 + $0x10] sm:$0xff] %v2082_v6 }
 0x3d6   : > { %3167 = shalt.err (!%p3164_p11)
}
 0x3d7   : > { %s3168_s10 = scalar_lea.hbm %s4002_s25, 512  ;;  %s3172_s18 = scalar_lea.hbm %s4070_s8, 2048 }
 0x3d8   : > { %p3169_p12 = scmp.ne.s32.totalorder %s4002_s25, %s3168_s10  ;;  %p3173_p1 = scmp.lt.u32.totalorder %s4002_s25, %s4070_s8 }
 0x3d9   : > { %p3174_p2 = scmp.lt.u32.totalorder %s3172_s18, %s3168_s10  ;;  %p3176_p4 = scmp.lt.u32.totalorder %s3168_s10, %s4002_s25 }
 0x3da   : > { %p3170_p13 = pnand %p3169_p12, %p3361_p8 }
 0x3db   : > { %p3175_p3 = por %p3174_p2, %p3173_p1 }
 0x3dc   : > { %p3171_p0 = pneg %p3170_p13 }
 0x3dd   : > { %p3177_p5 = por %p3176_p4, %p3175_p3 }
 0x3df   : > { %p3178_p6 = pnand %p3177_p5, %p3171_p0 }
 0x3e1   : > { %3181 = shalt.err (!%p3178_p6)
}
 0x3e2   : > { %s3253_s16 = smov 128   ;;  %s3254_s23 = smov 256  }
 0x3e3   : > { %s3255_s30 = smov 8  }
 0x3e4   : > { %3062 = dma.vmem_to_hbm [thread:$0]  (%p3361_p8), %s4004_s0, 512, %s4002_s25, %s4010_s9, %s3253_s16, %s3254_s23, %s3255_s30  }
 0x3e5 PF: > { %p3068_p7 = scmp.ge.s32.totalorder %s3248_s12, 2  ;;  %s2118_s15 = sand.u32 1, %s3220_s27  }
 0x3e6   : > { %s2119_s11 = scalar_lea.sflag [#allocation5], %s2118_s15 }
 0x3e7   : > { %p3065_p10 = pnand %p3068_p7, %p3365_p9 }
 0x3e9   : > { %3215 = dma.done.wait (!%p3065_p10), %s2119_s11, 512  }
 0x3ea   : > { %3217 = vsyncadd (!%p3065_p10), %s2119_s11, 4294966784  ;;  %s21_s12 = sadd.s32 1, %s3248_s12   ;;  %s4088_s30 = sld [smem:[#allocation7_spill]] }
 0x3eb   : > { %p18_p11 = scmp.ge.s32.totalorder %s21_s12, 6   ;;  %s4089_s9 = sld [smem:[#allocation8_spill]] }
 0x3ec   : > { %s4090_s10 = sld [smem:[#allocation9_spill]]  ;;  %s4091_s11 = sld [smem:[#allocation10_spill]] }
 0x3ed   : > { %s4092_s27 = smov %s3224_s28  ;;  %s4093_s28 = smov %s3228_s29 }
 0x3ee   : > { %s4094_s29 = smov %s3373_s24  ;;  %20 = sbr.rel (!%p18_p11) target bundleno = 7 (0x7), region = 143 }
 0x3f5   :  { %2124 = vsyncpa [#allocation5], 1 }
 0x3f6   :  { %2126 = vsyncpa [#allocation5 + $0x1], 1 }

</bundles_post_ra>
